<compile_context>
chip_gen: v6e
topology: v6e:2x2x1
jax: 0.10.0
libtpu: 0.0.40
codegen_flags: <defaults>
</compile_context>

<pallas_src>
import math
import functools

import jax
import jax.numpy as jnp
from jax import lax
from jax.experimental import pallas as pl
from jax.experimental.pallas import tpu as pltpu

NEG = -1e30  # stands in for float('-inf') in masks; mask math stays f32


def _tile(dim, cap, mult):
    """Largest block t <= cap that divides dim and is a multiple of `mult`.
    Falls back to the full dim (a full-extent block is always legal)."""
    if dim <= cap:
        return dim
    t = (cap // mult) * mult
    while t >= mult:
        if dim % t == 0:
            return t
        t -= mult
    return dim


def _cparams(semantics, vmem_mb=48):
    # 48 MiB scoped budget: safe on v7x's 64 MiB physical, generous on v5e/v6e.
    return pltpu.CompilerParams(dimension_semantics=semantics,
                                vmem_limit_bytes=vmem_mb << 20)


# ----------------------------- Linear kernels -----------------------------

def _matmul_kernel(x_ref, w_ref, b_ref, o_ref, acc_ref):
    @pl.when(pl.program_id(2) == 0)
    def _():
        acc_ref[...] = jnp.zeros_like(acc_ref)

    acc_ref[...] += jnp.dot(x_ref[...], w_ref[...],
                            preferred_element_type=jnp.float32)

    @pl.when(pl.program_id(2) == pl.num_programs(2) - 1)
    def _():
        o_ref[...] = (acc_ref[...] + b_ref[...]).astype(o_ref.dtype)


def linear(x, w, b, out_dtype=None, tm=512, tn=512, tk=512):
    """y = x @ w + b.  x: (M,K) bf16, w: (K,N) bf16 pre-transposed, b: (N,) f32."""
    M, K = x.shape
    N = w.shape[1]
    if out_dtype is None:
        out_dtype = x.dtype
    tm = _tile(M, tm, 8)
    tn = _tile(N, tn, 128)
    tk = _tile(K, tk, 128)
    return pl.pallas_call(
        _matmul_kernel,
        out_shape=jax.ShapeDtypeStruct((M, N), out_dtype),
        grid=(M // tm, N // tn, K // tk),
        in_specs=[
            pl.BlockSpec((tm, tk), lambda i, j, k: (i, k)),
            pl.BlockSpec((tk, tn), lambda i, j, k: (k, j)),
            pl.BlockSpec((1, tn), lambda i, j, k: (0, j)),
        ],
        out_specs=pl.BlockSpec((tm, tn), lambda i, j, k: (i, j)),
        scratch_shapes=[pltpu.VMEM((tm, tn), jnp.float32)],
        compiler_params=_cparams(("parallel", "parallel", "arbitrary")),
    )(x, w, b.reshape(1, N))


def _matmul_add_ln_kernel(x_ref, w_ref, b_ref, r_ref, g_ref, bb_ref,
                          o_ref, acc_ref, *, eps):
    @pl.when(pl.program_id(1) == 0)
    def _():
        acc_ref[...] = jnp.zeros_like(acc_ref)

    acc_ref[...] += jnp.dot(x_ref[...], w_ref[...],
                            preferred_element_type=jnp.float32)

    @pl.when(pl.program_id(1) == pl.num_programs(1) - 1)
    def _():
        z = acc_ref[...] + b_ref[...] + r_ref[...].astype(jnp.float32)
        mu = jnp.mean(z, axis=-1, keepdims=True)
        var = jnp.mean(jnp.square(z - mu), axis=-1, keepdims=True)
        zn = (z - mu) * lax.rsqrt(var + eps)
        o_ref[...] = (zn * g_ref[...] + bb_ref[...]).astype(o_ref.dtype)


def linear_add_ln(x, w, b, res, gamma, beta, eps=1e-5, tm=256, tk=512):
    """y = LayerNorm(x @ w + b + res) over last dim.  N = E kept un-tiled."""
    M, K = x.shape
    N = w.shape[1]
    tm = _tile(M, tm, 8)
    tk = _tile(K, tk, 128)
    return pl.pallas_call(
        functools.partial(_matmul_add_ln_kernel, eps=eps),
        out_shape=jax.ShapeDtypeStruct((M, N), x.dtype),
        grid=(M // tm, K // tk),
        in_specs=[
            pl.BlockSpec((tm, tk), lambda i, k: (i, k)),
            pl.BlockSpec((tk, N), lambda i, k: (k, 0)),
            pl.BlockSpec((1, N), lambda i, k: (0, 0)),
            pl.BlockSpec((tm, N), lambda i, k: (i, 0)),
            pl.BlockSpec((1, N), lambda i, k: (0, 0)),
            pl.BlockSpec((1, N), lambda i, k: (0, 0)),
        ],
        out_specs=pl.BlockSpec((tm, N), lambda i, k: (i, 0)),
        scratch_shapes=[pltpu.VMEM((tm, N), jnp.float32)],
        compiler_params=_cparams(("parallel", "arbitrary")),
    )(x, w, b.reshape(1, N), res, gamma.reshape(1, N), beta.reshape(1, N))


def _ffn_ln_kernel(x_ref, w1_ref, b1_ref, w2_ref, b2_ref, g_ref, bt_ref,
                   o_ref, acc_ref, *, eps):
    @pl.when(pl.program_id(1) == 0)
    def _():
        acc_ref[...] = jnp.zeros_like(acc_ref)

    # relu is elementwise per hidden unit, so the F axis tiles cleanly:
    # each chunk contributes additively to the second matmul.
    h = jnp.dot(x_ref[...], w1_ref[...],
                preferred_element_type=jnp.float32) + b1_ref[...]
    h = jnp.maximum(h, 0.0)
    acc_ref[...] += jnp.dot(h.astype(w2_ref.dtype), w2_ref[...],
                            preferred_element_type=jnp.float32)

    @pl.when(pl.program_id(1) == pl.num_programs(1) - 1)
    def _():
        z = acc_ref[...] + b2_ref[...] + x_ref[...].astype(jnp.float32)
        mu = jnp.mean(z, axis=-1, keepdims=True)
        var = jnp.mean(jnp.square(z - mu), axis=-1, keepdims=True)
        zn = (z - mu) * lax.rsqrt(var + eps)
        o_ref[...] = (zn * g_ref[...] + bt_ref[...]).astype(o_ref.dtype)


def ffn_ln(x, w1, b1, w2, b2, gamma, beta, eps=1e-5, tm=256, tf=512):
    """y = LayerNorm(relu(x@w1+b1) @ w2 + b2 + x), F-tiled with f32 accumulator."""
    M, E = x.shape
    F = w1.shape[1]
    tm = _tile(M, tm, 8)
    tf = _tile(F, tf, 128)
    return pl.pallas_call(
        functools.partial(_ffn_ln_kernel, eps=eps),
        out_shape=jax.ShapeDtypeStruct((M, E), x.dtype),
        grid=(M // tm, F // tf),
        in_specs=[
            pl.BlockSpec((tm, E), lambda i, f: (i, 0)),
            pl.BlockSpec((E, tf), lambda i, f: (0, f)),
            pl.BlockSpec((1, tf), lambda i, f: (0, f)),
            pl.BlockSpec((tf, E), lambda i, f: (f, 0)),
            pl.BlockSpec((1, E), lambda i, f: (0, 0)),
            pl.BlockSpec((1, E), lambda i, f: (0, 0)),
            pl.BlockSpec((1, E), lambda i, f: (0, 0)),
        ],
        out_specs=pl.BlockSpec((tm, E), lambda i, f: (i, 0)),
        scratch_shapes=[pltpu.VMEM((tm, E), jnp.float32)],
        compiler_params=_cparams(("parallel", "arbitrary")),
    )(x, w1, b1.reshape(1, F), w2, b2.reshape(1, E),
      gamma.reshape(1, E), beta.reshape(1, E))


def _ln_kernel(x_ref, g_ref, b_ref, o_ref, *, eps):
    z = x_ref[...].astype(jnp.float32)
    mu = jnp.mean(z, axis=-1, keepdims=True)
    var = jnp.mean(jnp.square(z - mu), axis=-1, keepdims=True)
    zn = (z - mu) * lax.rsqrt(var + eps)
    o_ref[...] = (zn * g_ref[...] + b_ref[...]).astype(o_ref.dtype)


def layer_norm(x, gamma, beta, eps=1e-5, tm=256):
    M, E = x.shape
    tm = _tile(M, tm, 8)
    return pl.pallas_call(
        functools.partial(_ln_kernel, eps=eps),
        out_shape=jax.ShapeDtypeStruct((M, E), x.dtype),
        grid=(M // tm,),
        in_specs=[
            pl.BlockSpec((tm, E), lambda i: (i, 0)),
            pl.BlockSpec((1, E), lambda i: (0, 0)),
            pl.BlockSpec((1, E), lambda i: (0, 0)),
        ],
        out_specs=pl.BlockSpec((tm, E), lambda i: (i, 0)),
        compiler_params=_cparams(("parallel",)),
    )(x, gamma.reshape(1, E), beta.reshape(1, E))


# ----------------------------- Attention kernels -----------------------------

def _attend_heads(q, k, v, bias, o_ref, n_heads):
    """q: (tq,E) bf16 (pre-scaled), k/v: (S,E) bf16, bias: f32 broadcastable to
    (tq,S).  Each head's result is stored directly into its lane slice of
    o_ref — no concatenate, no transpose (NT dot_general)."""
    E = q.shape[-1]
    dh = E // n_heads
    # TODO(synk): heads could be packed into one batched dot_general when dh is
    # a 128-multiple to fill the MXU contraction width.
    for h in range(n_heads):
        sl = slice(h * dh, (h + 1) * dh)
        s = lax.dot_general(q[:, sl], k[:, sl],
                            (((1,), (1,)), ((), ())),
                            preferred_element_type=jnp.float32)       # (tq, S)
        s = s + bias
        m = jnp.max(s, axis=-1, keepdims=True)
        p = jnp.exp(s - m)
        inv = pl.reciprocal(jnp.sum(p, axis=-1, keepdims=True), approx=True)
        out_h = jnp.dot(p.astype(v.dtype), v[:, sl],
                        preferred_element_type=jnp.float32) * inv     # (tq, dh)
        o_ref[0, :, sl] = out_h.astype(o_ref.dtype)


def _self_attn_kernel(q_ref, kv_ref, mask_ref, kpm_ref, o_ref, *, n_heads, scale):
    E = o_ref.shape[-1]
    # softmax scale folded into q once per tile (not per head / per score elem)
    q = (q_ref[0][:, :E].astype(jnp.float32) * scale).astype(jnp.bfloat16)
    kv = kv_ref[0]                                  # (S, 3E) resident per batch
    k = kv[:, E:2 * E]
    v = kv[:, 2 * E:]
    bias = mask_ref[...] + kpm_ref[0]               # f32 (tq,S); NEG sums stay finite
    _attend_heads(q, k, v, bias, o_ref, n_heads)


def _cross_attn_kernel(q_ref, kv_ref, kpm_ref, o_ref, *, n_heads, scale):
    E = o_ref.shape[-1]
    q = (q_ref[0].astype(jnp.float32) * scale).astype(jnp.bfloat16)
    kv = kv_ref[0]                                  # (S, 2E)
    k, v = kv[:, :E], kv[:, E:]
    _attend_heads(q, k, v, kpm_ref[0], o_ref, n_heads)   # memory_mask is None


def attention_self(qkv, attn_bias, kpm_bias, n_heads):
    """qkv: (B,L,3E) bf16 packed, attn_bias: (L,L) f32, kpm_bias: (B,1,L) f32."""
    B, L, E3 = qkv.shape
    E = E3 // 3
    scale = 1.0 / math.sqrt(E // n_heads)
    tq = _tile(L, 256, 8)
    return pl.pallas_call(
        functools.partial(_self_attn_kernel, n_heads=n_heads, scale=scale),
        out_shape=jax.ShapeDtypeStruct((B, L, E), qkv.dtype),
        grid=(B, L // tq),
        in_specs=[
            pl.BlockSpec((1, tq, E3), lambda b, qi: (b, qi, 0)),   # q rows (tiled)
            pl.BlockSpec((1, L, E3), lambda b, qi: (b, 0, 0)),     # K/V, resident per batch
            pl.BlockSpec((tq, L), lambda b, qi: (qi, 0)),          # additive attn mask slice
            pl.BlockSpec((1, 1, L), lambda b, qi: (b, 0, 0)),      # key-padding bias
        ],
        out_specs=pl.BlockSpec((1, tq, E), lambda b, qi: (b, qi, 0)),
        compiler_params=_cparams(("parallel", "parallel")),
    )(qkv, qkv, attn_bias, kpm_bias)


def attention_cross(q, kv, kpm_bias, n_heads):
    """q: (B,T,E) bf16, kv: (B,S,2E) bf16 packed, kpm_bias: (B,1,S) f32."""
    B, T, E = q.shape
    S = kv.shape[1]
    scale = 1.0 / math.sqrt(E // n_heads)
    tq = _tile(T, 256, 8)
    return pl.pallas_call(
        functools.partial(_cross_attn_kernel, n_heads=n_heads, scale=scale),
        out_shape=jax.ShapeDtypeStruct((B, T, E), q.dtype),
        grid=(B, T // tq),
        in_specs=[
            pl.BlockSpec((1, tq, E), lambda b, qi: (b, qi, 0)),
            pl.BlockSpec((1, S, 2 * E), lambda b, qi: (b, 0, 0)),
            pl.BlockSpec((1, 1, S), lambda b, qi: (b, 0, 0)),
        ],
        out_specs=pl.BlockSpec((1, tq, E), lambda b, qi: (b, qi, 0)),
        compiler_params=_cparams(("parallel", "parallel")),
    )(q, kv, kpm_bias)


# ----------------------------- Model pieces -----------------------------

def make_pos_encoding(maxlen, emb_size):
    den = jnp.exp(-jnp.arange(0, emb_size, 2, dtype=jnp.float32)
                  * math.log(10000.0) / emb_size)
    pos = jnp.arange(0, maxlen, dtype=jnp.float32).reshape(maxlen, 1)
    pe = jnp.zeros((maxlen, emb_size), jnp.float32)
    pe = pe.at[:, 0::2].set(jnp.sin(pos * den))
    pe = pe.at[:, 1::2].set(jnp.cos(pos * den))
    return pe  # (maxlen, E)


def embed_pe(tokens_bf, emb_table, pe_table, emb_size):
    # TokenEmbedding * sqrt(E) + PositionalEncoding (dropout = identity in eval).
    # TODO(synk): kept in plain JAX (row gather + broadcast add); a separate
    # pallas_call here only blocks XLA fusion.
    B, L = tokens_bf.shape
    emb = jnp.take(emb_table, tokens_bf, axis=0) * math.sqrt(emb_size)
    return (emb + pe_table[None, :L, :]).astype(jnp.bfloat16)


def _kpm_bias(mask, B, S):
    """key_padding_mask (B,S) bool -> additive f32 bias (B,1,S)."""
    if mask is None:
        return jnp.zeros((B, 1, S), jnp.float32)
    return jnp.where(mask, NEG, 0.0).astype(jnp.float32).reshape(B, 1, S)


def encoder_layer(p, x, attn_bias, kpm_bias, n_heads):
    B, S, E = x.shape
    M = B * S
    x2 = x.reshape(M, E)
    sa = p["sa"]
    qkv = linear(x2, sa["w_qkv"], sa["b_qkv"]).reshape(B, S, 3 * E)
    a = attention_self(qkv, attn_bias, kpm_bias, n_heads).reshape(M, E)
    x2 = linear_add_ln(a, sa["w_out"], sa["b_out"], x2, p["ln1_g"], p["ln1_b"])
    x2 = ffn_ln(x2, p["w1"], p["b1"], p["w2"], p["b2"], p["ln2_g"], p["ln2_b"])
    return x2.reshape(B, S, E)


def decoder_layer(p, x, mem, tgt_bias, tgt_kpm, mem_kpm, n_heads):
    B, T, E = x.shape
    S = mem.shape[1]
    M = B * T
    x2 = x.reshape(M, E)
    sa, ca = p["sa"], p["ca"]
    # self-attention (causal + tgt key padding)
    qkv = linear(x2, sa["w_qkv"], sa["b_qkv"]).reshape(B, T, 3 * E)
    a = attention_self(qkv, tgt_bias, tgt_kpm, n_heads).reshape(M, E)
    x2 = linear_add_ln(a, sa["w_out"], sa["b_out"], x2, p["ln1_g"], p["ln1_b"])
    # cross-attention (memory key padding)
    q = linear(x2, ca["w_q"], ca["b_q"]).reshape(B, T, E)
    kv = linear(mem.reshape(B * S, E), ca["w_kv"], ca["b_kv"]).reshape(B, S, 2 * E)
    c = attention_cross(q, kv, mem_kpm, n_heads).reshape(M, E)
    x2 = linear_add_ln(c, ca["w_out"], ca["b_out"], x2, p["ln2_g"], p["ln2_b"])
    # feed-forward
    x2 = ffn_ln(x2, p["w1"], p["b1"], p["w2"], p["b2"], p["ln3_g"], p["ln3_b"])
    return x2.reshape(B, T, E)


def seq2seq_forward(params, x, y, src_mask, tgt_mask,
                    src_padding_mask, tgt_padding_mask, memory_key_padding_mask,
                    *, n_heads):
    E = params["src_emb"].shape[1]
    S, B = x.shape
    T, _ = y.shape

    # batch-first internal layout (B, L, E): avoids inter-kernel transposes
    src = embed_pe(x.T, params["src_emb"], params["pe"], E)      # (B, S, E) bf16
    tgt = embed_pe(y.T, params["tgt_emb"], params["pe"], E)      # (B, T, E) bf16

    # mask / bias arithmetic stays f32 (NEG sums must remain finite)
    src_kpm = _kpm_bias(src_padding_mask, B, S)
    tgt_kpm = _kpm_bias(tgt_padding_mask, B, T)
    mem_kpm = _kpm_bias(memory_key_padding_mask, B, S)
    src_bias = (src_mask.astype(jnp.float32) if src_mask is not None
                else jnp.zeros((S, S), jnp.float32))
    tgt_bias = (tgt_mask.astype(jnp.float32) if tgt_mask is not None
                else jnp.zeros((T, T), jnp.float32))

    # encoder
    mem = src
    for lp in params["enc_layers"]:
        mem = encoder_layer(lp, mem, src_bias, src_kpm, n_heads)
    mem = layer_norm(mem.reshape(B * S, E),
                     params["enc_norm_g"], params["enc_norm_b"]).reshape(B, S, E)

    # decoder
    out = tgt
    for lp in params["dec_layers"]:
        out = decoder_layer(lp, out, mem, tgt_bias, tgt_kpm, mem_kpm, n_heads)
    out = layer_norm(out.reshape(B * T, E),
                     params["dec_norm_g"], params["dec_norm_b"])

    # generator (vocab projection): bf16 matmul, f32 logits out
    V = params["gen_w"].shape[1]
    logits = linear(out, params["gen_w"], params["gen_b"], out_dtype=jnp.float32)
    return logits.reshape(B, T, V).transpose(1, 0, 2)             # (T, B, V) seq-first


# ----------------------------- Parameter init -----------------------------
# Weight matrices stored pre-transposed as (in, out) in bfloat16 (MXU operands);
# biases / LayerNorm params / embedding tables stay f32.

def _w(key, shape, scale=0.05):
    return (scale * jax.random.normal(key, shape, jnp.float32)).astype(jnp.bfloat16)


def init_mha_self(key, E):
    k1, k2, k3, k4 = jax.random.split(key, 4)
    return {
        "w_qkv": _w(k1, (E, 3 * E)),
        "b_qkv": 0.02 * jax.random.normal(k2, (3 * E,), jnp.float32),
        "w_out": _w(k3, (E, E)),
        "b_out": 0.02 * jax.random.normal(k4, (E,), jnp.float32),
    }


def init_mha_cross(key, E):
    k1, k2, k3, k4, k5, k6 = jax.random.split(key, 6)
    return {
        "w_q": _w(k1, (E, E)),
        "b_q": 0.02 * jax.random.normal(k2, (E,), jnp.float32),
        "w_kv": _w(k3, (E, 2 * E)),
        "b_kv": 0.02 * jax.random.normal(k4, (2 * E,), jnp.float32),
        "w_out": _w(k5, (E, E)),
        "b_out": 0.02 * jax.random.normal(k6, (E,), jnp.float32),
    }


def init_ffn_ln(key, E, F, n_ln):
    k1, k2 = jax.random.split(key, 2)
    d = {
        "w1": _w(k1, (E, F)),
        "b1": jnp.zeros((F,), jnp.float32),
        "w2": _w(k2, (F, E)),
        "b2": jnp.zeros((E,), jnp.float32),
    }
    for i in range(1, n_ln + 1):
        d[f"ln{i}_g"] = jnp.ones((E,), jnp.float32)
        d[f"ln{i}_b"] = jnp.zeros((E,), jnp.float32)
    return d


def init_params(key, src_vocab, tgt_vocab, E, F, n_layers, maxlen=5000):
    keys = jax.random.split(key, 4 + 2 * n_layers)
    params = {
        "src_emb": 0.05 * jax.random.normal(keys[0], (src_vocab, E), jnp.float32),
        "tgt_emb": 0.05 * jax.random.normal(keys[1], (tgt_vocab, E), jnp.float32),
        "pe": make_pos_encoding(maxlen, E),
        "enc_norm_g": jnp.ones((E,), jnp.float32),
        "enc_norm_b": jnp.zeros((E,), jnp.float32),
        "dec_norm_g": jnp.ones((E,), jnp.float32),
        "dec_norm_b": jnp.zeros((E,), jnp.float32),
        "gen_w": _w(keys[2], (E, tgt_vocab)),
        "gen_b": jnp.zeros((tgt_vocab,), jnp.float32),
    }
    enc_layers, dec_layers = [], []
    for li in range(n_layers):
        ka, kb = jax.random.split(keys[3 + li], 2)
        lp = {"sa": init_mha_self(ka, E)}
        lp.update(init_ffn_ln(kb, E, F, n_ln=2))
        enc_layers.append(lp)
    for li in range(n_layers):
        ka, kb, kc = jax.random.split(keys[3 + n_layers + li], 3)
        lp = {"sa": init_mha_self(ka, E), "ca": init_mha_cross(kb, E)}
        lp.update(init_ffn_ln(kc, E, F, n_ln=3))
        dec_layers.append(lp)
    params["enc_layers"] = enc_layers
    params["dec_layers"] = dec_layers
    return params


# ----------------------------- Main -----------------------------

if __name__ == "__main__":
    # small config consistent with the module defaults (scaled down);
    # E = 128 keeps attention / LN outputs lane-dense.
    SRC_VOCAB, TGT_VOCAB = 48, 64
    E, N_HEADS, FF_DIM, N_LAYERS = 128, 4, 256, 2
    S, T, B = 8, 8, 2

    key = jax.random.PRNGKey(0)
    kp, kx, ky = jax.random.split(key, 3)

    params = init_params(kp, SRC_VOCAB, TGT_VOCAB, E, FF_DIM, N_LAYERS, maxlen=64)

    x = jax.random.randint(kx, (S, B), 1, SRC_VOCAB, dtype=jnp.int32)   # (S, B) seq-first
    y = jax.random.randint(ky, (T, B), 1, TGT_VOCAB, dtype=jnp.int32)   # (T, B)

    # masks (PyTorch conventions)
    src_mask = jnp.zeros((S, S), jnp.float32)
    causal = jnp.triu(jnp.ones((T, T), jnp.bool_), k=1)
    tgt_mask = jnp.where(causal, NEG, 0.0).astype(jnp.float32)
    src_padding_mask = jnp.zeros((B, S), jnp.bool_).at[1, S - 1].set(True)  # True = pad
    tgt_padding_mask = jnp.zeros((B, T), jnp.bool_).at[1, T - 1].set(True)
    memory_key_padding_mask = src_padding_mask

    fwd = jax.jit(functools.partial(seq2seq_forward, n_heads=N_HEADS))
    logits = fwd(params, x, y, src_mask, tgt_mask,
                 src_padding_mask, tgt_padding_mask, memory_key_padding_mask)
    logits = jax.block_until_ready(logits)

    assert logits.shape == (T, B, TGT_VOCAB), logits.shape
    assert logits.dtype == jnp.float32
    assert bool(jnp.all(jnp.isfinite(logits)))
    print("KERNEL_OK")
</pallas_src>

<mosaic_0001>
module attributes {stable_mosaic.version = 11 : i64} {
  func.func @_matmul_add_ln_kernel(%arg0: i32, %arg1: i32, %arg2: memref<16x128xbf16, #tpu.memory_space<vmem>>, %arg3: memref<128x128xbf16, #tpu.memory_space<vmem>>, %arg4: memref<1x128xf32, #tpu.memory_space<vmem>>, %arg5: memref<16x128xbf16, #tpu.memory_space<vmem>>, %arg6: memref<1x128xf32, #tpu.memory_space<vmem>>, %arg7: memref<1x128xf32, #tpu.memory_space<vmem>>, %arg8: memref<16x128xbf16, #tpu.memory_space<vmem>>, %arg9: memref<16x128xf32, #tpu.memory_space<vmem>>) attributes {dimension_semantics = [#tpu.dimension_semantics<parallel>, #tpu.dimension_semantics<arbitrary>], iteration_bounds = array<i64: 1, 1>, scalar_prefetch = 0 : i64, scratch_operands = 1 : i64, tpu.core_type = #tpu.core_type<tc>, window_params = [{transform_indices = @transform_0, window_bounds = array<i64: 16, 128>}, {transform_indices = @transform_1, window_bounds = array<i64: 128, 128>}, {pipeline_mode = #tpu.pipeline_mode<synchronous>, transform_indices = @transform_2, window_bounds = array<i64: 1, 128>}, {transform_indices = @transform_3, window_bounds = array<i64: 16, 128>}, {pipeline_mode = #tpu.pipeline_mode<synchronous>, transform_indices = @transform_4, window_bounds = array<i64: 1, 128>}, {pipeline_mode = #tpu.pipeline_mode<synchronous>, transform_indices = @transform_5, window_bounds = array<i64: 1, 128>}, {transform_indices = @transform_6, window_bounds = array<i64: 16, 128>}]} {
    %c0_i32 = arith.constant 0 : i32
    %0 = arith.cmpi eq, %arg1, %c0_i32 : i32
    %1 = arith.extui %0 : i1 to i32
    %c0_i32_0 = arith.constant 0 : i32
    %2 = arith.cmpi ne, %1, %c0_i32_0 : i32
    scf.if %2 {
      %cst_10 = arith.constant 0.000000e+00 : f32
      %12 = vector.broadcast %cst_10 : f32 to vector<16x128xf32>
      %c0_11 = arith.constant 0 : index
      %c0_12 = arith.constant 0 : index
      %13 = vector.load %arg9[%c0_11, %c0_12] : memref<16x128xf32, #tpu.memory_space<vmem>>, vector<16x128xf32>
      tpu.vector_store %arg9[%c0_11, %c0_12], %12 {strides = array<i32>} : memref<16x128xf32, #tpu.memory_space<vmem>>, vector<16x128xf32>,
    } else {
    }
    %c0 = arith.constant 0 : index
    %c0_1 = arith.constant 0 : index
    %3 = vector.load %arg9[%c0, %c0_1] : memref<16x128xf32, #tpu.memory_space<vmem>>, vector<16x128xf32>
    %c0_2 = arith.constant 0 : index
    %c0_3 = arith.constant 0 : index
    %4 = vector.load %arg2[%c0_2, %c0_3] : memref<16x128xbf16, #tpu.memory_space<vmem>>, vector<16x128xbf16>
    %c0_4 = arith.constant 0 : index
    %c0_5 = arith.constant 0 : index
    %5 = vector.load %arg3[%c0_4, %c0_5] : memref<128x128xbf16, #tpu.memory_space<vmem>>, vector<128x128xbf16>
    %cst = arith.constant dense<0.000000e+00> : vector<16x128xf32>
    %6 = tpu.matmul %4, %5, %cst {dimension_numbers = #tpu.dot_dimension_numbers<[1], [0], [0], [1], [0, 0, 1, 1], [], []>} : vector<16x128xbf16>, vector<128x128xbf16>, vector<16x128xf32> -> vector<16x128xf32>
    %7 = arith.addf %3, %6 : vector<16x128xf32>
    %c0_6 = arith.constant 0 : index
    %c0_7 = arith.constant 0 : index
    %8 = vector.load %arg9[%c0_6, %c0_7] : memref<16x128xf32, #tpu.memory_space<vmem>>, vector<16x128xf32>
    tpu.vector_store %arg9[%c0_6, %c0_7], %7 {strides = array<i32>} : memref<16x128xf32, #tpu.memory_space<vmem>>, vector<16x128xf32>,
    %c0_i32_8 = arith.constant 0 : i32
    %9 = arith.cmpi eq, %arg1, %c0_i32_8 : i32
    %10 = arith.extui %9 : i1 to i32
    %c0_i32_9 = arith.constant 0 : i32
    %11 = arith.cmpi ne, %10, %c0_i32_9 : i32
    scf.if %11 {
      %c0_10 = arith.constant 0 : index
      %c0_11 = arith.constant 0 : index
      %12 = vector.load %arg9[%c0_10, %c0_11] : memref<16x128xf32, #tpu.memory_space<vmem>>, vector<16x128xf32>
      %c0_12 = arith.constant 0 : index
      %c0_13 = arith.constant 0 : index
      %13 = vector.load %arg4[%c0_12, %c0_13] : memref<1x128xf32, #tpu.memory_space<vmem>>, vector<1x128xf32>
      %14 = vector.broadcast %13 : vector<1x128xf32> to vector<16x128xf32>
      %15 = arith.addf %12, %14 : vector<16x128xf32>
      %c0_14 = arith.constant 0 : index
      %c0_15 = arith.constant 0 : index
      %16 = vector.load %arg5[%c0_14, %c0_15] : memref<16x128xbf16, #tpu.memory_space<vmem>>, vector<16x128xbf16>
      %17 = arith.extf %16 : vector<16x128xbf16> to vector<16x128xf32>
      %18 = arith.addf %15, %17 : vector<16x128xf32>
      %cst_16 = arith.constant dense<0.000000e+00> : vector<16xf32>
      %19 = vector.multi_reduction <add>, %18, %cst_16 [1] : vector<16x128xf32> to vector<16xf32>
      %20 = vector.shape_cast %19 : vector<16xf32> to vector<16x1xf32>
      %cst_17 = arith.constant 1.280000e+02 : f32
      %21 = vector.broadcast %cst_17 : f32 to vector<16x1xf32>
      %22 = arith.divf %20, %21 : vector<16x1xf32>
      %23 = vector.broadcast %22 : vector<16x1xf32> to vector<16x128xf32>
      %24 = arith.subf %18, %23 : vector<16x128xf32>
      %25 = arith.mulf %24, %24 : vector<16x128xf32>
      %cst_18 = arith.constant dense<0.000000e+00> : vector<16xf32>
      %26 = vector.multi_reduction <add>, %25, %cst_18 [1] : vector<16x128xf32> to vector<16xf32>
      %27 = vector.shape_cast %26 : vector<16xf32> to vector<16x1xf32>
      %cst_19 = arith.constant 1.280000e+02 : f32
      %28 = vector.broadcast %cst_19 : f32 to vector<16x1xf32>
      %29 = arith.divf %27, %28 : vector<16x1xf32>
      %30 = vector.broadcast %22 : vector<16x1xf32> to vector<16x128xf32>
      %31 = arith.subf %18, %30 : vector<16x128xf32>
      %cst_20 = arith.constant 9.99999974E-6 : f32
      %32 = vector.broadcast %cst_20 : f32 to vector<16x1xf32>
      %33 = arith.addf %29, %32 : vector<16x1xf32>
      %34 = math.rsqrt %33 : vector<16x1xf32>
      %35 = vector.broadcast %34 : vector<16x1xf32> to vector<16x128xf32>
      %36 = arith.mulf %31, %35 : vector<16x128xf32>
      %c0_21 = arith.constant 0 : index
      %c0_22 = arith.constant 0 : index
      %37 = vector.load %arg6[%c0_21, %c0_22] : memref<1x128xf32, #tpu.memory_space<vmem>>, vector<1x128xf32>
      %38 = vector.broadcast %37 : vector<1x128xf32> to vector<16x128xf32>
      %39 = arith.mulf %36, %38 : vector<16x128xf32>
      %c0_23 = arith.constant 0 : index
      %c0_24 = arith.constant 0 : index
      %40 = vector.load %arg7[%c0_23, %c0_24] : memref<1x128xf32, #tpu.memory_space<vmem>>, vector<1x128xf32>
      %41 = vector.broadcast %40 : vector<1x128xf32> to vector<16x128xf32>
      %42 = arith.addf %39, %41 : vector<16x128xf32>
      %43 = arith.truncf %42 : vector<16x128xf32> to vector<16x128xbf16>
      %c0_25 = arith.constant 0 : index
      %c0_26 = arith.constant 0 : index
      %44 = vector.load %arg8[%c0_25, %c0_26] : memref<16x128xbf16, #tpu.memory_space<vmem>>, vector<16x128xbf16>
      tpu.vector_store %arg8[%c0_25, %c0_26], %43 {strides = array<i32>} : memref<16x128xbf16, #tpu.memory_space<vmem>>, vector<16x128xbf16>,
    } else {
    }
    return
  }
  func.func @transform_0(%arg0: i32, %arg1: i32) -> (i32, i32) {
    %c0_i32 = arith.constant 0 : i32
    return %arg0, %arg1 : i32, i32
  }
  func.func @transform_1(%arg0: i32, %arg1: i32) -> (i32, i32) {
    %c0_i32 = arith.constant 0 : i32
    %c0_i32_0 = arith.constant 0 : i32
    return %arg1, %c0_i32 : i32, i32
  }
  func.func @transform_2(%arg0: i32, %arg1: i32) -> (i32, i32) {
    %c0_i32 = arith.constant 0 : i32
    %c0_i32_0 = arith.constant 0 : i32
    %c0_i32_1 = arith.constant 0 : i32
    return %c0_i32, %c0_i32_0 : i32, i32
  }
  func.func @transform_3(%arg0: i32, %arg1: i32) -> (i32, i32) {
    %c0_i32 = arith.constant 0 : i32
    %c0_i32_0 = arith.constant 0 : i32
    return %arg0, %c0_i32 : i32, i32
  }
  func.func @transform_4(%arg0: i32, %arg1: i32) -> (i32, i32) {
    %c0_i32 = arith.constant 0 : i32
    %c0_i32_0 = arith.constant 0 : i32
    %c0_i32_1 = arith.constant 0 : i32
    return %c0_i32, %c0_i32_0 : i32, i32
  }
  func.func @transform_5(%arg0: i32, %arg1: i32) -> (i32, i32) {
    %c0_i32 = arith.constant 0 : i32
    %c0_i32_0 = arith.constant 0 : i32
    %c0_i32_1 = arith.constant 0 : i32
    return %c0_i32, %c0_i32_0 : i32, i32
  }
  func.func @transform_6(%arg0: i32, %arg1: i32) -> (i32, i32) {
    %c0_i32 = arith.constant 0 : i32
    %c0_i32_0 = arith.constant 0 : i32
    return %arg0, %c0_i32 : i32, i32
  }
}

module attributes {stable_mosaic.version = 11 : i64} {
  func.func @_ffn_ln_kernel(%arg0: i32, %arg1: i32, %arg2: memref<16x128xbf16, #tpu.memory_space<vmem>>, %arg3: memref<128x256xbf16, #tpu.memory_space<vmem>>, %arg4: memref<1x256xf32, #tpu.memory_space<vmem>>, %arg5: memref<256x128xbf16, #tpu.memory_space<vmem>>, %arg6: memref<1x128xf32, #tpu.memory_space<vmem>>, %arg7: memref<1x128xf32, #tpu.memory_space<vmem>>, %arg8: memref<1x128xf32, #tpu.memory_space<vmem>>, %arg9: memref<16x128xbf16, #tpu.memory_space<vmem>>, %arg10: memref<16x128xf32, #tpu.memory_space<vmem>>) attributes {dimension_semantics = [#tpu.dimension_semantics<parallel>, #tpu.dimension_semantics<arbitrary>], iteration_bounds = array<i64: 1, 1>, scalar_prefetch = 0 : i64, scratch_operands = 1 : i64, tpu.core_type = #tpu.core_type<tc>, window_params = [{transform_indices = @transform_0, window_bounds = array<i64: 16, 128>}, {transform_indices = @transform_1, window_bounds = array<i64: 128, 256>}, {transform_indices = @transform_2, window_bounds = array<i64: 1, 256>}, {transform_indices = @transform_3, window_bounds = array<i64: 256, 128>}, {pipeline_mode = #tpu.pipeline_mode<synchronous>, transform_indices = @transform_4, window_bounds = array<i64: 1, 128>}, {pipeline_mode = #tpu.pipeline_mode<synchronous>, transform_indices = @transform_5, window_bounds = array<i64: 1, 128>}, {pipeline_mode = #tpu.pipeline_mode<synchronous>, transform_indices = @transform_6, window_bounds = array<i64: 1, 128>}, {transform_indices = @transform_7, window_bounds = array<i64: 16, 128>}]} {
    %c0_i32 = arith.constant 0 : i32
    %0 = arith.cmpi eq, %arg1, %c0_i32 : i32
    %1 = arith.extui %0 : i1 to i32
    %c0_i32_0 = arith.constant 0 : i32
    %2 = arith.cmpi ne, %1, %c0_i32_0 : i32
    scf.if %2 {
      %cst_16 = arith.constant 0.000000e+00 : f32
      %20 = vector.broadcast %cst_16 : f32 to vector<16x128xf32>
      %c0_17 = arith.constant 0 : index
      %c0_18 = arith.constant 0 : index
      %21 = vector.load %arg10[%c0_17, %c0_18] : memref<16x128xf32, #tpu.memory_space<vmem>>, vector<16x128xf32>
      tpu.vector_store %arg10[%c0_17, %c0_18], %20 {strides = array<i32>} : memref<16x128xf32, #tpu.memory_space<vmem>>, vector<16x128xf32>,
    } else {
    }
    %c0 = arith.constant 0 : index
    %c0_1 = arith.constant 0 : index
    %3 = vector.load %arg2[%c0, %c0_1] : memref<16x128xbf16, #tpu.memory_space<vmem>>, vector<16x128xbf16>
    %c0_2 = arith.constant 0 : index
    %c0_3 = arith.constant 0 : index
    %4 = vector.load %arg3[%c0_2, %c0_3] : memref<128x256xbf16, #tpu.memory_space<vmem>>, vector<128x256xbf16>
    %cst = arith.constant dense<0.000000e+00> : vector<16x256xf32>
    %5 = tpu.matmul %3, %4, %cst {dimension_numbers = #tpu.dot_dimension_numbers<[1], [0], [0], [1], [0, 0, 1, 1], [], []>} : vector<16x128xbf16>, vector<128x256xbf16>, vector<16x256xf32> -> vector<16x256xf32>
    %c0_4 = arith.constant 0 : index
    %c0_5 = arith.constant 0 : index
    %6 = vector.load %arg4[%c0_4, %c0_5] : memref<1x256xf32, #tpu.memory_space<vmem>>, vector<1x256xf32>
    %7 = vector.broadcast %6 : vector<1x256xf32> to vector<16x256xf32>
    %8 = arith.addf %5, %7 : vector<16x256xf32>
    %cst_6 = arith.constant 0.000000e+00 : f32
    %9 = vector.broadcast %cst_6 : f32 to vector<16x256xf32>
    %10 = arith.maximumf %8, %9 : vector<16x256xf32>
    %c0_7 = arith.constant 0 : index
    %c0_8 = arith.constant 0 : index
    %11 = vector.load %arg10[%c0_7, %c0_8] : memref<16x128xf32, #tpu.memory_space<vmem>>, vector<16x128xf32>
    %12 = arith.truncf %10 : vector<16x256xf32> to vector<16x256xbf16>
    %c0_9 = arith.constant 0 : index
    %c0_10 = arith.constant 0 : index
    %13 = vector.load %arg5[%c0_9, %c0_10] : memref<256x128xbf16, #tpu.memory_space<vmem>>, vector<256x128xbf16>
    %cst_11 = arith.constant dense<0.000000e+00> : vector<16x128xf32>
    %14 = tpu.matmul %12, %13, %cst_11 {dimension_numbers = #tpu.dot_dimension_numbers<[1], [0], [0], [1], [0, 0, 1, 1], [], []>} : vector<16x256xbf16>, vector<256x128xbf16>, vector<16x128xf32> -> vector<16x128xf32>
    %15 = arith.addf %11, %14 : vector<16x128xf32>
    %c0_12 = arith.constant 0 : index
    %c0_13 = arith.constant 0 : index
    %16 = vector.load %arg10[%c0_12, %c0_13] : memref<16x128xf32, #tpu.memory_space<vmem>>, vector<16x128xf32>
    tpu.vector_store %arg10[%c0_12, %c0_13], %15 {strides = array<i32>} : memref<16x128xf32, #tpu.memory_space<vmem>>, vector<16x128xf32>,
    %c0_i32_14 = arith.constant 0 : i32
    %17 = arith.cmpi eq, %arg1, %c0_i32_14 : i32
    %18 = arith.extui %17 : i1 to i32
    %c0_i32_15 = arith.constant 0 : i32
    %19 = arith.cmpi ne, %18, %c0_i32_15 : i32
    scf.if %19 {
      %c0_16 = arith.constant 0 : index
      %c0_17 = arith.constant 0 : index
      %20 = vector.load %arg10[%c0_16, %c0_17] : memref<16x128xf32, #tpu.memory_space<vmem>>, vector<16x128xf32>
      %c0_18 = arith.constant 0 : index
      %c0_19 = arith.constant 0 : index
      %21 = vector.load %arg6[%c0_18, %c0_19] : memref<1x128xf32, #tpu.memory_space<vmem>>, vector<1x128xf32>
      %22 = vector.broadcast %21 : vector<1x128xf32> to vector<16x128xf32>
      %23 = arith.addf %20, %22 : vector<16x128xf32>
      %c0_20 = arith.constant 0 : index
      %c0_21 = arith.constant 0 : index
      %24 = vector.load %arg2[%c0_20, %c0_21] : memref<16x128xbf16, #tpu.memory_space<vmem>>, vector<16x128xbf16>
      %25 = arith.extf %24 : vector<16x128xbf16> to vector<16x128xf32>
      %26 = arith.addf %23, %25 : vector<16x128xf32>
      %cst_22 = arith.constant dense<0.000000e+00> : vector<16xf32>
      %27 = vector.multi_reduction <add>, %26, %cst_22 [1] : vector<16x128xf32> to vector<16xf32>
      %28 = vector.shape_cast %27 : vector<16xf32> to vector<16x1xf32>
      %cst_23 = arith.constant 1.280000e+02 : f32
      %29 = vector.broadcast %cst_23 : f32 to vector<16x1xf32>
      %30 = arith.divf %28, %29 : vector<16x1xf32>
      %31 = vector.broadcast %30 : vector<16x1xf32> to vector<16x128xf32>
      %32 = arith.subf %26, %31 : vector<16x128xf32>
      %33 = arith.mulf %32, %32 : vector<16x128xf32>
      %cst_24 = arith.constant dense<0.000000e+00> : vector<16xf32>
      %34 = vector.multi_reduction <add>, %33, %cst_24 [1] : vector<16x128xf32> to vector<16xf32>
      %35 = vector.shape_cast %34 : vector<16xf32> to vector<16x1xf32>
      %cst_25 = arith.constant 1.280000e+02 : f32
      %36 = vector.broadcast %cst_25 : f32 to vector<16x1xf32>
      %37 = arith.divf %35, %36 : vector<16x1xf32>
      %38 = vector.broadcast %30 : vector<16x1xf32> to vector<16x128xf32>
      %39 = arith.subf %26, %38 : vector<16x128xf32>
      %cst_26 = arith.constant 9.99999974E-6 : f32
      %40 = vector.broadcast %cst_26 : f32 to vector<16x1xf32>
      %41 = arith.addf %37, %40 : vector<16x1xf32>
      %42 = math.rsqrt %41 : vector<16x1xf32>
      %43 = vector.broadcast %42 : vector<16x1xf32> to vector<16x128xf32>
      %44 = arith.mulf %39, %43 : vector<16x128xf32>
      %c0_27 = arith.constant 0 : index
      %c0_28 = arith.constant 0 : index
      %45 = vector.load %arg7[%c0_27, %c0_28] : memref<1x128xf32, #tpu.memory_space<vmem>>, vector<1x128xf32>
      %46 = vector.broadcast %45 : vector<1x128xf32> to vector<16x128xf32>
      %47 = arith.mulf %44, %46 : vector<16x128xf32>
      %c0_29 = arith.constant 0 : index
      %c0_30 = arith.constant 0 : index
      %48 = vector.load %arg8[%c0_29, %c0_30] : memref<1x128xf32, #tpu.memory_space<vmem>>, vector<1x128xf32>
      %49 = vector.broadcast %48 : vector<1x128xf32> to vector<16x128xf32>
      %50 = arith.addf %47, %49 : vector<16x128xf32>
      %51 = arith.truncf %50 : vector<16x128xf32> to vector<16x128xbf16>
      %c0_31 = arith.constant 0 : index
      %c0_32 = arith.constant 0 : index
      %52 = vector.load %arg9[%c0_31, %c0_32] : memref<16x128xbf16, #tpu.memory_space<vmem>>, vector<16x128xbf16>
      tpu.vector_store %arg9[%c0_31, %c0_32], %51 {strides = array<i32>} : memref<16x128xbf16, #tpu.memory_space<vmem>>, vector<16x128xbf16>,
    } else {
    }
    return
  }
  func.func @transform_0(%arg0: i32, %arg1: i32) -> (i32, i32) {
    %c0_i32 = arith.constant 0 : i32
    %c0_i32_0 = arith.constant 0 : i32
    return %arg0, %c0_i32 : i32, i32
  }
  func.func @transform_1(%arg0: i32, %arg1: i32) -> (i32, i32) {
    %c0_i32 = arith.constant 0 : i32
    %c0_i32_0 = arith.constant 0 : i32
    return %c0_i32, %arg1 : i32, i32
  }
  func.func @transform_2(%arg0: i32, %arg1: i32) -> (i32, i32) {
    %c0_i32 = arith.constant 0 : i32
    %c0_i32_0 = arith.constant 0 : i32
    return %c0_i32, %arg1 : i32, i32
  }
  func.func @transform_3(%arg0: i32, %arg1: i32) -> (i32, i32) {
    %c0_i32 = arith.constant 0 : i32
    %c0_i32_0 = arith.constant 0 : i32
    return %arg1, %c0_i32 : i32, i32
  }
  func.func @transform_4(%arg0: i32, %arg1: i32) -> (i32, i32) {
    %c0_i32 = arith.constant 0 : i32
    %c0_i32_0 = arith.constant 0 : i32
    %c0_i32_1 = arith.constant 0 : i32
    return %c0_i32, %c0_i32_0 : i32, i32
  }
  func.func @transform_5(%arg0: i32, %arg1: i32) -> (i32, i32) {
    %c0_i32 = arith.constant 0 : i32
    %c0_i32_0 = arith.constant 0 : i32
    %c0_i32_1 = arith.constant 0 : i32
    return %c0_i32, %c0_i32_0 : i32, i32
  }
  func.func @transform_6(%arg0: i32, %arg1: i32) -> (i32, i32) {
    %c0_i32 = arith.constant 0 : i32
    %c0_i32_0 = arith.constant 0 : i32
    %c0_i32_1 = arith.constant 0 : i32
    return %c0_i32, %c0_i32_0 : i32, i32
  }
  func.func @transform_7(%arg0: i32, %arg1: i32) -> (i32, i32) {
    %c0_i32 = arith.constant 0 : i32
    %c0_i32_0 = arith.constant 0 : i32
    return %arg0, %c0_i32 : i32, i32
  }
}

module attributes {stable_mosaic.version = 11 : i64} {
  func.func @_self_attn_kernel(%arg0: i32, %arg1: i32, %arg2: memref<1x8x384xbf16, #tpu.memory_space<vmem>>, %arg3: memref<1x8x384xbf16, #tpu.memory_space<vmem>>, %arg4: memref<8x8xf32, #tpu.memory_space<vmem>>, %arg5: memref<1x1x8xf32, #tpu.memory_space<vmem>>, %arg6: memref<1x8x128xbf16, #tpu.memory_space<vmem>>) attributes {dimension_semantics = [#tpu.dimension_semantics<parallel>, #tpu.dimension_semantics<parallel>], iteration_bounds = array<i64: 2, 1>, scalar_prefetch = 0 : i64, scratch_operands = 0 : i64, tpu.core_type = #tpu.core_type<tc>, window_params = [{transform_indices = @transform_0, window_bounds = array<i64: 1, 8, 384>}, {transform_indices = @transform_1, window_bounds = array<i64: 1, 8, 384>}, {transform_indices = @transform_2, window_bounds = array<i64: 8, 8>}, {transform_indices = @transform_3, window_bounds = array<i64: 1, 1, 8>}, {transform_indices = @transform_4, window_bounds = array<i64: 1, 8, 128>}]} {
    %c0 = arith.constant 0 : index
    %c0_0 = arith.constant 0 : index
    %c0_1 = arith.constant 0 : index
    %0 = vector.load %arg2[%c0, %c0_0, %c0_1] : memref<1x8x384xbf16, #tpu.memory_space<vmem>>, vector<1x8x384xbf16>
    %1 = vector.shape_cast %0 : vector<1x8x384xbf16> to vector<8x384xbf16>
    %2 = vector.extract_strided_slice %1 {offsets = [0, 0], sizes = [8, 128], strides = [1, 1]} : vector<8x384xbf16> to vector<8x128xbf16>
    %3 = arith.extf %2 : vector<8x128xbf16> to vector<8x128xf32>
    %cst = arith.constant 0.176776692 : f32
    %4 = vector.broadcast %cst : f32 to vector<8x128xf32>
    %5 = arith.mulf %3, %4 : vector<8x128xf32>
    %6 = arith.truncf %5 : vector<8x128xf32> to vector<8x128xbf16>
    %c0_2 = arith.constant 0 : index
    %c0_3 = arith.constant 0 : index
    %c0_4 = arith.constant 0 : index
    %7 = vector.load %arg3[%c0_2, %c0_3, %c0_4] : memref<1x8x384xbf16, #tpu.memory_space<vmem>>, vector<1x8x384xbf16>
    %8 = vector.shape_cast %7 : vector<1x8x384xbf16> to vector<8x384xbf16>
    %9 = vector.extract_strided_slice %8 {offsets = [0, 128], sizes = [8, 128], strides = [1, 1]} : vector<8x384xbf16> to vector<8x128xbf16>
    %10 = vector.extract_strided_slice %8 {offsets = [0, 256], sizes = [8, 128], strides = [1, 1]} : vector<8x384xbf16> to vector<8x128xbf16>
    %c0_5 = arith.constant 0 : index
    %c0_6 = arith.constant 0 : index
    %11 = vector.load %arg4[%c0_5, %c0_6] : memref<8x8xf32, #tpu.memory_space<vmem>>, vector<8x8xf32>
    %c0_7 = arith.constant 0 : index
    %c0_8 = arith.constant 0 : index
    %c0_9 = arith.constant 0 : index
    %12 = vector.load %arg5[%c0_7, %c0_8, %c0_9] : memref<1x1x8xf32, #tpu.memory_space<vmem>>, vector<1x1x8xf32>
    %13 = vector.shape_cast %12 : vector<1x1x8xf32> to vector<1x8xf32>
    %14 = vector.broadcast %13 : vector<1x8xf32> to vector<8x8xf32>
    %15 = arith.addf %11, %14 : vector<8x8xf32>
    %16 = vector.extract_strided_slice %6 {offsets = [0, 0], sizes = [8, 32], strides = [1, 1]} : vector<8x128xbf16> to vector<8x32xbf16>
    %17 = vector.extract_strided_slice %9 {offsets = [0, 0], sizes = [8, 32], strides = [1, 1]} : vector<8x128xbf16> to vector<8x32xbf16>
    %cst_10 = arith.constant dense<0.000000e+00> : vector<8x8xf32>
    %18 = tpu.matmul %16, %17, %cst_10 {dimension_numbers = #tpu.dot_dimension_numbers<[1], [1], [0], [0], [0, 0, 1, 0], [], []>} : vector<8x32xbf16>, vector<8x32xbf16>, vector<8x8xf32> -> vector<8x8xf32>
    %19 = arith.addf %18, %15 : vector<8x8xf32>
    %cst_11 = arith.constant dense<0xFF800000> : vector<8xf32>
    %20 = vector.multi_reduction <maximumf>, %19, %cst_11 [1] : vector<8x8xf32> to vector<8xf32>
    %21 = vector.shape_cast %20 : vector<8xf32> to vector<8x1xf32>
    %22 = vector.broadcast %21 : vector<8x1xf32> to vector<8x8xf32>
    %23 = arith.subf %19, %22 : vector<8x8xf32>
    %24 = math.exp %23 : vector<8x8xf32>
    %cst_12 = arith.constant dense<0.000000e+00> : vector<8xf32>
    %25 = vector.multi_reduction <add>, %24, %cst_12 [1] : vector<8x8xf32> to vector<8xf32>
    %26 = vector.shape_cast %25 : vector<8xf32> to vector<8x1xf32>
    %27 = tpu.reciprocal %26 {approx = true} : vector<8x1xf32> -> vector<8x1xf32>
    %28 = arith.truncf %24 : vector<8x8xf32> to vector<8x8xbf16>
    %29 = vector.extract_strided_slice %10 {offsets = [0, 0], sizes = [8, 32], strides = [1, 1]} : vector<8x128xbf16> to vector<8x32xbf16>
    %cst_13 = arith.constant dense<0.000000e+00> : vector<8x32xf32>
    %30 = tpu.matmul %28, %29, %cst_13 {dimension_numbers = #tpu.dot_dimension_numbers<[1], [0], [0], [1], [0, 0, 1, 1], [], []>} : vector<8x8xbf16>, vector<8x32xbf16>, vector<8x32xf32> -> vector<8x32xf32>
    %31 = vector.broadcast %27 : vector<8x1xf32> to vector<8x32xf32>
    %32 = arith.mulf %30, %31 : vector<8x32xf32>
    %33 = arith.truncf %32 : vector<8x32xf32> to vector<8x32xbf16>
    %c0_14 = arith.constant 0 : index
    %c0_15 = arith.constant 0 : index
    %c0_16 = arith.constant 0 : index
    %34 = vector.load %arg6[%c0_14, %c0_15, %c0_16] : memref<1x8x128xbf16, #tpu.memory_space<vmem>>, vector<1x8x32xbf16>
    %35 = vector.shape_cast %34 : vector<1x8x32xbf16> to vector<8x32xbf16>
    %36 = vector.shape_cast %33 : vector<8x32xbf16> to vector<1x8x32xbf16>
    tpu.vector_store %arg6[%c0_14, %c0_15, %c0_16], %36 {strides = array<i32>} : memref<1x8x128xbf16, #tpu.memory_space<vmem>>, vector<1x8x32xbf16>,
    %37 = vector.extract_strided_slice %6 {offsets = [0, 32], sizes = [8, 32], strides = [1, 1]} : vector<8x128xbf16> to vector<8x32xbf16>
    %38 = vector.extract_strided_slice %9 {offsets = [0, 32], sizes = [8, 32], strides = [1, 1]} : vector<8x128xbf16> to vector<8x32xbf16>
    %cst_17 = arith.constant dense<0.000000e+00> : vector<8x8xf32>
    %39 = tpu.matmul %37, %38, %cst_17 {dimension_numbers = #tpu.dot_dimension_numbers<[1], [1], [0], [0], [0, 0, 1, 0], [], []>} : vector<8x32xbf16>, vector<8x32xbf16>, vector<8x8xf32> -> vector<8x8xf32>
    %40 = arith.addf %39, %15 : vector<8x8xf32>
    %cst_18 = arith.constant dense<0xFF800000> : vector<8xf32>
    %41 = vector.multi_reduction <maximumf>, %40, %cst_18 [1] : vector<8x8xf32> to vector<8xf32>
    %42 = vector.shape_cast %41 : vector<8xf32> to vector<8x1xf32>
    %43 = vector.broadcast %42 : vector<8x1xf32> to vector<8x8xf32>
    %44 = arith.subf %40, %43 : vector<8x8xf32>
    %45 = math.exp %44 : vector<8x8xf32>
    %cst_19 = arith.constant dense<0.000000e+00> : vector<8xf32>
    %46 = vector.multi_reduction <add>, %45, %cst_19 [1] : vector<8x8xf32> to vector<8xf32>
    %47 = vector.shape_cast %46 : vector<8xf32> to vector<8x1xf32>
    %48 = tpu.reciprocal %47 {approx = true} : vector<8x1xf32> -> vector<8x1xf32>
    %49 = arith.truncf %45 : vector<8x8xf32> to vector<8x8xbf16>
    %50 = vector.extract_strided_slice %10 {offsets = [0, 32], sizes = [8, 32], strides = [1, 1]} : vector<8x128xbf16> to vector<8x32xbf16>
    %cst_20 = arith.constant dense<0.000000e+00> : vector<8x32xf32>
    %51 = tpu.matmul %49, %50, %cst_20 {dimension_numbers = #tpu.dot_dimension_numbers<[1], [0], [0], [1], [0, 0, 1, 1], [], []>} : vector<8x8xbf16>, vector<8x32xbf16>, vector<8x32xf32> -> vector<8x32xf32>
    %52 = vector.broadcast %48 : vector<8x1xf32> to vector<8x32xf32>
    %53 = arith.mulf %51, %52 : vector<8x32xf32>
    %54 = arith.truncf %53 : vector<8x32xf32> to vector<8x32xbf16>
    %c0_21 = arith.constant 0 : index
    %c0_22 = arith.constant 0 : index
    %c32 = arith.constant 32 : index
    %55 = vector.load %arg6[%c0_21, %c0_22, %c32] : memref<1x8x128xbf16, #tpu.memory_space<vmem>>, vector<1x8x32xbf16>
    %56 = vector.shape_cast %55 : vector<1x8x32xbf16> to vector<8x32xbf16>
    %57 = vector.shape_cast %54 : vector<8x32xbf16> to vector<1x8x32xbf16>
    tpu.vector_store %arg6[%c0_21, %c0_22, %c32], %57 {strides = array<i32>} : memref<1x8x128xbf16, #tpu.memory_space<vmem>>, vector<1x8x32xbf16>,
    %58 = vector.extract_strided_slice %6 {offsets = [0, 64], sizes = [8, 32], strides = [1, 1]} : vector<8x128xbf16> to vector<8x32xbf16>
    %59 = vector.extract_strided_slice %9 {offsets = [0, 64], sizes = [8, 32], strides = [1, 1]} : vector<8x128xbf16> to vector<8x32xbf16>
    %cst_23 = arith.constant dense<0.000000e+00> : vector<8x8xf32>
    %60 = tpu.matmul %58, %59, %cst_23 {dimension_numbers = #tpu.dot_dimension_numbers<[1], [1], [0], [0], [0, 0, 1, 0], [], []>} : vector<8x32xbf16>, vector<8x32xbf16>, vector<8x8xf32> -> vector<8x8xf32>
    %61 = arith.addf %60, %15 : vector<8x8xf32>
    %cst_24 = arith.constant dense<0xFF800000> : vector<8xf32>
    %62 = vector.multi_reduction <maximumf>, %61, %cst_24 [1] : vector<8x8xf32> to vector<8xf32>
    %63 = vector.shape_cast %62 : vector<8xf32> to vector<8x1xf32>
    %64 = vector.broadcast %63 : vector<8x1xf32> to vector<8x8xf32>
    %65 = arith.subf %61, %64 : vector<8x8xf32>
    %66 = math.exp %65 : vector<8x8xf32>
    %cst_25 = arith.constant dense<0.000000e+00> : vector<8xf32>
    %67 = vector.multi_reduction <add>, %66, %cst_25 [1] : vector<8x8xf32> to vector<8xf32>
    %68 = vector.shape_cast %67 : vector<8xf32> to vector<8x1xf32>
    %69 = tpu.reciprocal %68 {approx = true} : vector<8x1xf32> -> vector<8x1xf32>
    %70 = arith.truncf %66 : vector<8x8xf32> to vector<8x8xbf16>
    %71 = vector.extract_strided_slice %10 {offsets = [0, 64], sizes = [8, 32], strides = [1, 1]} : vector<8x128xbf16> to vector<8x32xbf16>
    %cst_26 = arith.constant dense<0.000000e+00> : vector<8x32xf32>
    %72 = tpu.matmul %70, %71, %cst_26 {dimension_numbers = #tpu.dot_dimension_numbers<[1], [0], [0], [1], [0, 0, 1, 1], [], []>} : vector<8x8xbf16>, vector<8x32xbf16>, vector<8x32xf32> -> vector<8x32xf32>
    %73 = vector.broadcast %69 : vector<8x1xf32> to vector<8x32xf32>
    %74 = arith.mulf %72, %73 : vector<8x32xf32>
    %75 = arith.truncf %74 : vector<8x32xf32> to vector<8x32xbf16>
    %c0_27 = arith.constant 0 : index
    %c0_28 = arith.constant 0 : index
    %c64 = arith.constant 64 : index
    %76 = vector.load %arg6[%c0_27, %c0_28, %c64] : memref<1x8x128xbf16, #tpu.memory_space<vmem>>, vector<1x8x32xbf16>
    %77 = vector.shape_cast %76 : vector<1x8x32xbf16> to vector<8x32xbf16>
    %78 = vector.shape_cast %75 : vector<8x32xbf16> to vector<1x8x32xbf16>
    tpu.vector_store %arg6[%c0_27, %c0_28, %c64], %78 {strides = array<i32>} : memref<1x8x128xbf16, #tpu.memory_space<vmem>>, vector<1x8x32xbf16>,
    %79 = vector.extract_strided_slice %6 {offsets = [0, 96], sizes = [8, 32], strides = [1, 1]} : vector<8x128xbf16> to vector<8x32xbf16>
    %80 = vector.extract_strided_slice %9 {offsets = [0, 96], sizes = [8, 32], strides = [1, 1]} : vector<8x128xbf16> to vector<8x32xbf16>
    %cst_29 = arith.constant dense<0.000000e+00> : vector<8x8xf32>
    %81 = tpu.matmul %79, %80, %cst_29 {dimension_numbers = #tpu.dot_dimension_numbers<[1], [1], [0], [0], [0, 0, 1, 0], [], []>} : vector<8x32xbf16>, vector<8x32xbf16>, vector<8x8xf32> -> vector<8x8xf32>
    %82 = arith.addf %81, %15 : vector<8x8xf32>
    %cst_30 = arith.constant dense<0xFF800000> : vector<8xf32>
    %83 = vector.multi_reduction <maximumf>, %82, %cst_30 [1] : vector<8x8xf32> to vector<8xf32>
    %84 = vector.shape_cast %83 : vector<8xf32> to vector<8x1xf32>
    %85 = vector.broadcast %84 : vector<8x1xf32> to vector<8x8xf32>
    %86 = arith.subf %82, %85 : vector<8x8xf32>
    %87 = math.exp %86 : vector<8x8xf32>
    %cst_31 = arith.constant dense<0.000000e+00> : vector<8xf32>
    %88 = vector.multi_reduction <add>, %87, %cst_31 [1] : vector<8x8xf32> to vector<8xf32>
    %89 = vector.shape_cast %88 : vector<8xf32> to vector<8x1xf32>
    %90 = tpu.reciprocal %89 {approx = true} : vector<8x1xf32> -> vector<8x1xf32>
    %91 = arith.truncf %87 : vector<8x8xf32> to vector<8x8xbf16>
    %92 = vector.extract_strided_slice %10 {offsets = [0, 96], sizes = [8, 32], strides = [1, 1]} : vector<8x128xbf16> to vector<8x32xbf16>
    %cst_32 = arith.constant dense<0.000000e+00> : vector<8x32xf32>
    %93 = tpu.matmul %91, %92, %cst_32 {dimension_numbers = #tpu.dot_dimension_numbers<[1], [0], [0], [1], [0, 0, 1, 1], [], []>} : vector<8x8xbf16>, vector<8x32xbf16>, vector<8x32xf32> -> vector<8x32xf32>
    %94 = vector.broadcast %90 : vector<8x1xf32> to vector<8x32xf32>
    %95 = arith.mulf %93, %94 : vector<8x32xf32>
    %96 = arith.truncf %95 : vector<8x32xf32> to vector<8x32xbf16>
    %c0_33 = arith.constant 0 : index
    %c0_34 = arith.constant 0 : index
    %c96 = arith.constant 96 : index
    %97 = vector.load %arg6[%c0_33, %c0_34, %c96] : memref<1x8x128xbf16, #tpu.memory_space<vmem>>, vector<1x8x32xbf16>
    %98 = vector.shape_cast %97 : vector<1x8x32xbf16> to vector<8x32xbf16>
    %99 = vector.shape_cast %96 : vector<8x32xbf16> to vector<1x8x32xbf16>
    tpu.vector_store %arg6[%c0_33, %c0_34, %c96], %99 {strides = array<i32>} : memref<1x8x128xbf16, #tpu.memory_space<vmem>>, vector<1x8x32xbf16>,
    return
  }
  func.func @transform_0(%arg0: i32, %arg1: i32) -> (i32, i32, i32) {
    %c0_i32 = arith.constant 0 : i32
    %c0_i32_0 = arith.constant 0 : i32
    return %arg0, %arg1, %c0_i32 : i32, i32, i32
  }
  func.func @transform_1(%arg0: i32, %arg1: i32) -> (i32, i32, i32) {
    %c0_i32 = arith.constant 0 : i32
    %c0_i32_0 = arith.constant 0 : i32
    %c0_i32_1 = arith.constant 0 : i32
    return %arg0, %c0_i32, %c0_i32_0 : i32, i32, i32
  }
  func.func @transform_2(%arg0: i32, %arg1: i32) -> (i32, i32) {
    %c0_i32 = arith.constant 0 : i32
    %c0_i32_0 = arith.constant 0 : i32
    return %arg1, %c0_i32 : i32, i32
  }
  func.func @transform_3(%arg0: i32, %arg1: i32) -> (i32, i32, i32) {
    %c0_i32 = arith.constant 0 : i32
    %c0_i32_0 = arith.constant 0 : i32
    %c0_i32_1 = arith.constant 0 : i32
    return %arg0, %c0_i32, %c0_i32_0 : i32, i32, i32
  }
  func.func @transform_4(%arg0: i32, %arg1: i32) -> (i32, i32, i32) {
    %c0_i32 = arith.constant 0 : i32
    %c0_i32_0 = arith.constant 0 : i32
    return %arg0, %arg1, %c0_i32 : i32, i32, i32
  }
}

module attributes {stable_mosaic.version = 11 : i64} {
  func.func @_matmul_kernel(%arg0: i32, %arg1: i32, %arg2: i32, %arg3: memref<16x128xbf16, #tpu.memory_space<vmem>>, %arg4: memref<128x384xbf16, #tpu.memory_space<vmem>>, %arg5: memref<1x384xf32, #tpu.memory_space<vmem>>, %arg6: memref<16x384xbf16, #tpu.memory_space<vmem>>, %arg7: memref<16x384xf32, #tpu.memory_space<vmem>>) attributes {dimension_semantics = [#tpu.dimension_semantics<parallel>, #tpu.dimension_semantics<parallel>, #tpu.dimension_semantics<arbitrary>], iteration_bounds = array<i64: 1, 1, 1>, scalar_prefetch = 0 : i64, scratch_operands = 1 : i64, tpu.core_type = #tpu.core_type<tc>, window_params = [{transform_indices = @transform_0, window_bounds = array<i64: 16, 128>}, {transform_indices = @transform_1, window_bounds = array<i64: 128, 384>}, {transform_indices = @transform_2, window_bounds = array<i64: 1, 384>}, {transform_indices = @transform_3, window_bounds = array<i64: 16, 384>}]} {
    %c0_i32 = arith.constant 0 : i32
    %0 = arith.cmpi eq, %arg2, %c0_i32 : i32
    %1 = arith.extui %0 : i1 to i32
    %c0_i32_0 = arith.constant 0 : i32
    %2 = arith.cmpi ne, %1, %c0_i32_0 : i32
    scf.if %2 {
      %cst_10 = arith.constant 0.000000e+00 : f32
      %12 = vector.broadcast %cst_10 : f32 to vector<16x384xf32>
      %c0_11 = arith.constant 0 : index
      %c0_12 = arith.constant 0 : index
      %13 = vector.load %arg7[%c0_11, %c0_12] : memref<16x384xf32, #tpu.memory_space<vmem>>, vector<16x384xf32>
      tpu.vector_store %arg7[%c0_11, %c0_12], %12 {strides = array<i32>} : memref<16x384xf32, #tpu.memory_space<vmem>>, vector<16x384xf32>,
    } else {
    }
    %c0 = arith.constant 0 : index
    %c0_1 = arith.constant 0 : index
    %3 = vector.load %arg7[%c0, %c0_1] : memref<16x384xf32, #tpu.memory_space<vmem>>, vector<16x384xf32>
    %c0_2 = arith.constant 0 : index
    %c0_3 = arith.constant 0 : index
    %4 = vector.load %arg3[%c0_2, %c0_3] : memref<16x128xbf16, #tpu.memory_space<vmem>>, vector<16x128xbf16>
    %c0_4 = arith.constant 0 : index
    %c0_5 = arith.constant 0 : index
    %5 = vector.load %arg4[%c0_4, %c0_5] : memref<128x384xbf16, #tpu.memory_space<vmem>>, vector<128x384xbf16>
    %cst = arith.constant dense<0.000000e+00> : vector<16x384xf32>
    %6 = tpu.matmul %4, %5, %cst {dimension_numbers = #tpu.dot_dimension_numbers<[1], [0], [0], [1], [0, 0, 1, 1], [], []>} : vector<16x128xbf16>, vector<128x384xbf16>, vector<16x384xf32> -> vector<16x384xf32>
    %7 = arith.addf %3, %6 : vector<16x384xf32>
    %c0_6 = arith.constant 0 : index
    %c0_7 = arith.constant 0 : index
    %8 = vector.load %arg7[%c0_6, %c0_7] : memref<16x384xf32, #tpu.memory_space<vmem>>, vector<16x384xf32>
    tpu.vector_store %arg7[%c0_6, %c0_7], %7 {strides = array<i32>} : memref<16x384xf32, #tpu.memory_space<vmem>>, vector<16x384xf32>,
    %c0_i32_8 = arith.constant 0 : i32
    %9 = arith.cmpi eq, %arg2, %c0_i32_8 : i32
    %10 = arith.extui %9 : i1 to i32
    %c0_i32_9 = arith.constant 0 : i32
    %11 = arith.cmpi ne, %10, %c0_i32_9 : i32
    scf.if %11 {
      %c0_10 = arith.constant 0 : index
      %c0_11 = arith.constant 0 : index
      %12 = vector.load %arg7[%c0_10, %c0_11] : memref<16x384xf32, #tpu.memory_space<vmem>>, vector<16x384xf32>
      %c0_12 = arith.constant 0 : index
      %c0_13 = arith.constant 0 : index
      %13 = vector.load %arg5[%c0_12, %c0_13] : memref<1x384xf32, #tpu.memory_space<vmem>>, vector<1x384xf32>
      %14 = vector.broadcast %13 : vector<1x384xf32> to vector<16x384xf32>
      %15 = arith.addf %12, %14 : vector<16x384xf32>
      %16 = arith.truncf %15 : vector<16x384xf32> to vector<16x384xbf16>
      %c0_14 = arith.constant 0 : index
      %c0_15 = arith.constant 0 : index
      %17 = vector.load %arg6[%c0_14, %c0_15] : memref<16x384xbf16, #tpu.memory_space<vmem>>, vector<16x384xbf16>
      tpu.vector_store %arg6[%c0_14, %c0_15], %16 {strides = array<i32>} : memref<16x384xbf16, #tpu.memory_space<vmem>>, vector<16x384xbf16>,
    } else {
    }
    return
  }
  func.func @transform_0(%arg0: i32, %arg1: i32, %arg2: i32) -> (i32, i32) {
    %c0_i32 = arith.constant 0 : i32
    return %arg0, %arg2 : i32, i32
  }
  func.func @transform_1(%arg0: i32, %arg1: i32, %arg2: i32) -> (i32, i32) {
    %c0_i32 = arith.constant 0 : i32
    return %arg2, %arg1 : i32, i32
  }
  func.func @transform_2(%arg0: i32, %arg1: i32, %arg2: i32) -> (i32, i32) {
    %c0_i32 = arith.constant 0 : i32
    %c0_i32_0 = arith.constant 0 : i32
    return %c0_i32, %arg1 : i32, i32
  }
  func.func @transform_3(%arg0: i32, %arg1: i32, %arg2: i32) -> (i32, i32) {
    %c0_i32 = arith.constant 0 : i32
    return %arg0, %arg1 : i32, i32
  }
}

module attributes {stable_mosaic.version = 11 : i64} {
  func.func @_matmul_kernel(%arg0: i32, %arg1: i32, %arg2: i32, %arg3: memref<16x128xbf16, #tpu.memory_space<vmem>>, %arg4: memref<128x128xbf16, #tpu.memory_space<vmem>>, %arg5: memref<1x128xf32, #tpu.memory_space<vmem>>, %arg6: memref<16x128xbf16, #tpu.memory_space<vmem>>, %arg7: memref<16x128xf32, #tpu.memory_space<vmem>>) attributes {dimension_semantics = [#tpu.dimension_semantics<parallel>, #tpu.dimension_semantics<parallel>, #tpu.dimension_semantics<arbitrary>], iteration_bounds = array<i64: 1, 1, 1>, scalar_prefetch = 0 : i64, scratch_operands = 1 : i64, tpu.core_type = #tpu.core_type<tc>, window_params = [{transform_indices = @transform_0, window_bounds = array<i64: 16, 128>}, {transform_indices = @transform_1, window_bounds = array<i64: 128, 128>}, {transform_indices = @transform_2, window_bounds = array<i64: 1, 128>}, {transform_indices = @transform_3, window_bounds = array<i64: 16, 128>}]} {
    %c0_i32 = arith.constant 0 : i32
    %0 = arith.cmpi eq, %arg2, %c0_i32 : i32
    %1 = arith.extui %0 : i1 to i32
    %c0_i32_0 = arith.constant 0 : i32
    %2 = arith.cmpi ne, %1, %c0_i32_0 : i32
    scf.if %2 {
      %cst_10 = arith.constant 0.000000e+00 : f32
      %12 = vector.broadcast %cst_10 : f32 to vector<16x128xf32>
      %c0_11 = arith.constant 0 : index
      %c0_12 = arith.constant 0 : index
      %13 = vector.load %arg7[%c0_11, %c0_12] : memref<16x128xf32, #tpu.memory_space<vmem>>, vector<16x128xf32>
      tpu.vector_store %arg7[%c0_11, %c0_12], %12 {strides = array<i32>} : memref<16x128xf32, #tpu.memory_space<vmem>>, vector<16x128xf32>,
    } else {
    }
    %c0 = arith.constant 0 : index
    %c0_1 = arith.constant 0 : index
    %3 = vector.load %arg7[%c0, %c0_1] : memref<16x128xf32, #tpu.memory_space<vmem>>, vector<16x128xf32>
    %c0_2 = arith.constant 0 : index
    %c0_3 = arith.constant 0 : index
    %4 = vector.load %arg3[%c0_2, %c0_3] : memref<16x128xbf16, #tpu.memory_space<vmem>>, vector<16x128xbf16>
    %c0_4 = arith.constant 0 : index
    %c0_5 = arith.constant 0 : index
    %5 = vector.load %arg4[%c0_4, %c0_5] : memref<128x128xbf16, #tpu.memory_space<vmem>>, vector<128x128xbf16>
    %cst = arith.constant dense<0.000000e+00> : vector<16x128xf32>
    %6 = tpu.matmul %4, %5, %cst {dimension_numbers = #tpu.dot_dimension_numbers<[1], [0], [0], [1], [0, 0, 1, 1], [], []>} : vector<16x128xbf16>, vector<128x128xbf16>, vector<16x128xf32> -> vector<16x128xf32>
    %7 = arith.addf %3, %6 : vector<16x128xf32>
    %c0_6 = arith.constant 0 : index
    %c0_7 = arith.constant 0 : index
    %8 = vector.load %arg7[%c0_6, %c0_7] : memref<16x128xf32, #tpu.memory_space<vmem>>, vector<16x128xf32>
    tpu.vector_store %arg7[%c0_6, %c0_7], %7 {strides = array<i32>} : memref<16x128xf32, #tpu.memory_space<vmem>>, vector<16x128xf32>,
    %c0_i32_8 = arith.constant 0 : i32
    %9 = arith.cmpi eq, %arg2, %c0_i32_8 : i32
    %10 = arith.extui %9 : i1 to i32
    %c0_i32_9 = arith.constant 0 : i32
    %11 = arith.cmpi ne, %10, %c0_i32_9 : i32
    scf.if %11 {
      %c0_10 = arith.constant 0 : index
      %c0_11 = arith.constant 0 : index
      %12 = vector.load %arg7[%c0_10, %c0_11] : memref<16x128xf32, #tpu.memory_space<vmem>>, vector<16x128xf32>
      %c0_12 = arith.constant 0 : index
      %c0_13 = arith.constant 0 : index
      %13 = vector.load %arg5[%c0_12, %c0_13] : memref<1x128xf32, #tpu.memory_space<vmem>>, vector<1x128xf32>
      %14 = vector.broadcast %13 : vector<1x128xf32> to vector<16x128xf32>
      %15 = arith.addf %12, %14 : vector<16x128xf32>
      %16 = arith.truncf %15 : vector<16x128xf32> to vector<16x128xbf16>
      %c0_14 = arith.constant 0 : index
      %c0_15 = arith.constant 0 : index
      %17 = vector.load %arg6[%c0_14, %c0_15] : memref<16x128xbf16, #tpu.memory_space<vmem>>, vector<16x128xbf16>
      tpu.vector_store %arg6[%c0_14, %c0_15], %16 {strides = array<i32>} : memref<16x128xbf16, #tpu.memory_space<vmem>>, vector<16x128xbf16>,
    } else {
    }
    return
  }
  func.func @transform_0(%arg0: i32, %arg1: i32, %arg2: i32) -> (i32, i32) {
    %c0_i32 = arith.constant 0 : i32
    return %arg0, %arg2 : i32, i32
  }
  func.func @transform_1(%arg0: i32, %arg1: i32, %arg2: i32) -> (i32, i32) {
    %c0_i32 = arith.constant 0 : i32
    return %arg2, %arg1 : i32, i32
  }
  func.func @transform_2(%arg0: i32, %arg1: i32, %arg2: i32) -> (i32, i32) {
    %c0_i32 = arith.constant 0 : i32
    %c0_i32_0 = arith.constant 0 : i32
    return %c0_i32, %arg1 : i32, i32
  }
  func.func @transform_3(%arg0: i32, %arg1: i32, %arg2: i32) -> (i32, i32) {
    %c0_i32 = arith.constant 0 : i32
    return %arg0, %arg1 : i32, i32
  }
}

module attributes {stable_mosaic.version = 11 : i64} {
  func.func @_matmul_kernel(%arg0: i32, %arg1: i32, %arg2: i32, %arg3: memref<16x128xbf16, #tpu.memory_space<vmem>>, %arg4: memref<128x256xbf16, #tpu.memory_space<vmem>>, %arg5: memref<1x256xf32, #tpu.memory_space<vmem>>, %arg6: memref<16x256xbf16, #tpu.memory_space<vmem>>, %arg7: memref<16x256xf32, #tpu.memory_space<vmem>>) attributes {dimension_semantics = [#tpu.dimension_semantics<parallel>, #tpu.dimension_semantics<parallel>, #tpu.dimension_semantics<arbitrary>], iteration_bounds = array<i64: 1, 1, 1>, scalar_prefetch = 0 : i64, scratch_operands = 1 : i64, tpu.core_type = #tpu.core_type<tc>, window_params = [{transform_indices = @transform_0, window_bounds = array<i64: 16, 128>}, {transform_indices = @transform_1, window_bounds = array<i64: 128, 256>}, {transform_indices = @transform_2, window_bounds = array<i64: 1, 256>}, {transform_indices = @transform_3, window_bounds = array<i64: 16, 256>}]} {
    %c0_i32 = arith.constant 0 : i32
    %0 = arith.cmpi eq, %arg2, %c0_i32 : i32
    %1 = arith.extui %0 : i1 to i32
    %c0_i32_0 = arith.constant 0 : i32
    %2 = arith.cmpi ne, %1, %c0_i32_0 : i32
    scf.if %2 {
      %cst_10 = arith.constant 0.000000e+00 : f32
      %12 = vector.broadcast %cst_10 : f32 to vector<16x256xf32>
      %c0_11 = arith.constant 0 : index
      %c0_12 = arith.constant 0 : index
      %13 = vector.load %arg7[%c0_11, %c0_12] : memref<16x256xf32, #tpu.memory_space<vmem>>, vector<16x256xf32>
      tpu.vector_store %arg7[%c0_11, %c0_12], %12 {strides = array<i32>} : memref<16x256xf32, #tpu.memory_space<vmem>>, vector<16x256xf32>,
    } else {
    }
    %c0 = arith.constant 0 : index
    %c0_1 = arith.constant 0 : index
    %3 = vector.load %arg7[%c0, %c0_1] : memref<16x256xf32, #tpu.memory_space<vmem>>, vector<16x256xf32>
    %c0_2 = arith.constant 0 : index
    %c0_3 = arith.constant 0 : index
    %4 = vector.load %arg3[%c0_2, %c0_3] : memref<16x128xbf16, #tpu.memory_space<vmem>>, vector<16x128xbf16>
    %c0_4 = arith.constant 0 : index
    %c0_5 = arith.constant 0 : index
    %5 = vector.load %arg4[%c0_4, %c0_5] : memref<128x256xbf16, #tpu.memory_space<vmem>>, vector<128x256xbf16>
    %cst = arith.constant dense<0.000000e+00> : vector<16x256xf32>
    %6 = tpu.matmul %4, %5, %cst {dimension_numbers = #tpu.dot_dimension_numbers<[1], [0], [0], [1], [0, 0, 1, 1], [], []>} : vector<16x128xbf16>, vector<128x256xbf16>, vector<16x256xf32> -> vector<16x256xf32>
    %7 = arith.addf %3, %6 : vector<16x256xf32>
    %c0_6 = arith.constant 0 : index
    %c0_7 = arith.constant 0 : index
    %8 = vector.load %arg7[%c0_6, %c0_7] : memref<16x256xf32, #tpu.memory_space<vmem>>, vector<16x256xf32>
    tpu.vector_store %arg7[%c0_6, %c0_7], %7 {strides = array<i32>} : memref<16x256xf32, #tpu.memory_space<vmem>>, vector<16x256xf32>,
    %c0_i32_8 = arith.constant 0 : i32
    %9 = arith.cmpi eq, %arg2, %c0_i32_8 : i32
    %10 = arith.extui %9 : i1 to i32
    %c0_i32_9 = arith.constant 0 : i32
    %11 = arith.cmpi ne, %10, %c0_i32_9 : i32
    scf.if %11 {
      %c0_10 = arith.constant 0 : index
      %c0_11 = arith.constant 0 : index
      %12 = vector.load %arg7[%c0_10, %c0_11] : memref<16x256xf32, #tpu.memory_space<vmem>>, vector<16x256xf32>
      %c0_12 = arith.constant 0 : index
      %c0_13 = arith.constant 0 : index
      %13 = vector.load %arg5[%c0_12, %c0_13] : memref<1x256xf32, #tpu.memory_space<vmem>>, vector<1x256xf32>
      %14 = vector.broadcast %13 : vector<1x256xf32> to vector<16x256xf32>
      %15 = arith.addf %12, %14 : vector<16x256xf32>
      %16 = arith.truncf %15 : vector<16x256xf32> to vector<16x256xbf16>
      %c0_14 = arith.constant 0 : index
      %c0_15 = arith.constant 0 : index
      %17 = vector.load %arg6[%c0_14, %c0_15] : memref<16x256xbf16, #tpu.memory_space<vmem>>, vector<16x256xbf16>
      tpu.vector_store %arg6[%c0_14, %c0_15], %16 {strides = array<i32>} : memref<16x256xbf16, #tpu.memory_space<vmem>>, vector<16x256xbf16>,
    } else {
    }
    return
  }
  func.func @transform_0(%arg0: i32, %arg1: i32, %arg2: i32) -> (i32, i32) {
    %c0_i32 = arith.constant 0 : i32
    return %arg0, %arg2 : i32, i32
  }
  func.func @transform_1(%arg0: i32, %arg1: i32, %arg2: i32) -> (i32, i32) {
    %c0_i32 = arith.constant 0 : i32
    return %arg2, %arg1 : i32, i32
  }
  func.func @transform_2(%arg0: i32, %arg1: i32, %arg2: i32) -> (i32, i32) {
    %c0_i32 = arith.constant 0 : i32
    %c0_i32_0 = arith.constant 0 : i32
    return %c0_i32, %arg1 : i32, i32
  }
  func.func @transform_3(%arg0: i32, %arg1: i32, %arg2: i32) -> (i32, i32) {
    %c0_i32 = arith.constant 0 : i32
    return %arg0, %arg1 : i32, i32
  }
}

module attributes {stable_mosaic.version = 11 : i64} {
  func.func @_cross_attn_kernel(%arg0: i32, %arg1: i32, %arg2: memref<1x8x128xbf16, #tpu.memory_space<vmem>>, %arg3: memref<1x8x256xbf16, #tpu.memory_space<vmem>>, %arg4: memref<1x1x8xf32, #tpu.memory_space<vmem>>, %arg5: memref<1x8x128xbf16, #tpu.memory_space<vmem>>) attributes {dimension_semantics = [#tpu.dimension_semantics<parallel>, #tpu.dimension_semantics<parallel>], iteration_bounds = array<i64: 2, 1>, scalar_prefetch = 0 : i64, scratch_operands = 0 : i64, tpu.core_type = #tpu.core_type<tc>, window_params = [{transform_indices = @transform_0, window_bounds = array<i64: 1, 8, 128>}, {transform_indices = @transform_1, window_bounds = array<i64: 1, 8, 256>}, {transform_indices = @transform_2, window_bounds = array<i64: 1, 1, 8>}, {transform_indices = @transform_3, window_bounds = array<i64: 1, 8, 128>}]} {
    %c0 = arith.constant 0 : index
    %c0_0 = arith.constant 0 : index
    %c0_1 = arith.constant 0 : index
    %0 = vector.load %arg2[%c0, %c0_0, %c0_1] : memref<1x8x128xbf16, #tpu.memory_space<vmem>>, vector<1x8x128xbf16>
    %1 = vector.shape_cast %0 : vector<1x8x128xbf16> to vector<8x128xbf16>
    %2 = arith.extf %1 : vector<8x128xbf16> to vector<8x128xf32>
    %cst = arith.constant 0.176776692 : f32
    %3 = vector.broadcast %cst : f32 to vector<8x128xf32>
    %4 = arith.mulf %2, %3 : vector<8x128xf32>
    %5 = arith.truncf %4 : vector<8x128xf32> to vector<8x128xbf16>
    %c0_2 = arith.constant 0 : index
    %c0_3 = arith.constant 0 : index
    %c0_4 = arith.constant 0 : index
    %6 = vector.load %arg3[%c0_2, %c0_3, %c0_4] : memref<1x8x256xbf16, #tpu.memory_space<vmem>>, vector<1x8x256xbf16>
    %7 = vector.shape_cast %6 : vector<1x8x256xbf16> to vector<8x256xbf16>
    %8 = vector.extract_strided_slice %7 {offsets = [0, 0], sizes = [8, 128], strides = [1, 1]} : vector<8x256xbf16> to vector<8x128xbf16>
    %9 = vector.extract_strided_slice %7 {offsets = [0, 128], sizes = [8, 128], strides = [1, 1]} : vector<8x256xbf16> to vector<8x128xbf16>
    %c0_5 = arith.constant 0 : index
    %c0_6 = arith.constant 0 : index
    %c0_7 = arith.constant 0 : index
    %10 = vector.load %arg4[%c0_5, %c0_6, %c0_7] : memref<1x1x8xf32, #tpu.memory_space<vmem>>, vector<1x1x8xf32>
    %11 = vector.shape_cast %10 : vector<1x1x8xf32> to vector<1x8xf32>
    %12 = vector.extract_strided_slice %5 {offsets = [0, 0], sizes = [8, 32], strides = [1, 1]} : vector<8x128xbf16> to vector<8x32xbf16>
    %13 = vector.extract_strided_slice %8 {offsets = [0, 0], sizes = [8, 32], strides = [1, 1]} : vector<8x128xbf16> to vector<8x32xbf16>
    %cst_8 = arith.constant dense<0.000000e+00> : vector<8x8xf32>
    %14 = tpu.matmul %12, %13, %cst_8 {dimension_numbers = #tpu.dot_dimension_numbers<[1], [1], [0], [0], [0, 0, 1, 0], [], []>} : vector<8x32xbf16>, vector<8x32xbf16>, vector<8x8xf32> -> vector<8x8xf32>
    %15 = vector.broadcast %11 : vector<1x8xf32> to vector<8x8xf32>
    %16 = arith.addf %14, %15 : vector<8x8xf32>
    %cst_9 = arith.constant dense<0xFF800000> : vector<8xf32>
    %17 = vector.multi_reduction <maximumf>, %16, %cst_9 [1] : vector<8x8xf32> to vector<8xf32>
    %18 = vector.shape_cast %17 : vector<8xf32> to vector<8x1xf32>
    %19 = vector.broadcast %18 : vector<8x1xf32> to vector<8x8xf32>
    %20 = arith.subf %16, %19 : vector<8x8xf32>
    %21 = math.exp %20 : vector<8x8xf32>
    %cst_10 = arith.constant dense<0.000000e+00> : vector<8xf32>
    %22 = vector.multi_reduction <add>, %21, %cst_10 [1] : vector<8x8xf32> to vector<8xf32>
    %23 = vector.shape_cast %22 : vector<8xf32> to vector<8x1xf32>
    %24 = tpu.reciprocal %23 {approx = true} : vector<8x1xf32> -> vector<8x1xf32>
    %25 = arith.truncf %21 : vector<8x8xf32> to vector<8x8xbf16>
    %26 = vector.extract_strided_slice %9 {offsets = [0, 0], sizes = [8, 32], strides = [1, 1]} : vector<8x128xbf16> to vector<8x32xbf16>
    %cst_11 = arith.constant dense<0.000000e+00> : vector<8x32xf32>
    %27 = tpu.matmul %25, %26, %cst_11 {dimension_numbers = #tpu.dot_dimension_numbers<[1], [0], [0], [1], [0, 0, 1, 1], [], []>} : vector<8x8xbf16>, vector<8x32xbf16>, vector<8x32xf32> -> vector<8x32xf32>
    %28 = vector.broadcast %24 : vector<8x1xf32> to vector<8x32xf32>
    %29 = arith.mulf %27, %28 : vector<8x32xf32>
    %30 = arith.truncf %29 : vector<8x32xf32> to vector<8x32xbf16>
    %c0_12 = arith.constant 0 : index
    %c0_13 = arith.constant 0 : index
    %c0_14 = arith.constant 0 : index
    %31 = vector.load %arg5[%c0_12, %c0_13, %c0_14] : memref<1x8x128xbf16, #tpu.memory_space<vmem>>, vector<1x8x32xbf16>
    %32 = vector.shape_cast %31 : vector<1x8x32xbf16> to vector<8x32xbf16>
    %33 = vector.shape_cast %30 : vector<8x32xbf16> to vector<1x8x32xbf16>
    tpu.vector_store %arg5[%c0_12, %c0_13, %c0_14], %33 {strides = array<i32>} : memref<1x8x128xbf16, #tpu.memory_space<vmem>>, vector<1x8x32xbf16>,
    %34 = vector.extract_strided_slice %5 {offsets = [0, 32], sizes = [8, 32], strides = [1, 1]} : vector<8x128xbf16> to vector<8x32xbf16>
    %35 = vector.extract_strided_slice %8 {offsets = [0, 32], sizes = [8, 32], strides = [1, 1]} : vector<8x128xbf16> to vector<8x32xbf16>
    %cst_15 = arith.constant dense<0.000000e+00> : vector<8x8xf32>
    %36 = tpu.matmul %34, %35, %cst_15 {dimension_numbers = #tpu.dot_dimension_numbers<[1], [1], [0], [0], [0, 0, 1, 0], [], []>} : vector<8x32xbf16>, vector<8x32xbf16>, vector<8x8xf32> -> vector<8x8xf32>
    %37 = vector.broadcast %11 : vector<1x8xf32> to vector<8x8xf32>
    %38 = arith.addf %36, %37 : vector<8x8xf32>
    %cst_16 = arith.constant dense<0xFF800000> : vector<8xf32>
    %39 = vector.multi_reduction <maximumf>, %38, %cst_16 [1] : vector<8x8xf32> to vector<8xf32>
    %40 = vector.shape_cast %39 : vector<8xf32> to vector<8x1xf32>
    %41 = vector.broadcast %40 : vector<8x1xf32> to vector<8x8xf32>
    %42 = arith.subf %38, %41 : vector<8x8xf32>
    %43 = math.exp %42 : vector<8x8xf32>
    %cst_17 = arith.constant dense<0.000000e+00> : vector<8xf32>
    %44 = vector.multi_reduction <add>, %43, %cst_17 [1] : vector<8x8xf32> to vector<8xf32>
    %45 = vector.shape_cast %44 : vector<8xf32> to vector<8x1xf32>
    %46 = tpu.reciprocal %45 {approx = true} : vector<8x1xf32> -> vector<8x1xf32>
    %47 = arith.truncf %43 : vector<8x8xf32> to vector<8x8xbf16>
    %48 = vector.extract_strided_slice %9 {offsets = [0, 32], sizes = [8, 32], strides = [1, 1]} : vector<8x128xbf16> to vector<8x32xbf16>
    %cst_18 = arith.constant dense<0.000000e+00> : vector<8x32xf32>
    %49 = tpu.matmul %47, %48, %cst_18 {dimension_numbers = #tpu.dot_dimension_numbers<[1], [0], [0], [1], [0, 0, 1, 1], [], []>} : vector<8x8xbf16>, vector<8x32xbf16>, vector<8x32xf32> -> vector<8x32xf32>
    %50 = vector.broadcast %46 : vector<8x1xf32> to vector<8x32xf32>
    %51 = arith.mulf %49, %50 : vector<8x32xf32>
    %52 = arith.truncf %51 : vector<8x32xf32> to vector<8x32xbf16>
    %c0_19 = arith.constant 0 : index
    %c0_20 = arith.constant 0 : index
    %c32 = arith.constant 32 : index
    %53 = vector.load %arg5[%c0_19, %c0_20, %c32] : memref<1x8x128xbf16, #tpu.memory_space<vmem>>, vector<1x8x32xbf16>
    %54 = vector.shape_cast %53 : vector<1x8x32xbf16> to vector<8x32xbf16>
    %55 = vector.shape_cast %52 : vector<8x32xbf16> to vector<1x8x32xbf16>
    tpu.vector_store %arg5[%c0_19, %c0_20, %c32], %55 {strides = array<i32>} : memref<1x8x128xbf16, #tpu.memory_space<vmem>>, vector<1x8x32xbf16>,
    %56 = vector.extract_strided_slice %5 {offsets = [0, 64], sizes = [8, 32], strides = [1, 1]} : vector<8x128xbf16> to vector<8x32xbf16>
    %57 = vector.extract_strided_slice %8 {offsets = [0, 64], sizes = [8, 32], strides = [1, 1]} : vector<8x128xbf16> to vector<8x32xbf16>
    %cst_21 = arith.constant dense<0.000000e+00> : vector<8x8xf32>
    %58 = tpu.matmul %56, %57, %cst_21 {dimension_numbers = #tpu.dot_dimension_numbers<[1], [1], [0], [0], [0, 0, 1, 0], [], []>} : vector<8x32xbf16>, vector<8x32xbf16>, vector<8x8xf32> -> vector<8x8xf32>
    %59 = vector.broadcast %11 : vector<1x8xf32> to vector<8x8xf32>
    %60 = arith.addf %58, %59 : vector<8x8xf32>
    %cst_22 = arith.constant dense<0xFF800000> : vector<8xf32>
    %61 = vector.multi_reduction <maximumf>, %60, %cst_22 [1] : vector<8x8xf32> to vector<8xf32>
    %62 = vector.shape_cast %61 : vector<8xf32> to vector<8x1xf32>
    %63 = vector.broadcast %62 : vector<8x1xf32> to vector<8x8xf32>
    %64 = arith.subf %60, %63 : vector<8x8xf32>
    %65 = math.exp %64 : vector<8x8xf32>
    %cst_23 = arith.constant dense<0.000000e+00> : vector<8xf32>
    %66 = vector.multi_reduction <add>, %65, %cst_23 [1] : vector<8x8xf32> to vector<8xf32>
    %67 = vector.shape_cast %66 : vector<8xf32> to vector<8x1xf32>
    %68 = tpu.reciprocal %67 {approx = true} : vector<8x1xf32> -> vector<8x1xf32>
    %69 = arith.truncf %65 : vector<8x8xf32> to vector<8x8xbf16>
    %70 = vector.extract_strided_slice %9 {offsets = [0, 64], sizes = [8, 32], strides = [1, 1]} : vector<8x128xbf16> to vector<8x32xbf16>
    %cst_24 = arith.constant dense<0.000000e+00> : vector<8x32xf32>
    %71 = tpu.matmul %69, %70, %cst_24 {dimension_numbers = #tpu.dot_dimension_numbers<[1], [0], [0], [1], [0, 0, 1, 1], [], []>} : vector<8x8xbf16>, vector<8x32xbf16>, vector<8x32xf32> -> vector<8x32xf32>
    %72 = vector.broadcast %68 : vector<8x1xf32> to vector<8x32xf32>
    %73 = arith.mulf %71, %72 : vector<8x32xf32>
    %74 = arith.truncf %73 : vector<8x32xf32> to vector<8x32xbf16>
    %c0_25 = arith.constant 0 : index
    %c0_26 = arith.constant 0 : index
    %c64 = arith.constant 64 : index
    %75 = vector.load %arg5[%c0_25, %c0_26, %c64] : memref<1x8x128xbf16, #tpu.memory_space<vmem>>, vector<1x8x32xbf16>
    %76 = vector.shape_cast %75 : vector<1x8x32xbf16> to vector<8x32xbf16>
    %77 = vector.shape_cast %74 : vector<8x32xbf16> to vector<1x8x32xbf16>
    tpu.vector_store %arg5[%c0_25, %c0_26, %c64], %77 {strides = array<i32>} : memref<1x8x128xbf16, #tpu.memory_space<vmem>>, vector<1x8x32xbf16>,
    %78 = vector.extract_strided_slice %5 {offsets = [0, 96], sizes = [8, 32], strides = [1, 1]} : vector<8x128xbf16> to vector<8x32xbf16>
    %79 = vector.extract_strided_slice %8 {offsets = [0, 96], sizes = [8, 32], strides = [1, 1]} : vector<8x128xbf16> to vector<8x32xbf16>
    %cst_27 = arith.constant dense<0.000000e+00> : vector<8x8xf32>
    %80 = tpu.matmul %78, %79, %cst_27 {dimension_numbers = #tpu.dot_dimension_numbers<[1], [1], [0], [0], [0, 0, 1, 0], [], []>} : vector<8x32xbf16>, vector<8x32xbf16>, vector<8x8xf32> -> vector<8x8xf32>
    %81 = vector.broadcast %11 : vector<1x8xf32> to vector<8x8xf32>
    %82 = arith.addf %80, %81 : vector<8x8xf32>
    %cst_28 = arith.constant dense<0xFF800000> : vector<8xf32>
    %83 = vector.multi_reduction <maximumf>, %82, %cst_28 [1] : vector<8x8xf32> to vector<8xf32>
    %84 = vector.shape_cast %83 : vector<8xf32> to vector<8x1xf32>
    %85 = vector.broadcast %84 : vector<8x1xf32> to vector<8x8xf32>
    %86 = arith.subf %82, %85 : vector<8x8xf32>
    %87 = math.exp %86 : vector<8x8xf32>
    %cst_29 = arith.constant dense<0.000000e+00> : vector<8xf32>
    %88 = vector.multi_reduction <add>, %87, %cst_29 [1] : vector<8x8xf32> to vector<8xf32>
    %89 = vector.shape_cast %88 : vector<8xf32> to vector<8x1xf32>
    %90 = tpu.reciprocal %89 {approx = true} : vector<8x1xf32> -> vector<8x1xf32>
    %91 = arith.truncf %87 : vector<8x8xf32> to vector<8x8xbf16>
    %92 = vector.extract_strided_slice %9 {offsets = [0, 96], sizes = [8, 32], strides = [1, 1]} : vector<8x128xbf16> to vector<8x32xbf16>
    %cst_30 = arith.constant dense<0.000000e+00> : vector<8x32xf32>
    %93 = tpu.matmul %91, %92, %cst_30 {dimension_numbers = #tpu.dot_dimension_numbers<[1], [0], [0], [1], [0, 0, 1, 1], [], []>} : vector<8x8xbf16>, vector<8x32xbf16>, vector<8x32xf32> -> vector<8x32xf32>
    %94 = vector.broadcast %90 : vector<8x1xf32> to vector<8x32xf32>
    %95 = arith.mulf %93, %94 : vector<8x32xf32>
    %96 = arith.truncf %95 : vector<8x32xf32> to vector<8x32xbf16>
    %c0_31 = arith.constant 0 : index
    %c0_32 = arith.constant 0 : index
    %c96 = arith.constant 96 : index
    %97 = vector.load %arg5[%c0_31, %c0_32, %c96] : memref<1x8x128xbf16, #tpu.memory_space<vmem>>, vector<1x8x32xbf16>
    %98 = vector.shape_cast %97 : vector<1x8x32xbf16> to vector<8x32xbf16>
    %99 = vector.shape_cast %96 : vector<8x32xbf16> to vector<1x8x32xbf16>
    tpu.vector_store %arg5[%c0_31, %c0_32, %c96], %99 {strides = array<i32>} : memref<1x8x128xbf16, #tpu.memory_space<vmem>>, vector<1x8x32xbf16>,
    return
  }
  func.func @transform_0(%arg0: i32, %arg1: i32) -> (i32, i32, i32) {
    %c0_i32 = arith.constant 0 : i32
    %c0_i32_0 = arith.constant 0 : i32
    return %arg0, %arg1, %c0_i32 : i32, i32, i32
  }
  func.func @transform_1(%arg0: i32, %arg1: i32) -> (i32, i32, i32) {
    %c0_i32 = arith.constant 0 : i32
    %c0_i32_0 = arith.constant 0 : i32
    %c0_i32_1 = arith.constant 0 : i32
    return %arg0, %c0_i32, %c0_i32_0 : i32, i32, i32
  }
  func.func @transform_2(%arg0: i32, %arg1: i32) -> (i32, i32, i32) {
    %c0_i32 = arith.constant 0 : i32
    %c0_i32_0 = arith.constant 0 : i32
    %c0_i32_1 = arith.constant 0 : i32
    return %arg0, %c0_i32, %c0_i32_0 : i32, i32, i32
  }
  func.func @transform_3(%arg0: i32, %arg1: i32) -> (i32, i32, i32) {
    %c0_i32 = arith.constant 0 : i32
    %c0_i32_0 = arith.constant 0 : i32
    return %arg0, %arg1, %c0_i32 : i32, i32, i32
  }
}

module attributes {stable_mosaic.version = 11 : i64} {
  func.func @_ln_kernel(%arg0: i32, %arg1: memref<16x128xbf16, #tpu.memory_space<vmem>>, %arg2: memref<1x128xf32, #tpu.memory_space<vmem>>, %arg3: memref<1x128xf32, #tpu.memory_space<vmem>>, %arg4: memref<16x128xbf16, #tpu.memory_space<vmem>>) attributes {dimension_semantics = [#tpu.dimension_semantics<parallel>], iteration_bounds = array<i64: 1>, scalar_prefetch = 0 : i64, scratch_operands = 0 : i64, tpu.core_type = #tpu.core_type<tc>, window_params = [{transform_indices = @transform_0, window_bounds = array<i64: 16, 128>}, {pipeline_mode = #tpu.pipeline_mode<synchronous>, transform_indices = @transform_1, window_bounds = array<i64: 1, 128>}, {pipeline_mode = #tpu.pipeline_mode<synchronous>, transform_indices = @transform_2, window_bounds = array<i64: 1, 128>}, {transform_indices = @transform_3, window_bounds = array<i64: 16, 128>}]} {
    %c0 = arith.constant 0 : index
    %c0_0 = arith.constant 0 : index
    %0 = vector.load %arg1[%c0, %c0_0] : memref<16x128xbf16, #tpu.memory_space<vmem>>, vector<16x128xbf16>
    %1 = arith.extf %0 : vector<16x128xbf16> to vector<16x128xf32>
    %cst = arith.constant dense<0.000000e+00> : vector<16xf32>
    %2 = vector.multi_reduction <add>, %1, %cst [1] : vector<16x128xf32> to vector<16xf32>
    %3 = vector.shape_cast %2 : vector<16xf32> to vector<16x1xf32>
    %cst_1 = arith.constant 1.280000e+02 : f32
    %4 = vector.broadcast %cst_1 : f32 to vector<16x1xf32>
    %5 = arith.divf %3, %4 : vector<16x1xf32>
    %6 = vector.broadcast %5 : vector<16x1xf32> to vector<16x128xf32>
    %7 = arith.subf %1, %6 : vector<16x128xf32>
    %8 = arith.mulf %7, %7 : vector<16x128xf32>
    %cst_2 = arith.constant dense<0.000000e+00> : vector<16xf32>
    %9 = vector.multi_reduction <add>, %8, %cst_2 [1] : vector<16x128xf32> to vector<16xf32>
    %10 = vector.shape_cast %9 : vector<16xf32> to vector<16x1xf32>
    %cst_3 = arith.constant 1.280000e+02 : f32
    %11 = vector.broadcast %cst_3 : f32 to vector<16x1xf32>
    %12 = arith.divf %10, %11 : vector<16x1xf32>
    %13 = vector.broadcast %5 : vector<16x1xf32> to vector<16x128xf32>
    %14 = arith.subf %1, %13 : vector<16x128xf32>
    %cst_4 = arith.constant 9.99999974E-6 : f32
    %15 = vector.broadcast %cst_4 : f32 to vector<16x1xf32>
    %16 = arith.addf %12, %15 : vector<16x1xf32>
    %17 = math.rsqrt %16 : vector<16x1xf32>
    %18 = vector.broadcast %17 : vector<16x1xf32> to vector<16x128xf32>
    %19 = arith.mulf %14, %18 : vector<16x128xf32>
    %c0_5 = arith.constant 0 : index
    %c0_6 = arith.constant 0 : index
    %20 = vector.load %arg2[%c0_5, %c0_6] : memref<1x128xf32, #tpu.memory_space<vmem>>, vector<1x128xf32>
    %21 = vector.broadcast %20 : vector<1x128xf32> to vector<16x128xf32>
    %22 = arith.mulf %19, %21 : vector<16x128xf32>
    %c0_7 = arith.constant 0 : index
    %c0_8 = arith.constant 0 : index
    %23 = vector.load %arg3[%c0_7, %c0_8] : memref<1x128xf32, #tpu.memory_space<vmem>>, vector<1x128xf32>
    %24 = vector.broadcast %23 : vector<1x128xf32> to vector<16x128xf32>
    %25 = arith.addf %22, %24 : vector<16x128xf32>
    %26 = arith.truncf %25 : vector<16x128xf32> to vector<16x128xbf16>
    %c0_9 = arith.constant 0 : index
    %c0_10 = arith.constant 0 : index
    %27 = vector.load %arg4[%c0_9, %c0_10] : memref<16x128xbf16, #tpu.memory_space<vmem>>, vector<16x128xbf16>
    tpu.vector_store %arg4[%c0_9, %c0_10], %26 {strides = array<i32>} : memref<16x128xbf16, #tpu.memory_space<vmem>>, vector<16x128xbf16>,
    return
  }
  func.func @transform_0(%arg0: i32) -> (i32, i32) {
    %c0_i32 = arith.constant 0 : i32
    %c0_i32_0 = arith.constant 0 : i32
    return %arg0, %c0_i32 : i32, i32
  }
  func.func @transform_1(%arg0: i32) -> (i32, i32) {
    %c0_i32 = arith.constant 0 : i32
    %c0_i32_0 = arith.constant 0 : i32
    %c0_i32_1 = arith.constant 0 : i32
    return %c0_i32, %c0_i32_0 : i32, i32
  }
  func.func @transform_2(%arg0: i32) -> (i32, i32) {
    %c0_i32 = arith.constant 0 : i32
    %c0_i32_0 = arith.constant 0 : i32
    %c0_i32_1 = arith.constant 0 : i32
    return %c0_i32, %c0_i32_0 : i32, i32
  }
  func.func @transform_3(%arg0: i32) -> (i32, i32) {
    %c0_i32 = arith.constant 0 : i32
    %c0_i32_0 = arith.constant 0 : i32
    return %arg0, %c0_i32 : i32, i32
  }
}

module attributes {stable_mosaic.version = 11 : i64} {
  func.func @_matmul_kernel(%arg0: i32, %arg1: i32, %arg2: i32, %arg3: memref<16x128xbf16, #tpu.memory_space<vmem>>, %arg4: memref<128x64xbf16, #tpu.memory_space<vmem>>, %arg5: memref<1x64xf32, #tpu.memory_space<vmem>>, %arg6: memref<16x64xf32, #tpu.memory_space<vmem>>, %arg7: memref<16x64xf32, #tpu.memory_space<vmem>>) attributes {dimension_semantics = [#tpu.dimension_semantics<parallel>, #tpu.dimension_semantics<parallel>, #tpu.dimension_semantics<arbitrary>], iteration_bounds = array<i64: 1, 1, 1>, scalar_prefetch = 0 : i64, scratch_operands = 1 : i64, tpu.core_type = #tpu.core_type<tc>, window_params = [{transform_indices = @transform_0, window_bounds = array<i64: 16, 128>}, {transform_indices = @transform_1, window_bounds = array<i64: 128, 64>}, {transform_indices = @transform_2, window_bounds = array<i64: 1, 64>}, {transform_indices = @transform_3, window_bounds = array<i64: 16, 64>}]} {
    %c0_i32 = arith.constant 0 : i32
    %0 = arith.cmpi eq, %arg2, %c0_i32 : i32
    %1 = arith.extui %0 : i1 to i32
    %c0_i32_0 = arith.constant 0 : i32
    %2 = arith.cmpi ne, %1, %c0_i32_0 : i32
    scf.if %2 {
      %cst_10 = arith.constant 0.000000e+00 : f32
      %12 = vector.broadcast %cst_10 : f32 to vector<16x64xf32>
      %c0_11 = arith.constant 0 : index
      %c0_12 = arith.constant 0 : index
      %13 = vector.load %arg7[%c0_11, %c0_12] : memref<16x64xf32, #tpu.memory_space<vmem>>, vector<16x64xf32>
      tpu.vector_store %arg7[%c0_11, %c0_12], %12 {strides = array<i32>} : memref<16x64xf32, #tpu.memory_space<vmem>>, vector<16x64xf32>,
    } else {
    }
    %c0 = arith.constant 0 : index
    %c0_1 = arith.constant 0 : index
    %3 = vector.load %arg7[%c0, %c0_1] : memref<16x64xf32, #tpu.memory_space<vmem>>, vector<16x64xf32>
    %c0_2 = arith.constant 0 : index
    %c0_3 = arith.constant 0 : index
    %4 = vector.load %arg3[%c0_2, %c0_3] : memref<16x128xbf16, #tpu.memory_space<vmem>>, vector<16x128xbf16>
    %c0_4 = arith.constant 0 : index
    %c0_5 = arith.constant 0 : index
    %5 = vector.load %arg4[%c0_4, %c0_5] : memref<128x64xbf16, #tpu.memory_space<vmem>>, vector<128x64xbf16>
    %cst = arith.constant dense<0.000000e+00> : vector<16x64xf32>
    %6 = tpu.matmul %4, %5, %cst {dimension_numbers = #tpu.dot_dimension_numbers<[1], [0], [0], [1], [0, 0, 1, 1], [], []>} : vector<16x128xbf16>, vector<128x64xbf16>, vector<16x64xf32> -> vector<16x64xf32>
    %7 = arith.addf %3, %6 : vector<16x64xf32>
    %c0_6 = arith.constant 0 : index
    %c0_7 = arith.constant 0 : index
    %8 = vector.load %arg7[%c0_6, %c0_7] : memref<16x64xf32, #tpu.memory_space<vmem>>, vector<16x64xf32>
    tpu.vector_store %arg7[%c0_6, %c0_7], %7 {strides = array<i32>} : memref<16x64xf32, #tpu.memory_space<vmem>>, vector<16x64xf32>,
    %c0_i32_8 = arith.constant 0 : i32
    %9 = arith.cmpi eq, %arg2, %c0_i32_8 : i32
    %10 = arith.extui %9 : i1 to i32
    %c0_i32_9 = arith.constant 0 : i32
    %11 = arith.cmpi ne, %10, %c0_i32_9 : i32
    scf.if %11 {
      %c0_10 = arith.constant 0 : index
      %c0_11 = arith.constant 0 : index
      %12 = vector.load %arg7[%c0_10, %c0_11] : memref<16x64xf32, #tpu.memory_space<vmem>>, vector<16x64xf32>
      %c0_12 = arith.constant 0 : index
      %c0_13 = arith.constant 0 : index
      %13 = vector.load %arg5[%c0_12, %c0_13] : memref<1x64xf32, #tpu.memory_space<vmem>>, vector<1x64xf32>
      %14 = vector.broadcast %13 : vector<1x64xf32> to vector<16x64xf32>
      %15 = arith.addf %12, %14 : vector<16x64xf32>
      %c0_14 = arith.constant 0 : index
      %c0_15 = arith.constant 0 : index
      %16 = vector.load %arg6[%c0_14, %c0_15] : memref<16x64xf32, #tpu.memory_space<vmem>>, vector<16x64xf32>
      tpu.vector_store %arg6[%c0_14, %c0_15], %15 {strides = array<i32>} : memref<16x64xf32, #tpu.memory_space<vmem>>, vector<16x64xf32>,
    } else {
    }
    return
  }
  func.func @transform_0(%arg0: i32, %arg1: i32, %arg2: i32) -> (i32, i32) {
    %c0_i32 = arith.constant 0 : i32
    return %arg0, %arg2 : i32, i32
  }
  func.func @transform_1(%arg0: i32, %arg1: i32, %arg2: i32) -> (i32, i32) {
    %c0_i32 = arith.constant 0 : i32
    return %arg2, %arg1 : i32, i32
  }
  func.func @transform_2(%arg0: i32, %arg1: i32, %arg2: i32) -> (i32, i32) {
    %c0_i32 = arith.constant 0 : i32
    %c0_i32_0 = arith.constant 0 : i32
    return %c0_i32, %arg1 : i32, i32
  }
  func.func @transform_3(%arg0: i32, %arg1: i32, %arg2: i32) -> (i32, i32) {
    %c0_i32 = arith.constant 0 : i32
    return %arg0, %arg1 : i32, i32
  }
}

</mosaic_0001>

<bundles_post_ra>
// kernel: seq2seq_forward.29
= control target key start
LH: loop header
LB: loop body
LE: loop exit
PB: predicated region body
PF: predicated region fallthrough
CT: control target
= control target key end

     0   :  { %v293_v0 = vmov 0.0   ;;  %vm294_vm0 = vmmov 0   ;;  %s372_s1 = inlined_call_operand.vmem [shape: bf16[128,128], index: 1, kind: input, shape index: {}]   ;;  %s373_s0 = inlined_call_operand.vmem [shape: bf16[16,128], index: 0, kind: input, shape index: {}]   ;;  %s374_s3 = inlined_call_operand.vmem [shape: bf16[16,128], index: 3, kind: input, shape index: {}]   ;;  %s375_s2 = inlined_call_operand.vmem [shape: f32[1,128], index: 2, kind: input, shape index: {}]   ;;  %s376_s4 = inlined_call_operand.vmem [shape: f32[1,128], index: 4, kind: input, shape index: {}]   ;;  %s377_s5 = inlined_call_operand.vmem [shape: f32[1,128], index: 5, kind: input, shape index: {}]   ;;  %s378_s6 = inlined_call_operand.vmem [shape: bf16[16,128], index: 6, kind: output, shape index: {}]  }
   0x1   :  { %258 = vmatprep.subr.bf16.mxu0 %v293_v0  ;;  %v280_v1 = vld [vmem:[%s372_s1 + $0x38] sm:$0xff]   ;;  %274 = vmatprep.mubr.msk.bf16.mxu0 %vm294_vm0, %v293_v0  ;;  %v281_v2 = vld [vmem:[%s372_s1 + $0x30] sm:$0xff]   ;;  %v282_v3 = vld [vmem:[%s372_s1 + $0x28] sm:$0xff]  }
   0x2   :  { %259 = vmatpush3.bf16.msra.mxu0 %v280_v1  ;;  %v283_v4 = vld [vmem:[%s372_s1 + $0x20] sm:$0xff]   ;;  %v284_v5 = vld [vmem:[%s372_s1 + $0x18] sm:$0xff]   ;;  %v285_v6 = vld [vmem:[%s372_s1 + $0x10] sm:$0xff]  }
   0x3   :  { %260 = vmatprep.subr.bf16.mxu0 %v293_v0  ;;  %v286_v7 = vld [vmem:[%s372_s1 + $0x8] sm:$0xff]   ;;  %v287_v8 = vld [vmem:[%s372_s1] sm:$0xff]  }
   0x4   :  { %v288_v9 = vld [vmem:[%s373_s0] sm:$0xff]  }
   0x5   :  { %v241_v10 = vld [vmem:[%s374_s3] sm:$0xff]  }
   0x6   :  { %261 = vmatpush3.bf16.msra.mxu0 %v281_v2  ;;  %v233_v11 = vld [vmem:[%s375_s2] ss:$0 sm:$0xff]  ;;  %v242_v12 = vunpack.c.l.bf16 %v241_v10  ;;  %v243_v17 = vunpack.c.h.bf16 %v241_v10 }
   0x7   :  { %262 = vmatprep.subr.bf16.mxu0 %v293_v0  ;;  %v234_v38 = vld [vmem:[%s376_s4] ss:$0 sm:$0xff] }
   0x8   :  { %v235_v42 = vld [vmem:[%s377_s5] ss:$0 sm:$0xff] }
   0xa   :  { %263 = vmatpush3.bf16.msra.mxu0 %v282_v3 }
   0xb   :  { %264 = vmatprep.subr.bf16.mxu0 %v293_v0 }
   0xe   :  { %265 = vmatpush3.bf16.msra.mxu0 %v283_v4 }
   0xf   :  { %266 = vmatprep.subr.bf16.mxu0 %v293_v0 }
  0x12   :  { %267 = vmatpush3.bf16.msra.mxu0 %v284_v5 }
  0x13   :  { %268 = vmatprep.subr.bf16.mxu0 %v293_v0 }
  0x16   :  { %269 = vmatpush3.bf16.msra.mxu0 %v285_v6 }
  0x17   :  { %270 = vmatprep.subr.bf16.mxu0 %v293_v0 }
  0x1a   :  { %271 = vmatpush3.bf16.msra.mxu0 %v286_v7 }
  0x1b   :  { %272 = vmatprep.subr.bf16.mxu0 %v293_v0 }
  0x1e   :  { %273 = vmatpush3.bf16.msra.mxu0 %v287_v8 }
  0x21   :  { %275 = vmatmul.mubr.bf16.vlgmr.msra.gmra.mxu0 %v288_v9 }
  0xe1   :  { %v138_v13 = vpop.f32.mrf.mxu0 }
  0xe2   :  { %v161_v14 = vadd.f32 %v233_v11, %v138_v13 }
  0xe3   :  { %v276_v15 = vpop.f32.mrf.mxu0 }
  0xe4   :  { %v167_v16 = vadd.f32 %v242_v12, %v161_v14 }
  0xe5   :  { %v141_v18 = vpop.f32.mrf.mxu0 }
  0xe6   :  { %v162_v19 = vadd.f32 %v233_v11, %v141_v18  ;;  %169 = vadd.xlane.f32.xlu0 %v167_v16 }
  0xe7   :  { %v277_v20 = vpop.f32.mrf.mxu0 }
  0xe8   :  { %v168_v21 = vadd.f32 %v243_v17, %v162_v19 }
  0xea   :  { %171 = vadd.xlane.f32.xlu0 %v168_v21 }
 0x16f   :  { %v170_v22 = vpop.xlane.xlu0 %169 }
 0x170   :  { %v174_v23 = vmul.f32 0.0078125, %v170_v22 }
 0x172   :  { %v176_v24 = vsub.f32 %v167_v16, %v174_v23 }
 0x173   :  { %v172_v25 = vpop.xlane.xlu0 %171 }
 0x174   :  { %v175_v26 = vmul.f32 0.0078125, %v172_v25  ;;  %v178_v27 = vmul.f32 %v176_v24, %v176_v24 }
 0x176   :  { %v177_v28 = vsub.f32 %v168_v21, %v175_v26  ;;  %180 = vadd.xlane.f32.xlu1 %v178_v27 }
 0x178   :  { %v179_v29 = vmul.f32 %v177_v28, %v177_v28 }
 0x17a   :  { %182 = vadd.xlane.f32.xlu1 %v179_v29 }
 0x1ff   :  { %v181_v30 = vpop.xlane.xlu1 %180 }
 0x200   :  { %v184_v31 = vmul.f32 0.0078125, %v181_v30 }
 0x202   :  { %v186_v32 = vadd.f32 1e-05, %v184_v31 }
 0x203   :  { %v183_v33 = vpop.xlane.xlu1 %182 }
 0x204   :  { %289 = vrsqrt.f32 %v186_v32  ;;  %v185_v34 = vmul.f32 0.0078125, %v183_v33 }
 0x206   :  { %v187_v35 = vadd.f32 1e-05, %v185_v34 }
 0x208   :  { %291 = vrsqrt.f32 %v187_v35 }
 0x211   :  { %v290_v36 = vpop.eup %289 }
 0x212   :  { %v190_v37 = vmul.f32 %v290_v36, %v176_v24 }
 0x214   :  { %v199_v40 = vmul.f32 %v234_v38, %v190_v37 }
 0x215   :  { %v292_v39 = vpop.eup %291 }
 0x216   :  { %v191_v41 = vmul.f32 %v292_v39, %v177_v28  ;;  %v208_v44 = vadd.f32 %v235_v42, %v199_v40 }
 0x218   :  { %v200_v43 = vmul.f32 %v234_v38, %v191_v41 }
 0x21a   :  { %v209_v45 = vadd.f32 %v235_v42, %v200_v43 }
 0x21c   :  { %v247_v46 = vpack.c.bf16 %v209_v45, %v208_v44 }
 0x21e   :  { %248 = vst [vmem:[%s378_s6] sm:$0xff] %v247_v46  }

// kernel: seq2seq_forward.30
= control target key start
LH: loop header
LB: loop body
LE: loop exit
PB: predicated region body
PF: predicated region fallthrough
CT: control target
= control target key end

     0   :  { %v565_v1 = vmov 0   ;;  %v53_v34 = vlaneseq  ;;  %s723_s1 = inlined_call_operand.vmem [shape: bf16[128,256], index: 1, kind: input, shape index: {}]   ;;  %s724_s0 = inlined_call_operand.vmem [shape: bf16[16,128], index: 0, kind: input, shape index: {}]   ;;  %s725_s3 = inlined_call_operand.vmem [shape: bf16[256,128], index: 3, kind: input, shape index: {}]   ;;  %s726_s2 = inlined_call_operand.vmem [shape: f32[1,256], index: 2, kind: input, shape index: {}]   ;;  %s727_s4 = inlined_call_operand.vmem [shape: f32[1,128], index: 4, kind: input, shape index: {}]   ;;  %s728_s5 = inlined_call_operand.vmem [shape: f32[1,128], index: 5, kind: input, shape index: {}]   ;;  %s729_s6 = inlined_call_operand.vmem [shape: f32[1,128], index: 6, kind: input, shape index: {}]   ;;  %s730_s7 = inlined_call_operand.vmem [shape: bf16[16,128], index: 7, kind: output, shape index: {}]  }
   0x1   :  { %v520_v0 = vld [vmem:[%s723_s1 + $0x74] ss:$8 sps:$4 sm:$0xff]   ;;  %181 = vmatprep.mubr.bf16.mxu0 %v565_v1  ;;  %v522_v2 = vld [vmem:[%s723_s1 + $0x70] ss:$8 sps:$4 sm:$0xff]   ;;  %v523_v3 = vld [vmem:[%s723_s1 + $0x64] ss:$8 sps:$4 sm:$0xff]  }
   0x2   :  { %149 = vmatprep.subr.bf16.mxu0 %v520_v0  ;;  %v525_v4 = vld [vmem:[%s723_s1 + $0x60] ss:$8 sps:$4 sm:$0xff]   ;;  %v526_v5 = vld [vmem:[%s723_s1 + $0x54] ss:$8 sps:$4 sm:$0xff]   ;;  %v528_v6 = vld [vmem:[%s723_s1 + $0x50] ss:$8 sps:$4 sm:$0xff]  }
   0x3   :  { %150 = vmatpush1.bf16.msra.mxu0 %v522_v2  ;;  %v529_v7 = vld [vmem:[%s723_s1 + $0x44] ss:$8 sps:$4 sm:$0xff]   ;;  %v531_v8 = vld [vmem:[%s723_s1 + $0x40] ss:$8 sps:$4 sm:$0xff]   ;;  %v532_v9 = vld [vmem:[%s723_s1 + $0x34] ss:$8 sps:$4 sm:$0xff]  }
   0x4   :  { %151 = vmatprep.subr.bf16.mxu0 %v523_v3  ;;  %v545_v10 = vld [vmem:[%s725_s3 + $0x78] sm:$0xff]   ;;  %v535_v13 = vld [vmem:[%s723_s1 + $0x24] ss:$8 sps:$4 sm:$0xff]   ;;  %v547_v14 = vld [vmem:[%s725_s3 + $0x70] sm:$0xff]   ;;  %v54_v35 = vshrl.u32 %v53_v34, 7 }
   0x5   :  { %v534_v11 = vld [vmem:[%s723_s1 + $0x30] ss:$8 sps:$4 sm:$0xff]   ;;  %497 = vmatprep.subr.bf16.mxu1 %v545_v10  ;;  %v549_v16 = vld [vmem:[%s725_s3 + $0x68] sm:$0xff]   ;;  %v538_v18 = vld [vmem:[%s723_s1 + $0x14] ss:$8 sps:$4 sm:$0xff]  }
   0x6   :  { %v546_v12 = vld [vmem:[%s725_s3 + $0x38] sm:$0xff]   ;;  %v548_v15 = vld [vmem:[%s725_s3 + $0x30] sm:$0xff]   ;;  %v537_v17 = vld [vmem:[%s723_s1 + $0x20] ss:$8 sps:$4 sm:$0xff]   ;;  %v59_v36 = vsub.s32 1, %v54_v35  ;;  %v55_v37 = vsub.s32 0, %v54_v35 }
   0x7   :  { %152 = vmatpush1.bf16.msra.mxu0 %v525_v4  ;;  %498 = vmatpush3.bf16.msra.mxu1 %v546_v12  ;;  %v550_v19 = vld [vmem:[%s725_s3 + $0x28] sm:$0xff]   ;;  %v551_v20 = vld [vmem:[%s725_s3 + $0x60] sm:$0xff]   ;;  %v540_v21 = vld [vmem:[%s723_s1 + $0x10] ss:$8 sps:$4 sm:$0xff]  }
   0x8   :  { %153 = vmatprep.subr.bf16.mxu0 %v526_v5  ;;  %499 = vmatprep.subr.bf16.mxu1 %v547_v14  ;;  %v552_v22 = vld [vmem:[%s725_s3 + $0x20] sm:$0xff]   ;;  %v553_v24 = vld [vmem:[%s725_s3 + $0x58] sm:$0xff]   ;;  %v555_v28 = vld [vmem:[%s725_s3 + $0x50] sm:$0xff]  }
   0x9   :  { %v541_v23 = vld [vmem:[%s723_s1 + $0x4] ss:$8 sps:$4 sm:$0xff]   ;;  %v543_v25 = vld [vmem:[%s723_s1] ss:$8 sps:$4 sm:$0xff]   ;;  %v554_v26 = vld [vmem:[%s725_s3 + $0x18] sm:$0xff]  }
   0xa   :  { %v544_v27 = vld [vmem:[%s724_s0] sm:$0xff]   ;;  %v556_v29 = vld [vmem:[%s725_s3 + $0x10] sm:$0xff]   ;;  %v557_v30 = vld [vmem:[%s725_s3 + $0x48] sm:$0xff]  }
   0xb   :  { %154 = vmatpush1.bf16.msra.mxu0 %v528_v6  ;;  %500 = vmatpush3.bf16.msra.mxu1 %v548_v15  ;;  %v558_v31 = vld [vmem:[%s725_s3 + $0x8] sm:$0xff]   ;;  %v559_v32 = vld [vmem:[%s725_s3 + $0x40] sm:$0xff]  }
   0xc   :  { %155 = vmatprep.subr.bf16.mxu0 %v529_v7  ;;  %501 = vmatprep.subr.bf16.mxu1 %v549_v16  ;;  %v560_v33 = vld [vmem:[%s725_s3] sm:$0xff]  }
   0xd   :  { %v51_v38 = vld [vmem:[%s726_s2] sm:$0x3] }
   0xe   :  { %v60_v40 = vrot.slane %v51_v38, %v59_v36  ;;  %v56_v41 = vrot.slane %v51_v38, %v55_v37  ;;  %v489_v56 = vld [vmem:[%s724_s0] sm:$0xff]  }
   0xf   :  { %156 = vmatpush1.bf16.msra.mxu0 %v531_v8  ;;  %502 = vmatpush3.bf16.msra.mxu1 %v550_v19  ;;  %v481_v58 = vld [vmem:[%s727_s4] ss:$0 sm:$0xff]  ;;  %v490_v60 = vunpack.c.l.bf16 %v489_v56  ;;  %v491_v2 = vunpack.c.h.bf16 %v489_v56 }
  0x10   :  { %157 = vmatprep.subr.bf16.mxu0 %v532_v9  ;;  %503 = vmatprep.subr.bf16.mxu1 %v551_v20 }
  0x13   :  { %158 = vmatpush1.bf16.msra.mxu0 %v534_v11  ;;  %504 = vmatpush3.bf16.msra.mxu1 %v552_v22 }
  0x14   :  { %159 = vmatprep.subr.bf16.mxu0 %v535_v13  ;;  %505 = vmatprep.subr.bf16.mxu1 %v553_v24 }
  0x17   :  { %160 = vmatpush1.bf16.msra.mxu0 %v537_v17  ;;  %506 = vmatpush3.bf16.msra.mxu1 %v554_v26 }
  0x18   :  { %161 = vmatprep.subr.bf16.mxu0 %v538_v18  ;;  %507 = vmatprep.subr.bf16.mxu1 %v555_v28 }
  0x1b   :  { %162 = vmatpush1.bf16.msra.mxu0 %v540_v21  ;;  %508 = vmatpush3.bf16.msra.mxu1 %v556_v29  ;;  %v482_v21 = vld [vmem:[%s728_s5] ss:$0 sm:$0xff] }
  0x1c   :  { %163 = vmatprep.subr.bf16.mxu0 %v541_v23  ;;  %509 = vmatprep.subr.bf16.mxu1 %v557_v30 }
  0x1f   :  { %164 = vmatpush1.bf16.msra.mxu0 %v543_v25  ;;  %510 = vmatpush3.bf16.msra.mxu1 %v558_v31  ;;  %v483_v25 = vld [vmem:[%s729_s6] ss:$0 sm:$0xff] }
  0x20   :  { %511 = vmatprep.subr.bf16.mxu1 %v559_v32 }
  0x22   :  { %182 = vmatmul.mubr.bf16.vlgmr.msra.gmra.mxu0 %v544_v27 }
  0x23   :  { %512 = vmatpush3.bf16.msra.mxu1 %v560_v33 }
  0xe2   :  { %v183_v39 = vpop.f32.mrf.mxu0 }
  0xe3   :  { %v184_v46 = vadd.f32 %v183_v39, %v56_v41 }
  0xe4   :  { %v185_v42 = vpop.f32.mrf.mxu0 }
  0xe5   :  { %v186_v44 = vadd.f32 %v185_v42, %v60_v40  ;;  %v192_v52 = vmax.f32 %v184_v46, 0.0 }
  0xe6   :  { %v187_v43 = vpop.f32.mrf.mxu0 }
  0xe7   :  { %v188_v45 = vadd.f32 %v187_v43, %v56_v41  ;;  %v193_v50 = vmax.f32 %v186_v44, 0.0 }
  0xe8   :  { %v189_v47 = vpop.f32.mrf.mxu0 }
  0xe9   :  { %v190_v48 = vadd.f32 %v189_v47, %v60_v40  ;;  %v194_v49 = vmax.f32 %v188_v45, 0.0 }
  0xeb   :  { %v195_v51 = vmax.f32 %v190_v48, 0.0  ;;  %v198_v54 = vpack.c.bf16 %v194_v49, %v192_v52 }
  0xed   :  { %v199_v53 = vpack.c.bf16 %v195_v51, %v193_v50 }
  0xef   :  { %360 = vmatprep.mubr.bf16.mxu1 %v199_v53 }
  0xf0   :  { %361 = vmatmul.mubr.bf16.vlgmr.msra.gmra.mxu1 %v198_v54 }
 0x1b0   :  { %v513_v55 = vpop.f32.mrf.mxu1 }
 0x1b2   :  { %v514_v57 = vpop.f32.mrf.mxu1 }
 0x1b3   :  { %v515_v59 = vadd.f32 %v514_v57, %v513_v55 }
 0x1b4   :  { %v516_v61 = vpop.f32.mrf.mxu1 }
 0x1b5   :  { %v385_v62 = vadd.f32 %v515_v59, %v481_v58 }
 0x1b6   :  { %v517_v63 = vpop.f32.mrf.mxu1 }
 0x1b7   :  { %v518_v0 = vadd.f32 %v517_v63, %v516_v61  ;;  %v391_v1 = vadd.f32 %v490_v60, %v385_v62 }
 0x1b9   :  { %v386_v3 = vadd.f32 %v518_v0, %v481_v58  ;;  %393 = vadd.xlane.f32.xlu0 %v391_v1 }
 0x1bb   :  { %v392_v4 = vadd.f32 %v491_v2, %v386_v3 }
 0x1bd   :  { %395 = vadd.xlane.f32.xlu0 %v392_v4 }
 0x242   :  { %v394_v5 = vpop.xlane.xlu0 %393 }
 0x243   :  { %v398_v6 = vmul.f32 0.0078125, %v394_v5 }
 0x245   :  { %v400_v7 = vsub.f32 %v391_v1, %v398_v6 }
 0x246   :  { %v396_v8 = vpop.xlane.xlu0 %395 }
 0x247   :  { %v399_v9 = vmul.f32 0.0078125, %v396_v8  ;;  %v402_v10 = vmul.f32 %v400_v7, %v400_v7 }
 0x249   :  { %v401_v11 = vsub.f32 %v392_v4, %v399_v9  ;;  %404 = vadd.xlane.f32.xlu1 %v402_v10 }
 0x24b   :  { %v403_v12 = vmul.f32 %v401_v11, %v401_v11 }
 0x24d   :  { %406 = vadd.xlane.f32.xlu1 %v403_v12 }
 0x2d2   :  { %v405_v13 = vpop.xlane.xlu1 %404 }
 0x2d3   :  { %v408_v14 = vmul.f32 0.0078125, %v405_v13 }
 0x2d5   :  { %v410_v15 = vadd.f32 1e-05, %v408_v14 }
 0x2d6   :  { %v407_v16 = vpop.xlane.xlu1 %406 }
 0x2d7   :  { %561 = vrsqrt.f32 %v410_v15  ;;  %v409_v17 = vmul.f32 0.0078125, %v407_v16 }
 0x2d9   :  { %v411_v18 = vadd.f32 1e-05, %v409_v17 }
 0x2db   :  { %563 = vrsqrt.f32 %v411_v18 }
 0x2e4   :  { %v562_v19 = vpop.eup %561 }
 0x2e5   :  { %v414_v20 = vmul.f32 %v562_v19, %v400_v7 }
 0x2e7   :  { %v423_v23 = vmul.f32 %v482_v21, %v414_v20 }
 0x2e8   :  { %v564_v22 = vpop.eup %563 }
 0x2e9   :  { %v415_v24 = vmul.f32 %v564_v22, %v401_v11  ;;  %v432_v27 = vadd.f32 %v483_v25, %v423_v23 }
 0x2eb   :  { %v424_v26 = vmul.f32 %v482_v21, %v415_v24 }
 0x2ed   :  { %v433_v28 = vadd.f32 %v483_v25, %v424_v26 }
 0x2ef   :  { %v495_v29 = vpack.c.bf16 %v433_v28, %v432_v27 }
 0x2f1   :  { %496 = vst [vmem:[%s730_s7] sm:$0xff] %v495_v29  }

// kernel: seq2seq_forward.27
= control target key start
LH: loop header
LB: loop body
LE: loop exit
PB: predicated region body
PF: predicated region fallthrough
CT: control target
= control target key end

     0   :  { %v453_v0 = vmov 0.0   ;;  %vm454_vm0 = vmmov 0   ;;  %v455_v3 = vmov 0   ;;  %v306_v27 = vlaneseq  ;;  %s566_s1 = inlined_call_operand.vmem [shape: bf16[128,384], index: 1, kind: input, shape index: {}]   ;;  %s567_s0 = inlined_call_operand.vmem [shape: bf16[16,128], index: 0, kind: input, shape index: {}]   ;;  %s568_s2 = inlined_call_operand.vmem [shape: f32[1,384], index: 2, kind: input, shape index: {}]   ;;  %s569_s3 = inlined_call_operand.vmem [shape: bf16[16,384], index: 3, kind: output, shape index: {}]  }
   0x1   :  { %397 = vmatprep.subr.bf16.mxu1 %v453_v0  ;;  %v420_v1 = vld [vmem:[%s566_s1 + $0xac] ss:$12 sps:$4 sm:$0xff]   ;;  %413 = vmatprep.mubr.msk.bf16.mxu1 %vm454_vm0, %v453_v0  ;;  %v422_v2 = vld [vmem:[%s566_s1 + $0xb0] ss:$12 sps:$4 sm:$0xff]   ;;  %v423_v4 = vld [vmem:[%s566_s1 + $0xa8] ss:$12 sps:$4 sm:$0xff]  }
   0x2   :  { %231 = vmatprep.mubr.bf16.mxu0 %v455_v3  ;;  %199 = vmatprep.subr.bf16.mxu0 %v420_v1  ;;  %v424_v5 = vld [vmem:[%s566_s1 + $0x94] ss:$12 sps:$4 sm:$0xff]   ;;  %v426_v6 = vld [vmem:[%s566_s1 + $0x98] ss:$12 sps:$4 sm:$0xff]   ;;  %v427_v7 = vld [vmem:[%s566_s1 + $0x90] ss:$12 sps:$4 sm:$0xff]  }
   0x3   :  { %398 = vmatpush3.bf16.msra.mxu1 %v422_v2  ;;  %200 = vmatpush1.bf16.msra.mxu0 %v423_v4  ;;  %v428_v8 = vld [vmem:[%s566_s1 + $0x7c] ss:$12 sps:$4 sm:$0xff]   ;;  %v430_v9 = vld [vmem:[%s566_s1 + $0x80] ss:$12 sps:$4 sm:$0xff]   ;;  %v431_v10 = vld [vmem:[%s566_s1 + $0x78] ss:$12 sps:$4 sm:$0xff]  }
   0x4   :  { %399 = vmatprep.subr.bf16.mxu1 %v453_v0  ;;  %201 = vmatprep.subr.bf16.mxu0 %v424_v5  ;;  %v432_v11 = vld [vmem:[%s566_s1 + $0x64] ss:$12 sps:$4 sm:$0xff]   ;;  %v434_v12 = vld [vmem:[%s566_s1 + $0x68] ss:$12 sps:$4 sm:$0xff]   ;;  %v435_v13 = vld [vmem:[%s566_s1 + $0x60] ss:$12 sps:$4 sm:$0xff]  }
   0x5   :  { %v436_v14 = vld [vmem:[%s566_s1 + $0x4c] ss:$12 sps:$4 sm:$0xff]   ;;  %v438_v15 = vld [vmem:[%s566_s1 + $0x50] ss:$12 sps:$4 sm:$0xff]   ;;  %v439_v16 = vld [vmem:[%s566_s1 + $0x48] ss:$12 sps:$4 sm:$0xff]  }
   0x6   :  { %v440_v17 = vld [vmem:[%s566_s1 + $0x34] ss:$12 sps:$4 sm:$0xff]   ;;  %v442_v18 = vld [vmem:[%s566_s1 + $0x38] ss:$12 sps:$4 sm:$0xff]   ;;  %v443_v19 = vld [vmem:[%s566_s1 + $0x30] ss:$12 sps:$4 sm:$0xff]  }
   0x7   :  { %400 = vmatpush3.bf16.msra.mxu1 %v426_v6  ;;  %202 = vmatpush1.bf16.msra.mxu0 %v427_v7  ;;  %v444_v20 = vld [vmem:[%s566_s1 + $0x1c] ss:$12 sps:$4 sm:$0xff]   ;;  %v446_v21 = vld [vmem:[%s566_s1 + $0x20] ss:$12 sps:$4 sm:$0xff]   ;;  %v447_v22 = vld [vmem:[%s566_s1 + $0x18] ss:$12 sps:$4 sm:$0xff]  }
   0x8   :  { %401 = vmatprep.subr.bf16.mxu1 %v453_v0  ;;  %203 = vmatprep.subr.bf16.mxu0 %v428_v8  ;;  %v448_v23 = vld [vmem:[%s566_s1 + $0x4] ss:$12 sps:$4 sm:$0xff]   ;;  %v450_v24 = vld [vmem:[%s566_s1 + $0x8] ss:$12 sps:$4 sm:$0xff]   ;;  %v451_v25 = vld [vmem:[%s566_s1] ss:$12 sps:$4 sm:$0xff]  }
   0x9   :  { %v452_v26 = vld [vmem:[%s567_s0] sm:$0xff]   ;;  %v307_v28 = vshrl.u32 %v306_v27, 7 }
   0xa   :  { %v304_v30 = vld [vmem:[%s568_s2] sm:$0x7] }
   0xb   :  { %402 = vmatpush3.bf16.msra.mxu1 %v430_v9  ;;  %204 = vmatpush1.bf16.msra.mxu0 %v431_v10  ;;  %v316_v29 = vsub.s32 2, %v307_v28  ;;  %v308_v31 = vsub.s32 0, %v307_v28  ;;  %v312_v32 = vsub.s32 1, %v307_v28 }
   0xc   :  { %403 = vmatprep.subr.bf16.mxu1 %v453_v0  ;;  %205 = vmatprep.subr.bf16.mxu0 %v432_v11 }
   0xd   :  { %v317_v33 = vrot.slane %v304_v30, %v316_v29  ;;  %v309_v35 = vrot.slane %v304_v30, %v308_v31  ;;  %v313_v36 = vrot.slane %v304_v30, %v312_v32 }
   0xf   :  { %404 = vmatpush3.bf16.msra.mxu1 %v434_v12  ;;  %206 = vmatpush1.bf16.msra.mxu0 %v435_v13 }
  0x10   :  { %405 = vmatprep.subr.bf16.mxu1 %v453_v0  ;;  %207 = vmatprep.subr.bf16.mxu0 %v436_v14 }
  0x13   :  { %406 = vmatpush3.bf16.msra.mxu1 %v438_v15  ;;  %208 = vmatpush1.bf16.msra.mxu0 %v439_v16 }
  0x14   :  { %407 = vmatprep.subr.bf16.mxu1 %v453_v0  ;;  %209 = vmatprep.subr.bf16.mxu0 %v440_v17 }
  0x17   :  { %408 = vmatpush3.bf16.msra.mxu1 %v442_v18  ;;  %210 = vmatpush1.bf16.msra.mxu0 %v443_v19 }
  0x18   :  { %409 = vmatprep.subr.bf16.mxu1 %v453_v0  ;;  %211 = vmatprep.subr.bf16.mxu0 %v444_v20 }
  0x1b   :  { %410 = vmatpush3.bf16.msra.mxu1 %v446_v21  ;;  %212 = vmatpush1.bf16.msra.mxu0 %v447_v22 }
  0x1c   :  { %411 = vmatprep.subr.bf16.mxu1 %v453_v0  ;;  %213 = vmatprep.subr.bf16.mxu0 %v448_v23 }
  0x1f   :  { %412 = vmatpush3.bf16.msra.mxu1 %v450_v24  ;;  %214 = vmatpush1.bf16.msra.mxu0 %v451_v25 }
  0x22   :  { %414 = vmatmul.mubr.bf16.vlgmr.msra.gmra.mxu1 %v452_v26  ;;  %232 = vmatmul.mubr.bf16.vlgmr.msra.gmra.mxu0 %v452_v26 }
  0xe2   :  { %v276_v34 = vpop.f32.mrf.mxu1  ;;  %v233_v38 = vpop.f32.mrf.mxu0 }
  0xe3   :  { %v323_v37 = vadd.f32 %v317_v33, %v276_v34  ;;  %v321_v42 = vadd.f32 %v309_v35, %v233_v38 }
  0xe4   :  { %v415_v39 = vpop.f32.mrf.mxu1  ;;  %v235_v41 = vpop.f32.mrf.mxu0 }
  0xe5   :  { %v385_v40 = vpack.c.bf16 %v323_v37, %v323_v37  ;;  %v322_v43 = vadd.f32 %v313_v36, %v235_v41 }
  0xe6   :  { %v279_v44 = vpop.f32.mrf.mxu1  ;;  %v237_v46 = vpop.f32.mrf.mxu0 }
  0xe7   :  { %348 = vst [vmem:[%s569_s3 + $0x8] sm:$0xf] %v385_v40  ;;  %v326_v45 = vadd.f32 %v317_v33, %v279_v44  ;;  %v384_v47 = vpack.c.bf16 %v322_v43, %v321_v42  ;;  %v324_v51 = vadd.f32 %v309_v35, %v237_v46 }
  0xe8   :  { %v416_v48 = vpop.f32.mrf.mxu1  ;;  %v239_v50 = vpop.f32.mrf.mxu0 }
  0xe9   :  { %v387_v49 = vpack.c.bf16 %v326_v45, %v326_v45  ;;  %347 = vst [vmem:[%s569_s3] sm:$0xff] %v384_v47  ;;  %v325_v52 = vadd.f32 %v313_v36, %v239_v50 }
  0xeb   :  { %350 = vst [vmem:[%s569_s3 + $0x14] sm:$0xf] %v387_v49  ;;  %v386_v53 = vpack.c.bf16 %v325_v52, %v324_v51 }
  0xed   :  { %349 = vst [vmem:[%s569_s3 + $0xc] sm:$0xff] %v386_v53 }

// kernel: seq2seq_forward.28
= control target key start
LH: loop header
LB: loop body
LE: loop exit
PB: predicated region body
PF: predicated region fallthrough
CT: control target
= control target key end

     0   :  { %s1082_s15 = smov 0   ;;  %s1084_s16 = smov 0   ;;  %s1207_s0 = inlined_call_operand.vmem [shape: bf16[2,8,384], index: 0, kind: input, shape index: {}, may-alias: {0,1}]   ;;  %s1208_s1 = inlined_call_operand.vmem [shape: bf16[2,8,384], index: 1, kind: input, shape index: {}, may-alias: {0,1}]   ;;  %s1209_s2 = inlined_call_operand.vmem [shape: f32[8,8], index: 2, kind: input, shape index: {}]   ;;  %s1210_s3 = inlined_call_operand.vmem [shape: f32[2,1,8], index: 3, kind: input, shape index: {}]   ;;  %s1211_s4 = inlined_call_operand.vmem [shape: bf16[2,8,128], index: 4, kind: output, shape index: {}]  }
   0x1   :  { %s1086_s17 = smov 0  }
   0x2 LB: > { %s26_s18 = sadd.s32 1, %s1046_s16  ;;  %p893_p0 = scmp.ge.s32.totalorder %s1050_s17, 1  ;;  %s1050_s17 = sphi %s1086_s17, %s14_s17   ;;  %s1046_s16 = sphi %s1084_s16, %s1213_s16   ;;  %s1042_s15 = sphi %s1082_s15, %s1212_s15  }
   0x3   : > { %p28_p1 = scmp.ge.s32.totalorder %s26_s18, 2  ;;  %p209_p2 = scmp.lt.s32.totalorder %s1050_s17, 3 }
   0x5   : > { %s1215_s18 = smov (%p28_p1, %s26_s18), 0  ;;  %p210_p3 = pnand %p893_p0, %p209_p2 }
   0x6   : > { %p253_p4 = scmp.lt.s32.totalorder (!%p210_p3), %s1042_s15, 1  ;;  %s1054_s26 = smov (!%p210_p3), 96  }
   0x7   : > { %213 = sbr.rel (%p210_p3) target bundleno = 1107 (0x453), region = 36  ;;  %s1055_s27 = smov (!%p210_p3), 64  }
   0x8   : > { %s1056_s28 = smov (!%p210_p3), 32  }
   0xc   : > { %v1052_v0 = vmov 0.0   ;;  %vm1053_vm0 = vmmov 0   ;;  %s1217_s15 = smov (!%p253_p4, %s1042_s15), 1  ;;  %vm300_vm1 = vcmask 261120   ;;  %v288_v7 = vld [vmem:[%s1209_s2] sm:$0xff]  ;;  %vm347_vm2 = vcmask 64512  }
   0xd   : > { %932 = vmatprep.subr.bf16.mxu0 %v1052_v0  ;;  %934 = vmatprep.mubr.msk.bf16.mxu0 %vm1053_vm0, %v1052_v0  ;;  %s980_s19 = smul.u32 12, %s1217_s15  ;;  %s273_s5 = scalar_lea.vmem %s1210_s3, %s1217_s15  ;;  %vm362_vm3 = vcmask 1043456   ;;  %vm408_vm4 = vcmask 257024   ;;  %vm531_vm5 = vcmask 519424   ;;  %vm650_vm6 = vcmask 781824  }
   0xe   : > { %938 = vmatprep.subr.bf16.mxu1 %v1052_v0  ;;  %940 = vmatprep.mubr.msk.bf16.mxu1 %vm1053_vm0, %v1052_v0  ;;  %v897_v8 = vld [vmem:[%s273_s5] ss:$0 sm:$0xff]  ;;  %s896_s8 = sshll.u32 %s1217_s15, 2  ;;  %vm769_vm7 = vcmask 1044224  }
   0xf   : > { %s1112_s22 = scalar_lea.vmem %s1208_s1, %s980_s19  ;;  %s261_s25 = scalar_lea.vmem %s1207_s0, %s980_s19  ;;  %v1135_v9 = vadd.f32 %v897_v8, %v288_v7 }
  0x10   : > { %v1010_v1 = vld [vmem:[%s1112_s22 + $0x4] ss:$0 sps:$4 sm:$0xff]   ;;  %v282_v2 = vld [vmem:[%s261_s25] sm:$0xf]  ;;  %v287_v16 = vld [vmem:[%s1112_s22 + $0x8] sm:$0xf]  ;;  %s280_s11 = scalar_lea.vmem %s1211_s4, %s896_s8 }
  0x11   : > { %v283_v3 = vunpack.c.l.bf16 %v282_v2  ;;  %v305_v4 = vsel %vm300_vm1, %v1010_v1, 0  ;;  %v364_v17 = vsel %vm362_vm3, %v287_v16, 0  ;;  %v902_v49 = vcombine.low %v287_v16, %v287_v16 }
  0x12   : > { %933 = vmatpush3.bf16.xpose.msra.mxu0 %v305_v4  ;;  %939 = vmatpush3.bf16.msra.mxu1 %v364_v17 }
  0x13   : > { %v284_v5 = vmul.f32 0.17677669, %v283_v3  ;;  %950 = vmatprep.subr.bf16.mxu0 %v1052_v0  ;;  %944 = vmatprep.subr.bf16.mxu1 %v1052_v0 }
  0x15   : > { %v285_v6 = vpack.c.bf16 %v284_v5, %v284_v5 }
  0x17   : > { %411 = vrot.lane.b32.xlu1 %v285_v6, %s1054_s26 }
  0x19   : > { %935 = vmatmul.mubr.msk.bf16.vlgmr.msra.gmra.mxu0 %vm300_vm1, %v285_v6 }
  0x1a   : > { %952 = vmatprep.mubr.msk.bf16.mxu0 %vm1053_vm0, %v1052_v0 }
  0x1b   : > { %535 = vrot.lane.b32.xlu1 %v1010_v1, %s1055_s27 }
  0x1f   : > { %533 = vrot.lane.b32.xlu1 %v285_v6, %s1055_s27 }
  0x23   : > { %654 = vrot.lane.b32.xlu1 %v1010_v1, %s1056_s28 }
  0x27   : > { %652 = vrot.lane.b32.xlu1 %v285_v6, %s1056_s28 }
  0x89   : > { %v412_v23 = vpop.permute.xlu1 %411 }
  0x8d   : > { %v536_v26 = vpop.permute.xlu1 %535 }
  0x8e   : > { %v541_v27 = vsel %vm300_vm1, %v536_v26, 0 }
  0x91   : > { %v534_v28 = vpop.permute.xlu1 %533 }
  0x95   : > { %v655_v29 = vpop.permute.xlu1 %654 }
  0x96   : > { %v660_v30 = vsel %vm300_vm1, %v655_v29, 0 }
  0x99   : > { %v653_v31 = vpop.permute.xlu1 %652 }
  0xd9   : > { %v341_v10 = vpop.f32.mrf.mxu0 }
  0xda   : > { %v342_v11 = vadd.f32 %v341_v10, %v1135_v9 }
  0xdb   : > { %v936_v12 = vpop.f32.mrf.mxu0 }
  0xdc   : > { %v348_v13 = vsel %vm347_vm2, %v342_v11, -inf }
  0xdd   : > { %349 = vmax.xlane.f32.xlu0 %v348_v13  ;;  %v344_v14 = vpop.f32.mrf.mxu0 }
  0xdf   : > { %v937_v15 = vpop.f32.mrf.mxu0 }
  0xf3   : > { %413 = vrot.lane.b32.xlu0 %v1010_v1, %s1054_s26 }
 0x166   : > { %v350_v18 = vpop.xlane.xlu0 %349 }
 0x167   : > { %v351_v19 = vsub.f32 %v342_v11, %v350_v18 }
 0x169   : > { %v352_v20 = vmul.f32 1.442695, %v351_v19 }
 0x16a   : > { %v414_v21 = vpop.permute.xlu0 %413 }
 0x16b   : > { %1012 = vpow2.f32 %v352_v20  ;;  %v419_v24 = vsel %vm300_vm1, %v414_v21, 0 }
 0x178   : > { %v1143_v22 = vpop.eup %1012 }
 0x179   : > { %v358_v25 = vpack.c.bf16 %v1143_v22, %v1143_v22  ;;  %v354_v16 = vsel %vm347_vm2, %v1143_v22, 0.0 }
 0x17b   : > { %941 = vmatmul.mubr.msk.bf16.vlgmr.msra.gmra.mxu1 %vm347_vm2, %v358_v25 }
 0x17c   : > { %945 = vmatpush3.bf16.xpose.msra.mxu1 %v419_v24  ;;  %946 = vmatprep.mubr.msk.bf16.mxu1 %vm1053_vm0, %v1052_v0 }
 0x17d   : > { %956 = vmatprep.subr.bf16.mxu1 %v1052_v0 }
 0x183   : > { %947 = vmatmul.mubr.msk.bf16.vlgmr.msra.gmra.mxu1 %vm300_vm1, %v412_v23 }
 0x184   : > { %957 = vmatpush3.bf16.xpose.msra.mxu1 %v541_v27  ;;  %958 = vmatprep.mubr.msk.bf16.mxu1 %vm1053_vm0, %v1052_v0 }
 0x185   : > { %968 = vmatprep.subr.bf16.mxu1 %v1052_v0 }
 0x18b   : > { %959 = vmatmul.mubr.msk.bf16.vlgmr.msra.gmra.mxu1 %vm300_vm1, %v534_v28 }
 0x18c   : > { %969 = vmatpush3.bf16.xpose.msra.mxu1 %v660_v30  ;;  %970 = vmatprep.mubr.msk.bf16.mxu1 %vm1053_vm0, %v1052_v0 }
 0x193   : > { %971 = vmatmul.mubr.msk.bf16.vlgmr.msra.gmra.mxu1 %vm300_vm1, %v653_v31 }
 0x23b   : > { %v1162_v32 = vpop.f32.mrf.mxu1 }
 0x23d   : > { %v942_v33 = vpop.f32.mrf.mxu1 }
 0x23f   : > { %v403_v34 = vpop.f32.mrf.mxu1 }
 0x241   : > { %v943_v35 = vpop.f32.mrf.mxu1 }
 0x243   : > { %v455_v36 = vpop.f32.mrf.mxu1 }
 0x244   : > { %v456_v37 = vadd.f32 %v455_v36, %v1135_v9 }
 0x245   : > { %v948_v38 = vpop.f32.mrf.mxu1 }
 0x246   : > { %v461_v39 = vsel %vm347_vm2, %v456_v37, -inf }
 0x247   : > { %462 = vmax.xlane.f32.xlu1 %v461_v39  ;;  %v458_v40 = vpop.f32.mrf.mxu1 }
 0x249   : > { %v949_v41 = vpop.f32.mrf.mxu1 }
 0x24b   : > { %v577_v42 = vpop.f32.mrf.mxu1 }
 0x24c   : > { %v578_v43 = vadd.f32 %v577_v42, %v1135_v9 }
 0x24d   : > { %v960_v44 = vpop.f32.mrf.mxu1 }
 0x24e   : > { %v583_v45 = vsel %vm347_vm2, %v578_v43, -inf }
 0x24f   : > { %584 = vmax.xlane.f32.xlu0 %v583_v45  ;;  %v580_v46 = vpop.f32.mrf.mxu1 }
 0x251   : > { %v961_v47 = vpop.f32.mrf.mxu1 }
 0x253   : > { %v696_v48 = vpop.f32.mrf.mxu1 }
 0x254   : > { %v697_v53 = vadd.f32 %v696_v48, %v1135_v9 }
 0x255   : > { %v972_v50 = vpop.f32.mrf.mxu1 }
 0x256   : > { %v702_v54 = vsel %vm347_vm2, %v697_v53, -inf }
 0x257   : > { %v699_v51 = vpop.f32.mrf.mxu1 }
 0x258   : > { %594 = vrot.lane.b32.xlu1 %v902_v49, %s1055_s27 }
 0x259   : > { %v973_v52 = vpop.f32.mrf.mxu1 }
 0x265   : > { %475 = vrot.lane.b32.xlu0 %v902_v49, %s1054_s26 }
 0x27c   : > { %703 = vmax.xlane.f32.xlu1 %v702_v54 }
 0x28d   : > { %713 = vrot.lane.b32.xlu1 %v902_v49, %s1056_s28 }
 0x2d0   : > { %v463_v55 = vpop.xlane.xlu1 %462 }
 0x2d1   : > { %v464_v56 = vsub.f32 %v456_v37, %v463_v55 }
 0x2d3   : > { %v465_v57 = vmul.f32 1.442695, %v464_v56 }
 0x2d4   : > { %v595_v1 = vpop.permute.xlu1 %594 }
 0x2d5   : > { %1014 = vpow2.f32 %v465_v57  ;;  %v600_v4 = vsel %vm362_vm3, %v595_v1, 0 }
 0x2d8   : > { %v585_v58 = vpop.xlane.xlu0 %584 }
 0x2d9   : > { %v586_v59 = vsub.f32 %v578_v43, %v585_v58 }
 0x2db   : > { %v587_v60 = vmul.f32 1.442695, %v586_v59 }
 0x2dc   : > { %v476_v61 = vpop.permute.xlu0 %475 }
 0x2dd   : > { %1016 = vpow2.f32 %v587_v60  ;;  %v481_v62 = vsel %vm362_vm3, %v476_v61, 0 }
 0x2de   : > { %951 = vmatpush3.bf16.msra.mxu0 %v481_v62 }
 0x2df   : > { %962 = vmatprep.subr.bf16.mxu0 %v1052_v0 }
 0x2e2   : > { %v1015_v63 = vpop.eup %1014 }
 0x2e3   : > { %v467_v2 = vsel %vm347_vm2, %v1015_v63, 0.0  ;;  %v471_v3 = vpack.c.bf16 %v1015_v63, %v1015_v63 }
 0x2e4   : > { %468 = vadd.xlane.f32.xlu0 %v467_v2 }
 0x2e5   : > { %953 = vmatmul.mubr.msk.bf16.vlgmr.msra.gmra.mxu0 %vm347_vm2, %v471_v3 }
 0x2e6   : > { %963 = vmatpush3.bf16.msra.mxu0 %v600_v4  ;;  %964 = vmatprep.mubr.msk.bf16.mxu0 %vm1053_vm0, %v1052_v0 }
 0x2e7   : > { %974 = vmatprep.subr.bf16.mxu0 %v1052_v0 }
 0x2ea   : > { %v1017_v5 = vpop.eup %1016 }
 0x2eb   : > { %v589_v6 = vsel %vm347_vm2, %v1017_v5, 0.0  ;;  %v593_v7 = vpack.c.bf16 %v1017_v5, %v1017_v5 }
 0x2ec   : > { %590 = vadd.xlane.f32.xlu1 %v589_v6 }
 0x2ed   : > { %965 = vmatmul.mubr.msk.bf16.vlgmr.msra.gmra.mxu0 %vm347_vm2, %v593_v7 }
 0x2ee   : > { %976 = vmatprep.mubr.msk.bf16.mxu0 %vm1053_vm0, %v1052_v0 }
 0x305   : > { %v704_v8 = vpop.xlane.xlu1 %703 }
 0x306   : > { %v705_v9 = vsub.f32 %v697_v53, %v704_v8 }
 0x308   : > { %v706_v10 = vmul.f32 1.442695, %v705_v9 }
 0x309   : > { %v714_v11 = vpop.permute.xlu1 %713 }
 0x30a   : > { %1018 = vpow2.f32 %v706_v10  ;;  %v719_v12 = vsel %vm362_vm3, %v714_v11, 0 }
 0x30b   : > { %975 = vmatpush3.bf16.msra.mxu0 %v719_v12 }
 0x317   : > { %v1019_v13 = vpop.eup %1018 }
 0x318   : > { %v708_v14 = vsel %vm347_vm2, %v1019_v13, 0.0  ;;  %v712_v15 = vpack.c.bf16 %v1019_v13, %v1019_v13 }
 0x319   : > { %709 = vadd.xlane.f32.xlu0 %v708_v14 }
 0x31a   : > { %977 = vmatmul.mubr.msk.bf16.vlgmr.msra.gmra.mxu0 %vm347_vm2, %v712_v15 }
 0x31d   : > { %355 = vadd.xlane.f32.xlu0 %v354_v16 }
 0x36d   : > { %v469_v0 = vpop.xlane.xlu0 %468 }
 0x36e   : > { %1020 = vrcp.f32 %v469_v0 }
 0x375   : > { %v591_v17 = vpop.xlane.xlu1 %590 }
 0x376   : > { %1022 = vrcp.f32 %v591_v17 }
 0x37b   : > { %v1021_v19 = vpop.eup %1020 }
 0x383   : > { %v1023_v28 = vpop.eup %1022 }
 0x3a2   : > { %v710_v18 = vpop.xlane.xlu0 %709 }
 0x3a5   : > { %v517_v20 = vpop.f32.mrf.mxu0 }
 0x3a6   : > { %v523_v21 = vmul.f32 %v1021_v19, %v517_v20  ;;  %v356_v23 = vpop.xlane.xlu0 %355 }
 0x3a7   : > { %1024 = vrcp.f32 %v356_v23  ;;  %v954_v24 = vpop.f32.mrf.mxu0 }
 0x3a8   : > { %v913_v25 = vpack.c.bf16 %v523_v21, %v523_v21  ;;  %1026 = vrcp.f32 %v710_v18 }
 0x3a9   : > { %v520_v26 = vpop.f32.mrf.mxu0 }
 0x3aa   : > { %528 = vrot.lane.b32.xlu1 %v913_v25, %s1056_s28 }
 0x3ab   : > { %v955_v27 = vpop.f32.mrf.mxu0 }
 0x3ad   : > { %v636_v22 = vpop.f32.mrf.mxu0 }
 0x3ae   : > { %v642_v29 = vmul.f32 %v1023_v28, %v636_v22 }
 0x3af   : > { %v966_v30 = vpop.f32.mrf.mxu0 }
 0x3b0   : > { %v914_v31 = vpack.c.bf16 %v642_v29, %v642_v29 }
 0x3b1   : > { %v639_v33 = vpop.f32.mrf.mxu0 }
 0x3b2   : > { %647 = vrot.lane.b32.xlu0 %v914_v31, %s1055_s27 }
 0x3b3   : > { %v967_v34 = vpop.f32.mrf.mxu0 }
 0x3b4   : > { %v1025_v35 = vpop.eup %1024 }
 0x3b5   : > { %v406_v36 = vmul.f32 %v1025_v35, %v1162_v32  ;;  %v1027_v38 = vpop.eup %1026 }
 0x3b7   : > { %v407_v37 = vpack.c.bf16 %v406_v36, %v406_v36 }
 0x3b9   : > { %409 = vst.msk [vmem:[%s280_s11] sm:$0xf] %vm408_vm4, %v407_v37 }
 0x3da   : > { %v755_v39 = vpop.f32.mrf.mxu0 }
 0x3db   : > { %v761_v40 = vmul.f32 %v1027_v38, %v755_v39 }
 0x3dc   : > { %v978_v41 = vpop.f32.mrf.mxu0 }
 0x3dd   : > { %v915_v42 = vpack.c.bf16 %v761_v40, %v761_v40 }
 0x3de   : > { %v758_v43 = vpop.f32.mrf.mxu0 }
 0x3df   : > { %766 = vrot.lane.b32.xlu1 %v915_v42, %s1054_s26 }
 0x3e0   : > { %v979_v44 = vpop.f32.mrf.mxu0 }
 0x41c   : > { %v529_v45 = vpop.permute.xlu1 %528 }
 0x41d   : > { %532 = vst.msk [vmem:[%s280_s11] sm:$0xf] %vm531_vm5, %v529_v45 }
 0x424   : > { %v648_v32 = vpop.permute.xlu0 %647 }
 0x425   : > { %651 = vst.msk [vmem:[%s280_s11] sm:$0xf] %vm650_vm6, %v648_v32 }
 0x451   : > { %v767_v46 = vpop.permute.xlu1 %766 }
 0x452   : > { %770 = vst.msk [vmem:[%s280_s11] sm:$0xf] %vm769_vm7, %v767_v46 }
 0x453 PF: > { %s14_s17 = sadd.s32 1, %s1050_s17   ;;  %s1212_s15 = smov %s1046_s16 }
 0x454   : > { %p11_p5 = scmp.ge.s32.totalorder %s14_s17, 4   ;;  %s1213_s16 = smov %s1215_s18 }
 0x456   :  { %13 = sbr.rel (!%p11_p5) target bundleno = 2 (0x2), region = 75 }

// kernel: seq2seq_forward.39
= control target key start
LH: loop header
LB: loop body
LE: loop exit
PB: predicated region body
PF: predicated region fallthrough
CT: control target
= control target key end

     0   :  { %v227_v0 = vmov 0.0   ;;  %vm228_vm0 = vmmov 0   ;;  %s282_s1 = inlined_call_operand.vmem [shape: bf16[128,128], index: 1, kind: input, shape index: {}]   ;;  %s283_s0 = inlined_call_operand.vmem [shape: bf16[16,128], index: 0, kind: input, shape index: {}]   ;;  %s284_s2 = inlined_call_operand.vmem [shape: f32[1,128], index: 2, kind: input, shape index: {}]   ;;  %s285_s3 = inlined_call_operand.vmem [shape: bf16[16,128], index: 3, kind: output, shape index: {}]  }
   0x1   :  { %196 = vmatprep.subr.bf16.mxu0 %v227_v0  ;;  %v218_v1 = vld [vmem:[%s282_s1 + $0x38] sm:$0xff]   ;;  %212 = vmatprep.mubr.msk.bf16.mxu0 %vm228_vm0, %v227_v0  ;;  %v219_v2 = vld [vmem:[%s282_s1 + $0x30] sm:$0xff]   ;;  %v220_v3 = vld [vmem:[%s282_s1 + $0x28] sm:$0xff]  }
   0x2   :  { %197 = vmatpush3.bf16.msra.mxu0 %v218_v1  ;;  %v221_v4 = vld [vmem:[%s282_s1 + $0x20] sm:$0xff]   ;;  %v222_v5 = vld [vmem:[%s282_s1 + $0x18] sm:$0xff]   ;;  %v223_v6 = vld [vmem:[%s282_s1 + $0x10] sm:$0xff]  }
   0x3   :  { %198 = vmatprep.subr.bf16.mxu0 %v227_v0  ;;  %v224_v7 = vld [vmem:[%s282_s1 + $0x8] sm:$0xff]   ;;  %v225_v8 = vld [vmem:[%s282_s1] sm:$0xff]  }
   0x4   :  { %v226_v9 = vld [vmem:[%s283_s0] sm:$0xff]  }
   0x5   :  { %v177_v11 = vld [vmem:[%s284_s2] ss:$0 sm:$0xff] }
   0x6   :  { %199 = vmatpush3.bf16.msra.mxu0 %v219_v2 }
   0x7   :  { %200 = vmatprep.subr.bf16.mxu0 %v227_v0 }
   0xa   :  { %201 = vmatpush3.bf16.msra.mxu0 %v220_v3 }
   0xb   :  { %202 = vmatprep.subr.bf16.mxu0 %v227_v0 }
   0xe   :  { %203 = vmatpush3.bf16.msra.mxu0 %v221_v4 }
   0xf   :  { %204 = vmatprep.subr.bf16.mxu0 %v227_v0 }
  0x12   :  { %205 = vmatpush3.bf16.msra.mxu0 %v222_v5 }
  0x13   :  { %206 = vmatprep.subr.bf16.mxu0 %v227_v0 }
  0x16   :  { %207 = vmatpush3.bf16.msra.mxu0 %v223_v6 }
  0x17   :  { %208 = vmatprep.subr.bf16.mxu0 %v227_v0 }
  0x1a   :  { %209 = vmatpush3.bf16.msra.mxu0 %v224_v7 }
  0x1b   :  { %210 = vmatprep.subr.bf16.mxu0 %v227_v0 }
  0x1e   :  { %211 = vmatpush3.bf16.msra.mxu0 %v225_v8 }
  0x21   :  { %213 = vmatmul.mubr.bf16.vlgmr.msra.gmra.mxu0 %v226_v9 }
  0xe1   :  { %v129_v10 = vpop.f32.mrf.mxu0 }
  0xe2   :  { %v152_v14 = vadd.f32 %v177_v11, %v129_v10 }
  0xe3   :  { %v214_v12 = vpop.f32.mrf.mxu0 }
  0xe5   :  { %v132_v13 = vpop.f32.mrf.mxu0 }
  0xe6   :  { %v153_v15 = vadd.f32 %v177_v11, %v132_v13 }
  0xe7   :  { %v215_v16 = vpop.f32.mrf.mxu0 }
  0xe8   :  { %v185_v17 = vpack.c.bf16 %v153_v15, %v152_v14 }
  0xea   :  { %186 = vst [vmem:[%s285_s3] sm:$0xff] %v185_v17  }

// kernel: seq2seq_forward.48
= control target key start
LH: loop header
LB: loop body
LE: loop exit
PB: predicated region body
PF: predicated region fallthrough
CT: control target
= control target key end

     0   :  { %v270_v1 = vmov 0   ;;  %v191_v18 = vlaneseq  ;;  %s351_s1 = inlined_call_operand.vmem [shape: bf16[128,256], index: 1, kind: input, shape index: {}]   ;;  %s352_s0 = inlined_call_operand.vmem [shape: bf16[16,128], index: 0, kind: input, shape index: {}]   ;;  %s353_s2 = inlined_call_operand.vmem [shape: f32[1,256], index: 2, kind: input, shape index: {}]   ;;  %s354_s3 = inlined_call_operand.vmem [shape: bf16[16,256], index: 3, kind: output, shape index: {}]  }
   0x1   :  { %v245_v0 = vld [vmem:[%s351_s1 + $0x74] ss:$8 sps:$4 sm:$0xff]   ;;  %163 = vmatprep.mubr.bf16.mxu0 %v270_v1  ;;  %v247_v2 = vld [vmem:[%s351_s1 + $0x70] ss:$8 sps:$4 sm:$0xff]   ;;  %v248_v3 = vld [vmem:[%s351_s1 + $0x64] ss:$8 sps:$4 sm:$0xff]  }
   0x2   :  { %131 = vmatprep.subr.bf16.mxu0 %v245_v0  ;;  %v250_v4 = vld [vmem:[%s351_s1 + $0x60] ss:$8 sps:$4 sm:$0xff]   ;;  %v251_v5 = vld [vmem:[%s351_s1 + $0x54] ss:$8 sps:$4 sm:$0xff]   ;;  %v253_v6 = vld [vmem:[%s351_s1 + $0x50] ss:$8 sps:$4 sm:$0xff]  }
   0x3   :  { %132 = vmatpush1.bf16.msra.mxu0 %v247_v2  ;;  %v254_v7 = vld [vmem:[%s351_s1 + $0x44] ss:$8 sps:$4 sm:$0xff]   ;;  %v256_v8 = vld [vmem:[%s351_s1 + $0x40] ss:$8 sps:$4 sm:$0xff]   ;;  %v257_v9 = vld [vmem:[%s351_s1 + $0x34] ss:$8 sps:$4 sm:$0xff]  }
   0x4   :  { %133 = vmatprep.subr.bf16.mxu0 %v248_v3  ;;  %v259_v10 = vld [vmem:[%s351_s1 + $0x30] ss:$8 sps:$4 sm:$0xff]   ;;  %v260_v11 = vld [vmem:[%s351_s1 + $0x24] ss:$8 sps:$4 sm:$0xff]   ;;  %v262_v12 = vld [vmem:[%s351_s1 + $0x20] ss:$8 sps:$4 sm:$0xff]  }
   0x5   :  { %v263_v13 = vld [vmem:[%s351_s1 + $0x14] ss:$8 sps:$4 sm:$0xff]   ;;  %v265_v14 = vld [vmem:[%s351_s1 + $0x10] ss:$8 sps:$4 sm:$0xff]   ;;  %v266_v15 = vld [vmem:[%s351_s1 + $0x4] ss:$8 sps:$4 sm:$0xff]  }
   0x6   :  { %v268_v16 = vld [vmem:[%s351_s1] ss:$8 sps:$4 sm:$0xff]   ;;  %v192_v19 = vshrl.u32 %v191_v18, 7 }
   0x7   :  { %134 = vmatpush1.bf16.msra.mxu0 %v250_v4  ;;  %v269_v17 = vld [vmem:[%s352_s0] sm:$0xff]  }
   0x8   :  { %135 = vmatprep.subr.bf16.mxu0 %v251_v5  ;;  %v193_v20 = vsub.s32 0, %v192_v19  ;;  %v197_v21 = vsub.s32 1, %v192_v19  ;;  %v189_v22 = vld [vmem:[%s353_s2] sm:$0x3] }
   0xa   :  { %v194_v23 = vrot.slane %v189_v22, %v193_v20  ;;  %v198_v24 = vrot.slane %v189_v22, %v197_v21 }
   0xb   :  { %136 = vmatpush1.bf16.msra.mxu0 %v253_v6 }
   0xc   :  { %137 = vmatprep.subr.bf16.mxu0 %v254_v7 }
   0xf   :  { %138 = vmatpush1.bf16.msra.mxu0 %v256_v8 }
  0x10   :  { %139 = vmatprep.subr.bf16.mxu0 %v257_v9 }
  0x13   :  { %140 = vmatpush1.bf16.msra.mxu0 %v259_v10 }
  0x14   :  { %141 = vmatprep.subr.bf16.mxu0 %v260_v11 }
  0x17   :  { %142 = vmatpush1.bf16.msra.mxu0 %v262_v12 }
  0x18   :  { %143 = vmatprep.subr.bf16.mxu0 %v263_v13 }
  0x1b   :  { %144 = vmatpush1.bf16.msra.mxu0 %v265_v14 }
  0x1c   :  { %145 = vmatprep.subr.bf16.mxu0 %v266_v15 }
  0x1f   :  { %146 = vmatpush1.bf16.msra.mxu0 %v268_v16 }
  0x22   :  { %164 = vmatmul.mubr.bf16.vlgmr.msra.gmra.mxu0 %v269_v17 }
  0xe2   :  { %v165_v25 = vpop.f32.mrf.mxu0 }
  0xe3   :  { %v201_v27 = vadd.f32 %v194_v23, %v165_v25 }
  0xe4   :  { %v167_v26 = vpop.f32.mrf.mxu0 }
  0xe5   :  { %v202_v28 = vadd.f32 %v198_v24, %v167_v26 }
  0xe6   :  { %v169_v29 = vpop.f32.mrf.mxu0 }
  0xe7   :  { %v242_v30 = vpack.c.bf16 %v202_v28, %v201_v27  ;;  %v203_v32 = vadd.f32 %v194_v23, %v169_v29 }
  0xe8   :  { %v171_v31 = vpop.f32.mrf.mxu0 }
  0xe9   :  { %217 = vst [vmem:[%s354_s3] sm:$0xff] %v242_v30  ;;  %v204_v33 = vadd.f32 %v198_v24, %v171_v31 }
  0xeb   :  { %v243_v34 = vpack.c.bf16 %v204_v33, %v203_v32 }
  0xed   :  { %218 = vst [vmem:[%s354_s3 + $0x8] sm:$0xff] %v243_v34 }

// kernel: seq2seq_forward.35
= control target key start
LH: loop header
LB: loop body
LE: loop exit
PB: predicated region body
PF: predicated region fallthrough
CT: control target
= control target key end

     0   :  { %s124_s0 = inlined_call_operand.vmem [shape: bf16[16,128], index: 0, kind: input, shape index: {}]   ;;  %s125_s1 = inlined_call_operand.vmem [shape: f32[1,128], index: 1, kind: input, shape index: {}]   ;;  %s126_s2 = inlined_call_operand.vmem [shape: f32[1,128], index: 2, kind: input, shape index: {}]   ;;  %s127_s3 = inlined_call_operand.vmem [shape: bf16[16,128], index: 3, kind: output, shape index: {}]  }
   0x1   :  { %v80_v0 = vld [vmem:[%s124_s0] sm:$0xff]  }
   0x2   :  { %v81_v1 = vunpack.c.l.bf16 %v80_v0  ;;  %v82_v2 = vunpack.c.h.bf16 %v80_v0  ;;  %v73_v19 = vld [vmem:[%s125_s1] ss:$0 sm:$0xff] }
   0x3   :  { %v74_v23 = vld [vmem:[%s126_s2] ss:$0 sm:$0xff] }
   0x4   :  { %18 = vadd.xlane.f32.xlu0 %v81_v1 }
   0x8   :  { %20 = vadd.xlane.f32.xlu0 %v82_v2 }
  0x8d   :  { %v19_v3 = vpop.xlane.xlu0 %18 }
  0x8e   :  { %v23_v4 = vmul.f32 0.0078125, %v19_v3 }
  0x90   :  { %v25_v5 = vsub.f32 %v81_v1, %v23_v4 }
  0x91   :  { %v21_v6 = vpop.xlane.xlu0 %20 }
  0x92   :  { %v24_v7 = vmul.f32 0.0078125, %v21_v6  ;;  %v27_v8 = vmul.f32 %v25_v5, %v25_v5 }
  0x94   :  { %v26_v9 = vsub.f32 %v82_v2, %v24_v7  ;;  %29 = vadd.xlane.f32.xlu1 %v27_v8 }
  0x96   :  { %v28_v10 = vmul.f32 %v26_v9, %v26_v9 }
  0x98   :  { %31 = vadd.xlane.f32.xlu1 %v28_v10 }
 0x11d   :  { %v30_v11 = vpop.xlane.xlu1 %29 }
 0x11e   :  { %v33_v12 = vmul.f32 0.0078125, %v30_v11 }
 0x120   :  { %v35_v13 = vadd.f32 1e-05, %v33_v12 }
 0x121   :  { %v32_v14 = vpop.xlane.xlu1 %31 }
 0x122   :  { %88 = vrsqrt.f32 %v35_v13  ;;  %v34_v15 = vmul.f32 0.0078125, %v32_v14 }
 0x124   :  { %v36_v16 = vadd.f32 1e-05, %v34_v15 }
 0x126   :  { %90 = vrsqrt.f32 %v36_v16 }
 0x12f   :  { %v89_v17 = vpop.eup %88 }
 0x130   :  { %v39_v18 = vmul.f32 %v89_v17, %v25_v5 }
 0x132   :  { %v48_v21 = vmul.f32 %v73_v19, %v39_v18 }
 0x133   :  { %v91_v20 = vpop.eup %90 }
 0x134   :  { %v40_v22 = vmul.f32 %v91_v20, %v26_v9  ;;  %v57_v25 = vadd.f32 %v74_v23, %v48_v21 }
 0x136   :  { %v49_v24 = vmul.f32 %v73_v19, %v40_v22 }
 0x138   :  { %v58_v26 = vadd.f32 %v74_v23, %v49_v24 }
 0x13a   :  { %v86_v27 = vpack.c.bf16 %v58_v26, %v57_v25 }
 0x13c   :  { %87 = vst [vmem:[%s127_s3] sm:$0xff] %v86_v27  }

// kernel: seq2seq_forward.41
= control target key start
LH: loop header
LB: loop body
LE: loop exit
PB: predicated region body
PF: predicated region fallthrough
CT: control target
= control target key end

     0   :  { %s1001_s12 = smov 0   ;;  %s1003_s13 = smov 0   ;;  %s1123_s0 = inlined_call_operand.vmem [shape: bf16[2,8,128], index: 0, kind: input, shape index: {}]   ;;  %s1124_s1 = inlined_call_operand.vmem [shape: bf16[2,8,256], index: 1, kind: input, shape index: {}]   ;;  %s1125_s2 = inlined_call_operand.vmem [shape: f32[2,1,8], index: 2, kind: input, shape index: {}]   ;;  %s1126_s3 = inlined_call_operand.vmem [shape: bf16[2,8,128], index: 3, kind: output, shape index: {}]  }
   0x1   :  { %s1005_s14 = smov 0  }
   0x2 LB: > { %s25_s15 = sadd.s32 1, %s970_s13  ;;  %p816_p0 = scmp.ge.s32.totalorder %s974_s14, 1  ;;  %s974_s14 = sphi %s1005_s14, %s13_s14   ;;  %s970_s13 = sphi %s1003_s13, %s1128_s13   ;;  %s966_s12 = sphi %s1001_s12, %s1127_s12  }
   0x3   : > { %p27_p1 = scmp.ge.s32.totalorder %s25_s15, 2  ;;  %p173_p2 = scmp.lt.s32.totalorder %s974_s14, 3 }
   0x5   : > { %s1130_s15 = smov (%p27_p1, %s25_s15), 0  ;;  %p174_p3 = pnand %p816_p0, %p173_p2 }
   0x6   : > { %p209_p4 = scmp.lt.s32.totalorder (!%p174_p3), %s966_s12, 1  ;;  %s978_s24 = smov (!%p174_p3), 96  }
   0x7   : > { %177 = sbr.rel (%p174_p3) target bundleno = 1106 (0x452), region = 32  ;;  %s979_s25 = smov (!%p174_p3), 64  }
   0x8   : > { %s980_s26 = smov (!%p174_p3), 32  }
   0xc   : > { %v976_v0 = vmov 0.0   ;;  %vm977_vm0 = vmmov 0   ;;  %s1132_s12 = smov (!%p209_p4, %s966_s12), 1  ;;  %vm244_vm1 = vcmask 261120   ;;  %vm291_vm2 = vcmask 64512  }
   0xd   : > { %857 = vmatprep.subr.bf16.mxu0 %v976_v0  ;;  %859 = vmatprep.mubr.msk.bf16.mxu0 %vm977_vm0, %v976_v0  ;;  %s837_s16 = sshll.u32 %s1132_s12, 3  ;;  %s817_s17 = sshll.u32 %s1132_s12, 2  ;;  %vm309_vm3 = vcmask 1043456   ;;  %vm355_vm4 = vcmask 257024   ;;  %vm477_vm5 = vcmask 519424   ;;  %vm596_vm6 = vcmask 781824  }
   0xe   : > { %863 = vmatprep.subr.bf16.mxu1 %v976_v0  ;;  %865 = vmatprep.mubr.msk.bf16.mxu1 %vm977_vm0, %v976_v0  ;;  %s220_s20 = scalar_lea.vmem %s1124_s1, %s837_s16  ;;  %s215_s23 = scalar_lea.vmem %s1123_s0, %s817_s17  ;;  %vm715_vm7 = vcmask 1044224  }
   0xf   : > { %v236_v1 = vld [vmem:[%s220_s20] sm:$0xff]  ;;  %s223_s29 = scalar_lea.vmem %s1125_s2, %s1132_s12  ;;  %s230_s5 = scalar_lea.vmem %s1126_s3, %s817_s17 }
  0x10   : > { %v232_v2 = vld [vmem:[%s215_s23] sm:$0xf]  ;;  %v249_v3 = vsel %vm244_vm1, %v236_v1, 0  ;;  %v825_v7 = vcombine.low %v236_v1, %v236_v1  ;;  %v823_v15 = vcombine.high %v236_v1, %v236_v1 }
  0x11   : > { %v233_v4 = vunpack.c.l.bf16 %v232_v2  ;;  %858 = vmatpush3.bf16.xpose.msra.mxu0 %v249_v3  ;;  %v1051_v8 = vld [vmem:[%s223_s29] ss:$0 sm:$0xff] }
  0x12   : > { %875 = vmatprep.subr.bf16.mxu0 %v976_v0  ;;  %v311_v16 = vsel %vm309_vm3, %v823_v15, 0 }
  0x13   : > { %v234_v5 = vmul.f32 0.17677669, %v233_v4  ;;  %864 = vmatpush3.bf16.msra.mxu1 %v311_v16 }
  0x14   : > { %869 = vmatprep.subr.bf16.mxu1 %v976_v0 }
  0x15   : > { %v235_v6 = vpack.c.bf16 %v234_v5, %v234_v5 }
  0x17   : > { %358 = vrot.lane.b32.xlu1 %v235_v6, %s978_s24 }
  0x18   : > { %860 = vmatmul.mubr.msk.bf16.vlgmr.msra.gmra.mxu0 %vm244_vm1, %v235_v6 }
  0x19   : > { %877 = vmatprep.mubr.msk.bf16.mxu0 %vm977_vm0, %v976_v0 }
  0x1b   : > { %481 = vrot.lane.b32.xlu1 %v825_v7, %s979_s25 }
  0x1f   : > { %479 = vrot.lane.b32.xlu1 %v235_v6, %s979_s25 }
  0x23   : > { %600 = vrot.lane.b32.xlu1 %v825_v7, %s980_s26 }
  0x27   : > { %598 = vrot.lane.b32.xlu1 %v235_v6, %s980_s26 }
  0x89   : > { %v359_v22 = vpop.permute.xlu1 %358 }
  0x8d   : > { %v482_v25 = vpop.permute.xlu1 %481 }
  0x8e   : > { %v487_v26 = vsel %vm244_vm1, %v482_v25, 0 }
  0x91   : > { %v480_v27 = vpop.permute.xlu1 %479 }
  0x95   : > { %v601_v28 = vpop.permute.xlu1 %600 }
  0x96   : > { %v606_v29 = vsel %vm244_vm1, %v601_v28, 0 }
  0x99   : > { %v599_v30 = vpop.permute.xlu1 %598 }
  0xd8   : > { %v285_v9 = vpop.f32.mrf.mxu0 }
  0xd9   : > { %v286_v10 = vadd.f32 %v1051_v8, %v285_v9 }
  0xda   : > { %v861_v11 = vpop.f32.mrf.mxu0 }
  0xdb   : > { %v292_v12 = vsel %vm291_vm2, %v286_v10, -inf }
  0xdc   : > { %293 = vmax.xlane.f32.xlu0 %v292_v12  ;;  %v288_v13 = vpop.f32.mrf.mxu0 }
  0xde   : > { %v862_v14 = vpop.f32.mrf.mxu0 }
  0xf2   : > { %362 = vrot.lane.b32.xlu0 %v825_v7, %s978_s24 }
 0x165   : > { %v294_v17 = vpop.xlane.xlu0 %293 }
 0x166   : > { %v295_v18 = vsub.f32 %v286_v10, %v294_v17 }
 0x168   : > { %v296_v19 = vmul.f32 1.442695, %v295_v18 }
 0x169   : > { %v363_v20 = vpop.permute.xlu0 %362 }
 0x16a   : > { %936 = vpow2.f32 %v296_v19  ;;  %v368_v23 = vsel %vm244_vm1, %v363_v20, 0 }
 0x177   : > { %v1058_v21 = vpop.eup %936 }
 0x178   : > { %v302_v24 = vpack.c.bf16 %v1058_v21, %v1058_v21  ;;  %v298_v14 = vsel %vm291_vm2, %v1058_v21, 0.0 }
 0x17a   : > { %866 = vmatmul.mubr.msk.bf16.vlgmr.msra.gmra.mxu1 %vm291_vm2, %v302_v24 }
 0x17b   : > { %870 = vmatpush3.bf16.xpose.msra.mxu1 %v368_v23  ;;  %871 = vmatprep.mubr.msk.bf16.mxu1 %vm977_vm0, %v976_v0 }
 0x17c   : > { %881 = vmatprep.subr.bf16.mxu1 %v976_v0 }
 0x182   : > { %872 = vmatmul.mubr.msk.bf16.vlgmr.msra.gmra.mxu1 %vm244_vm1, %v359_v22 }
 0x183   : > { %882 = vmatpush3.bf16.xpose.msra.mxu1 %v487_v26  ;;  %883 = vmatprep.mubr.msk.bf16.mxu1 %vm977_vm0, %v976_v0 }
 0x184   : > { %893 = vmatprep.subr.bf16.mxu1 %v976_v0 }
 0x18a   : > { %884 = vmatmul.mubr.msk.bf16.vlgmr.msra.gmra.mxu1 %vm244_vm1, %v480_v27 }
 0x18b   : > { %894 = vmatpush3.bf16.xpose.msra.mxu1 %v606_v29  ;;  %895 = vmatprep.mubr.msk.bf16.mxu1 %vm977_vm0, %v976_v0 }
 0x192   : > { %896 = vmatmul.mubr.msk.bf16.vlgmr.msra.gmra.mxu1 %vm244_vm1, %v599_v30 }
 0x23a   : > { %v1077_v31 = vpop.f32.mrf.mxu1 }
 0x23c   : > { %v867_v32 = vpop.f32.mrf.mxu1 }
 0x23e   : > { %v350_v33 = vpop.f32.mrf.mxu1 }
 0x240   : > { %v868_v34 = vpop.f32.mrf.mxu1 }
 0x242   : > { %v404_v35 = vpop.f32.mrf.mxu1 }
 0x243   : > { %v405_v36 = vadd.f32 %v1051_v8, %v404_v35 }
 0x244   : > { %v873_v37 = vpop.f32.mrf.mxu1 }
 0x245   : > { %v410_v38 = vsel %vm291_vm2, %v405_v36, -inf }
 0x246   : > { %411 = vmax.xlane.f32.xlu1 %v410_v38  ;;  %v407_v39 = vpop.f32.mrf.mxu1 }
 0x248   : > { %v874_v40 = vpop.f32.mrf.mxu1 }
 0x24a   : > { %v523_v41 = vpop.f32.mrf.mxu1 }
 0x24b   : > { %v524_v42 = vadd.f32 %v1051_v8, %v523_v41 }
 0x24c   : > { %v885_v43 = vpop.f32.mrf.mxu1 }
 0x24d   : > { %v529_v44 = vsel %vm291_vm2, %v524_v42, -inf }
 0x24e   : > { %530 = vmax.xlane.f32.xlu0 %v529_v44  ;;  %v526_v45 = vpop.f32.mrf.mxu1 }
 0x250   : > { %v886_v46 = vpop.f32.mrf.mxu1 }
 0x252   : > { %v642_v47 = vpop.f32.mrf.mxu1 }
 0x253   : > { %v643_v51 = vadd.f32 %v1051_v8, %v642_v47 }
 0x254   : > { %v897_v48 = vpop.f32.mrf.mxu1 }
 0x255   : > { %v648_v52 = vsel %vm291_vm2, %v643_v51, -inf }
 0x256   : > { %v645_v49 = vpop.f32.mrf.mxu1 }
 0x257   : > { %540 = vrot.lane.b32.xlu1 %v823_v15, %s979_s25 }
 0x258   : > { %v898_v50 = vpop.f32.mrf.mxu1 }
 0x264   : > { %421 = vrot.lane.b32.xlu0 %v823_v15, %s978_s24 }
 0x27b   : > { %649 = vmax.xlane.f32.xlu1 %v648_v52 }
 0x28c   : > { %659 = vrot.lane.b32.xlu1 %v823_v15, %s980_s26 }
 0x2cf   : > { %v412_v53 = vpop.xlane.xlu1 %411 }
 0x2d0   : > { %v413_v54 = vsub.f32 %v405_v36, %v412_v53 }
 0x2d2   : > { %v414_v55 = vmul.f32 1.442695, %v413_v54 }
 0x2d3   : > { %v541_v62 = vpop.permute.xlu1 %540 }
 0x2d4   : > { %938 = vpow2.f32 %v414_v55  ;;  %v546_v2 = vsel %vm309_vm3, %v541_v62, 0 }
 0x2d7   : > { %v531_v56 = vpop.xlane.xlu0 %530 }
 0x2d8   : > { %v532_v57 = vsub.f32 %v524_v42, %v531_v56 }
 0x2da   : > { %v533_v58 = vmul.f32 1.442695, %v532_v57 }
 0x2db   : > { %v422_v59 = vpop.permute.xlu0 %421 }
 0x2dc   : > { %940 = vpow2.f32 %v533_v58  ;;  %v427_v60 = vsel %vm309_vm3, %v422_v59, 0 }
 0x2dd   : > { %876 = vmatpush3.bf16.msra.mxu0 %v427_v60 }
 0x2de   : > { %887 = vmatprep.subr.bf16.mxu0 %v976_v0 }
 0x2e1   : > { %v939_v61 = vpop.eup %938 }
 0x2e2   : > { %v416_v63 = vsel %vm291_vm2, %v939_v61, 0.0  ;;  %v420_v1 = vpack.c.bf16 %v939_v61, %v939_v61 }
 0x2e3   : > { %417 = vadd.xlane.f32.xlu0 %v416_v63 }
 0x2e4   : > { %878 = vmatmul.mubr.msk.bf16.vlgmr.msra.gmra.mxu0 %vm291_vm2, %v420_v1 }
 0x2e5   : > { %888 = vmatpush3.bf16.msra.mxu0 %v546_v2  ;;  %889 = vmatprep.mubr.msk.bf16.mxu0 %vm977_vm0, %v976_v0 }
 0x2e6   : > { %899 = vmatprep.subr.bf16.mxu0 %v976_v0 }
 0x2e9   : > { %v941_v3 = vpop.eup %940 }
 0x2ea   : > { %v535_v4 = vsel %vm291_vm2, %v941_v3, 0.0  ;;  %v539_v5 = vpack.c.bf16 %v941_v3, %v941_v3 }
 0x2eb   : > { %536 = vadd.xlane.f32.xlu1 %v535_v4 }
 0x2ec   : > { %890 = vmatmul.mubr.msk.bf16.vlgmr.msra.gmra.mxu0 %vm291_vm2, %v539_v5 }
 0x2ed   : > { %901 = vmatprep.mubr.msk.bf16.mxu0 %vm977_vm0, %v976_v0 }
 0x304   : > { %v650_v6 = vpop.xlane.xlu1 %649 }
 0x305   : > { %v651_v7 = vsub.f32 %v643_v51, %v650_v6 }
 0x307   : > { %v652_v8 = vmul.f32 1.442695, %v651_v7 }
 0x308   : > { %v660_v9 = vpop.permute.xlu1 %659 }
 0x309   : > { %942 = vpow2.f32 %v652_v8  ;;  %v665_v10 = vsel %vm309_vm3, %v660_v9, 0 }
 0x30a   : > { %900 = vmatpush3.bf16.msra.mxu0 %v665_v10 }
 0x316   : > { %v943_v11 = vpop.eup %942 }
 0x317   : > { %v654_v12 = vsel %vm291_vm2, %v943_v11, 0.0  ;;  %v658_v13 = vpack.c.bf16 %v943_v11, %v943_v11 }
 0x318   : > { %655 = vadd.xlane.f32.xlu0 %v654_v12 }
 0x319   : > { %902 = vmatmul.mubr.msk.bf16.vlgmr.msra.gmra.mxu0 %vm291_vm2, %v658_v13 }
 0x31c   : > { %299 = vadd.xlane.f32.xlu0 %v298_v14 }
 0x36c   : > { %v418_v0 = vpop.xlane.xlu0 %417 }
 0x36d   : > { %944 = vrcp.f32 %v418_v0 }
 0x374   : > { %v537_v15 = vpop.xlane.xlu1 %536 }
 0x375   : > { %946 = vrcp.f32 %v537_v15 }
 0x37a   : > { %v945_v17 = vpop.eup %944 }
 0x382   : > { %v947_v26 = vpop.eup %946 }
 0x3a1   : > { %v656_v16 = vpop.xlane.xlu0 %655 }
 0x3a4   : > { %v463_v18 = vpop.f32.mrf.mxu0 }
 0x3a5   : > { %v469_v19 = vmul.f32 %v945_v17, %v463_v18  ;;  %v300_v20 = vpop.xlane.xlu0 %299 }
 0x3a6   : > { %948 = vrcp.f32 %v300_v20  ;;  %v879_v22 = vpop.f32.mrf.mxu0 }
 0x3a7   : > { %v838_v23 = vpack.c.bf16 %v469_v19, %v469_v19  ;;  %950 = vrcp.f32 %v656_v16 }
 0x3a8   : > { %v466_v24 = vpop.f32.mrf.mxu0 }
 0x3a9   : > { %474 = vrot.lane.b32.xlu1 %v838_v23, %s980_s26 }
 0x3aa   : > { %v880_v25 = vpop.f32.mrf.mxu0 }
 0x3ac   : > { %v582_v21 = vpop.f32.mrf.mxu0 }
 0x3ad   : > { %v588_v27 = vmul.f32 %v947_v26, %v582_v21 }
 0x3ae   : > { %v891_v28 = vpop.f32.mrf.mxu0 }
 0x3af   : > { %v839_v29 = vpack.c.bf16 %v588_v27, %v588_v27 }
 0x3b0   : > { %v585_v30 = vpop.f32.mrf.mxu0 }
 0x3b1   : > { %593 = vrot.lane.b32.xlu0 %v839_v29, %s979_s25 }
 0x3b2   : > { %v892_v32 = vpop.f32.mrf.mxu0 }
 0x3b3   : > { %v949_v33 = vpop.eup %948 }
 0x3b4   : > { %v353_v34 = vmul.f32 %v949_v33, %v1077_v31  ;;  %v951_v36 = vpop.eup %950 }
 0x3b6   : > { %v354_v35 = vpack.c.bf16 %v353_v34, %v353_v34 }
 0x3b8   : > { %356 = vst.msk [vmem:[%s230_s5] sm:$0xf] %vm355_vm4, %v354_v35 }
 0x3d9   : > { %v701_v37 = vpop.f32.mrf.mxu0 }
 0x3da   : > { %v707_v38 = vmul.f32 %v951_v36, %v701_v37 }
 0x3db   : > { %v903_v39 = vpop.f32.mrf.mxu0 }
 0x3dc   : > { %v840_v40 = vpack.c.bf16 %v707_v38, %v707_v38 }
 0x3dd   : > { %v704_v41 = vpop.f32.mrf.mxu0 }
 0x3de   : > { %712 = vrot.lane.b32.xlu1 %v840_v40, %s978_s24 }
 0x3df   : > { %v904_v42 = vpop.f32.mrf.mxu0 }
 0x41b   : > { %v475_v31 = vpop.permute.xlu1 %474 }
 0x41c   : > { %478 = vst.msk [vmem:[%s230_s5] sm:$0xf] %vm477_vm5, %v475_v31 }
 0x423   : > { %v594_v43 = vpop.permute.xlu0 %593 }
 0x424   : > { %597 = vst.msk [vmem:[%s230_s5] sm:$0xf] %vm596_vm6, %v594_v43 }
 0x450   : > { %v713_v44 = vpop.permute.xlu1 %712 }
 0x451   : > { %716 = vst.msk [vmem:[%s230_s5] sm:$0xf] %vm715_vm7, %v713_v44 }
 0x452 PF: > { %s13_s14 = sadd.s32 1, %s974_s14   ;;  %s1127_s12 = smov %s970_s13 }
 0x453   : > { %p10_p5 = scmp.ge.s32.totalorder %s13_s14, 4   ;;  %s1128_s13 = smov %s1130_s15 }
 0x455   :  { %12 = sbr.rel (!%p10_p5) target bundleno = 2 (0x2), region = 68 }

// kernel: seq2seq_forward.53
= control target key start
LH: loop header
LB: loop body
LE: loop exit
PB: predicated region body
PF: predicated region fallthrough
CT: control target
= control target key end

     0   :  { %vm19_vm0 = vcmask 523264   ;;  %v212_v0 = vmov 0.0   ;;  %vm213_vm1 = vmmov 0   ;;  %s276_s1 = inlined_call_operand.vmem [shape: bf16[128,64], index: 1, kind: input, shape index: {}]   ;;  %s277_s0 = inlined_call_operand.vmem [shape: bf16[16,128], index: 0, kind: input, shape index: {}]   ;;  %s278_s2 = inlined_call_operand.vmem [shape: f32[1,64], index: 2, kind: input, shape index: {}]   ;;  %s279_s3 = inlined_call_operand.vmem [shape: f32[16,64], index: 3, kind: output, shape index: {}]  }
   0x1   :  { %181 = vmatprep.subr.bf16.mxu0 %v212_v0  ;;  %v203_v1 = vld [vmem:[%s276_s1 + $0x38] sm:$0xff]   ;;  %197 = vmatprep.mubr.msk.bf16.mxu0 %vm213_vm1, %v212_v0  ;;  %20 = vst.msk [vmem:[#allocation2] sm:$0xff] %vm19_vm0, %v212_v0  ;;  %21 = vst.msk [vmem:[#allocation2 + $0x8] sm:$0xff] %vm19_vm0, %v212_v0  ;;  %v204_v2 = vld [vmem:[%s276_s1 + $0x30] sm:$0xff]  }
   0x2   :  { %182 = vmatpush3.bf16.msra.mxu0 %v203_v1  ;;  %v205_v3 = vld [vmem:[%s276_s1 + $0x28] sm:$0xff]   ;;  %v206_v4 = vld [vmem:[%s276_s1 + $0x20] sm:$0xff]   ;;  %v207_v5 = vld [vmem:[%s276_s1 + $0x18] sm:$0xff]  }
   0x3   :  { %183 = vmatprep.subr.bf16.mxu0 %v212_v0  ;;  %v208_v6 = vld [vmem:[%s276_s1 + $0x10] sm:$0xff]   ;;  %v209_v7 = vld [vmem:[%s276_s1 + $0x8] sm:$0xff]   ;;  %v210_v8 = vld [vmem:[%s276_s1] sm:$0xff]  }
   0x4   :  { %v211_v9 = vld [vmem:[%s277_s0] sm:$0xff]  }
   0x5   :  { %v171_v18 = vld [vmem:[%s278_s2] ss:$0 sm:$0xff] }
   0x6   :  { %184 = vmatpush3.bf16.msra.mxu0 %v204_v2 }
   0x7   :  { %185 = vmatprep.subr.bf16.mxu0 %v212_v0 }
   0x8   :  { %v22_v10 = vld [vmem:[#allocation2] sm:$0xff]  ;;  %v23_v14 = vld [vmem:[#allocation2 + $0x8] sm:$0xff] }
   0xa   :  { %186 = vmatpush3.bf16.msra.mxu0 %v205_v3 }
   0xb   :  { %187 = vmatprep.subr.bf16.mxu0 %v212_v0 }
   0xe   :  { %188 = vmatpush3.bf16.msra.mxu0 %v206_v4 }
   0xf   :  { %189 = vmatprep.subr.bf16.mxu0 %v212_v0 }
  0x12   :  { %190 = vmatpush3.bf16.msra.mxu0 %v207_v5 }
  0x13   :  { %191 = vmatprep.subr.bf16.mxu0 %v212_v0 }
  0x16   :  { %192 = vmatpush3.bf16.msra.mxu0 %v208_v6 }
  0x17   :  { %193 = vmatprep.subr.bf16.mxu0 %v212_v0 }
  0x1a   :  { %194 = vmatpush3.bf16.msra.mxu0 %v209_v7 }
  0x1b   :  { %195 = vmatprep.subr.bf16.mxu0 %v212_v0 }
  0x1e   :  { %196 = vmatpush3.bf16.msra.mxu0 %v210_v8 }
  0x21   :  { %198 = vmatmul.mubr.bf16.vlgmr.msra.gmra.mxu0 %v211_v9 }
  0xe1   :  { %v130_v11 = vpop.f32.mrf.mxu0 }
  0xe2   :  { %v137_v12 = vadd.f32 %v130_v11, %v22_v10 }
  0xe3   :  { %v199_v13 = vpop.f32.mrf.mxu0 }
  0xe4   :  { %140 = vst.msk [vmem:[#allocation2] sm:$0xff] %vm19_vm0, %v137_v12 }
  0xe5   :  { %v133_v15 = vpop.f32.mrf.mxu0 }
  0xe6   :  { %v138_v16 = vadd.f32 %v133_v15, %v23_v14 }
  0xe7   :  { %v200_v17 = vpop.f32.mrf.mxu0 }
  0xe8   :  { %141 = vst.msk [vmem:[#allocation2 + $0x8] sm:$0xff] %vm19_vm0, %v138_v16 }
  0xeb   :  { %v145_v19 = vld [vmem:[#allocation2] sm:$0xff] }
  0xec   :  { %v154_v20 = vadd.f32 %v171_v18, %v145_v19 }
  0xee   :  { %156 = vst.msk [vmem:[%s279_s3] sm:$0xff] %vm19_vm0, %v154_v20 }
  0xef   :  { %v146_v21 = vld [vmem:[#allocation2 + $0x8] sm:$0xff] }
  0xf0   :  { %v155_v22 = vadd.f32 %v171_v18, %v146_v21 }
  0xf2   :  { %157 = vst.msk [vmem:[%s279_s3 + $0x8] sm:$0xff] %vm19_vm0, %v155_v22 }

</bundles_post_ra>
